<compile_context>
chip_gen: v7x
topology: tpu7x:2x2x1
jax: 0.10.0
libtpu: 0.0.40
codegen_flags: <defaults>
</compile_context>

<pallas_src>
import functools
import numpy as np
import jax
import jax.numpy as jnp
from jax.experimental import pallas as pl
from jax.experimental.pallas import tpu as pltpu

NEG_SLOPE = 0.01        # PyTorch LeakyReLU default negative_slope
BN_EPS = 1e-5           # PyTorch BatchNorm1d default eps

IMG_IN = 478 * 3        # 1434 flattened landmark features
IMG_IN_PAD = 1536       # 12 * 128 (lane-aligned K for the first matmul)
NUM_IN = 10             # numeric features
NUM_SLICE_START = IMG_IN_PAD - 128          # 1408: 128-lane-aligned slice start
X2_LANE_OFF = IMG_IN - NUM_SLICE_START      # 26: x2[j] sits at slice lane 26+j

# padded layer dims (in, out) for the 5 LeakyReLU image layers
IMG_IN_DIMS = [IMG_IN, 400, 400, 400, 100]
IMG_OUT_DIMS = [400, 400, 400, 100, 50]
IMG_IN_PADS = [IMG_IN_PAD, 512, 512, 512, 128]
IMG_OUT_PADS = [512, 512, 512, 128, 128]


# ----------------------------------------------------------------------------
# Pallas kernel
# ----------------------------------------------------------------------------
def lier_kernel(x_ref,
                w1_ref, b1_ref, w2_ref, b2_ref, w3_ref, b3_ref,
                w4_ref, b4_ref, w5_ref, b5_ref,
                wit_ref,      # (1, 128) f32 : fused (Linear 50->10) @ combiner image half
                wn1_ref,      # (5, 128) f32 : numeric Linear 10->5 (weights at lanes 26:36)
                bn1_ref,      # (5,)     f32 : SMEM, numeric Linear 10->5 bias
                wnt_ref,      # (5,)     f32 : SMEM, fused (Linear 5->5) @ combiner numeric half
                bfin_ref,     # (1, 1)   f32 : fully folded final bias
                out_ref):
    def lin(h_bf16, w_ref, b_ref):
        # bf16 operands on the MXU, f32 accumulation, f32 bias.
        return (jnp.dot(h_bf16, w_ref[...],
                        preferred_element_type=jnp.float32) + b_ref[...])

    def leaky(h):
        return jnp.where(h >= 0, h, NEG_SLOPE * h)

    x = x_ref[...]                                                # (BM, 1536) bf16

    # ---- image branch (MXU, 128-aligned): 1536 -> 512 -> 512 -> 512 -> 128 -> 128
    h = leaky(lin(x, w1_ref, b1_ref))
    h = leaky(lin(h.astype(jnp.bfloat16), w2_ref, b2_ref))
    h = leaky(lin(h.astype(jnp.bfloat16), w3_ref, b3_ref))
    h = leaky(lin(h.astype(jnp.bfloat16), w4_ref, b4_ref))
    h = leaky(lin(h.astype(jnp.bfloat16), w5_ref, b5_ref))        # (BM, 128) f32
    # fused tail (50 -> 1): VPU multiply + lane reduce, no MXU pass
    img_logit = jnp.sum(h * wit_ref[...], axis=-1, keepdims=True)  # (BM, 1)

    # ---- numeric branch (VPU/XLU only): x2 lives in the last 128-lane chunk
    x2 = x[:, NUM_SLICE_START:].astype(jnp.float32)               # (BM, 128) f32
    num_logit = jnp.zeros_like(img_logit)
    for j in range(5):                                            # static unroll
        row = wn1_ref[pl.ds(j, 1), :]                             # (1, 128)
        s = jnp.sum(x2 * row, axis=-1, keepdims=True)             # (BM, 1)
        g = jnp.maximum(s + bn1_ref[j], 0.0)                      # ReLU
        num_logit = num_logit + g * wnt_ref[j]

    out_ref[...] = jax.nn.sigmoid(img_logit + num_logit + bfin_ref[...])


# ----------------------------------------------------------------------------
# Parameter construction (deterministic, synthetic, PyTorch-style init)
# ----------------------------------------------------------------------------
def init_linear(key, out_f, in_f):
    k1, k2 = jax.random.split(key)
    bound = 1.0 / np.sqrt(in_f)
    W = jax.random.uniform(k1, (out_f, in_f), jnp.float32, -bound, bound)
    b = jax.random.uniform(k2, (out_f,), jnp.float32, -bound, bound)
    return W, b


def init_bn(key, n):
    k1, k2, k3, k4 = jax.random.split(key, 4)
    gamma = jax.random.uniform(k1, (n,), jnp.float32, 0.5, 1.5)
    beta = jax.random.uniform(k2, (n,), jnp.float32, -0.1, 0.1)
    mean = jax.random.uniform(k3, (n,), jnp.float32, -0.1, 0.1)
    var = jax.random.uniform(k4, (n,), jnp.float32, 0.5, 1.5)
    return gamma, beta, mean, var


def init_params(key):
    keys = iter(jax.random.split(key, 32))
    p = {}
    img_bn_dims = [478 * 3, 400, 400, 400, 100, 50]
    img_lin_shapes = [(400, 478 * 3), (400, 400), (400, 400),
                      (100, 400), (50, 100), (10, 50)]
    for i, (bn_d, (o, ii)) in enumerate(zip(img_bn_dims, img_lin_shapes)):
        p[f"bn_i{i}"] = init_bn(next(keys), bn_d)
        p[f"lin_i{i}"] = init_linear(next(keys), o, ii)
    for i, (bn_d, (o, ii)) in enumerate(zip([10, 5], [(5, 10), (5, 5)])):
        p[f"bn_n{i}"] = init_bn(next(keys), bn_d)
        p[f"lin_n{i}"] = init_linear(next(keys), o, ii)
    p["lin_c"] = init_linear(next(keys), 1, 15)
    return p


# ----------------------------------------------------------------------------
# Host-side folding: BN -> Linear, tail fusion, 128-aligned padding, bf16 cast
# ----------------------------------------------------------------------------
def fold_bn_into_linear(bn, W, b):
    # Linear(BN_eval(x)):  BN_eval(x) = x*s + t  =>  W_f = W * s,  b_f = b + W@t
    gamma, beta, mean, var = bn
    s = gamma * jax.lax.rsqrt(var + BN_EPS)
    t = beta - mean * s
    return W * s[None, :], b + W @ t            # (out, in), (out,)


def fold_params(raw):
    """Returns a flat list of arrays in kernel-argument order."""
    flat = []
    # image layers 0..4 (followed by LeakyReLU): MXU, (in, out) layout, bf16,
    # both dims zero-padded to multiples of 128
    for i in range(5):
        W, b = raw[f"lin_i{i}"]
        Wf, bf = fold_bn_into_linear(raw[f"bn_i{i}"], W, b)
        Wt = Wf.T                                               # (in, out)
        Wt = jnp.pad(Wt, ((0, IMG_IN_PADS[i] - IMG_IN_DIMS[i]),
                          (0, IMG_OUT_PADS[i] - IMG_OUT_DIMS[i])))
        bp = jnp.pad(bf, (0, IMG_OUT_PADS[i] - IMG_OUT_DIMS[i]))
        flat.append(Wt.astype(jnp.bfloat16))
        flat.append(bp[None, :].astype(jnp.float32))

    Wc, bc = raw["lin_c"]                                       # (1, 15), (1,)
    Wch = Wc[:, :10].T                                          # (10, 1) image half
    Wcg = Wc[:, 10:].T                                          # (5, 1)  numeric half

    # image layer 5 (Linear 50->10, no activation) fused into combiner
    W6f, b6f = fold_bn_into_linear(raw["bn_i5"], *raw["lin_i5"])   # (10,50), (10,)
    wit = (W6f.T @ Wch).T                                          # (1, 50)
    wit = jnp.pad(wit, ((0, 0), (0, 128 - 50)))                    # (1, 128)
    flat.append(wit.astype(jnp.float32))

    # numeric layer 0 (Linear 10->5 + ReLU): VPU layer; weights placed at the
    # lanes where x2 is packed inside the last 128-lane chunk of the x stream
    Wn0f, bn0f = fold_bn_into_linear(raw["bn_n0"], *raw["lin_n0"])  # (5,10), (5,)
    wn1 = jnp.zeros((5, 128), jnp.float32)
    wn1 = wn1.at[:, X2_LANE_OFF:X2_LANE_OFF + NUM_IN].set(Wn0f)     # (5, 128)
    flat.append(wn1)
    flat.append(bn0f.astype(jnp.float32))                           # (5,)  -> SMEM

    # numeric layer 1 (Linear 5->5, no activation) fused into combiner
    Wn1f, bn1f = fold_bn_into_linear(raw["bn_n1"], *raw["lin_n1"])  # (5,5), (5,)
    wnt = (Wn1f.T @ Wcg)[:, 0]                                      # (5,)  -> SMEM
    flat.append(wnt.astype(jnp.float32))

    # fully folded final bias: bc + b6@Wch + bn2@Wcg
    bfin = bc + b6f @ Wch[:, 0] + bn1f @ Wcg[:, 0]                  # (1,)
    flat.append(bfin[None, :].astype(jnp.float32))                  # (1, 1)
    return flat


# ----------------------------------------------------------------------------
# Wrapper (jitted so pad + cast + pack fuse into one host-side pass)
# ----------------------------------------------------------------------------
def _round_up(x, m):
    return (x + m - 1) // m * m


def _cdiv(a, b):
    return -(-a // b)


@functools.partial(jax.jit, static_argnames=("block_m",))
def lier_detect_forward(x1, x2, folded_params, *, block_m=512):
    B = x1.shape[0]
    x1_flat = x1.reshape(B, -1)                                    # (B, 1434)

    # adaptive block size: no near-full-block overshoot, >=2 blocks when B>block_m
    n_blocks = max(1, _cdiv(B, block_m))
    BM = _round_up(_cdiv(B, n_blocks), 8)
    B_pad = BM * n_blocks

    # single packed bf16 stream: x1 in cols 0:1434, x2 in cols 1434:1444, rest 0
    xp = jnp.zeros((B_pad, IMG_IN_PAD), jnp.bfloat16)
    xp = xp.at[:B, :IMG_IN].set(x1_flat.astype(jnp.bfloat16))
    xp = xp.at[:B, IMG_IN:IMG_IN + NUM_IN].set(x2.astype(jnp.bfloat16))

    vmem = pl.BlockSpec(memory_space=pltpu.MemorySpace.VMEM)   # full array, resident
    smem = pl.BlockSpec(memory_space=pltpu.MemorySpace.SMEM)   # tiny scalar tables
    param_specs = [smem if p.ndim == 1 else vmem for p in folded_params]

    fwd = pl.pallas_call(
        lier_kernel,
        out_shape=jax.ShapeDtypeStruct((B_pad, 1), jnp.float32),
        grid=(n_blocks,),
        in_specs=[pl.BlockSpec((BM, IMG_IN_PAD), lambda i: (i, 0)),
                  *param_specs],
        out_specs=pl.BlockSpec((BM, 1), lambda i: (i, 0)),
        compiler_params=pltpu.CompilerParams(
            dimension_semantics=("parallel",),          # shard batch over TCs (v7x)
            vmem_limit_bytes=32 * 1024 * 1024),
    )
    out = fwd(xp, *folded_params)
    return out[:B]


# ----------------------------------------------------------------------------
# Pure-JAX reference (eval-mode semantics, un-folded params) for verification
# ----------------------------------------------------------------------------
def reference_forward(x1, x2, raw):
    hi = jax.lax.Precision.HIGHEST

    def bn(x, p):
        gamma, beta, mean, var = p
        return (x - mean) / jnp.sqrt(var + BN_EPS) * gamma + beta

    def lin(x, Wb):
        W, b = Wb
        return jnp.dot(x, W.T, precision=hi) + b

    def leaky(h):
        return jnp.where(h >= 0, h, NEG_SLOPE * h)

    h = x1.reshape(x1.shape[0], -1)
    for i in range(6):
        h = lin(bn(h, raw[f"bn_i{i}"]), raw[f"lin_i{i}"])
        if i < 5:
            h = leaky(h)
    g = x2
    g = jnp.maximum(lin(bn(g, raw["bn_n0"]), raw["lin_n0"]), 0.0)
    g = lin(bn(g, raw["bn_n1"]), raw["lin_n1"])
    c = jnp.concatenate([h, g], axis=1)
    return jax.nn.sigmoid(lin(c, raw["lin_c"]))


if __name__ == "__main__":
    key = jax.random.PRNGKey(0)
    kx1, kx2, kp = jax.random.split(key, 3)
    B = 8
    x1 = jax.random.normal(kx1, (B, 478, 3), jnp.float32)   # landmark tensor
    x2 = jax.random.normal(kx2, (B, 10), jnp.float32)       # numeric features

    raw_params = init_params(kp)
    folded = fold_params(raw_params)

    out = lier_detect_forward(x1, x2, folded)
    out = jax.block_until_ready(out)

    ref = reference_forward(x1, x2, raw_params)
    # bf16 streamed inputs + bf16 matmul weights vs f32-HIGHEST reference
    np.testing.assert_allclose(np.asarray(out), np.asarray(ref),
                               rtol=2e-2, atol=2e-2)
    assert out.shape == (B, 1) and bool(jnp.all(jnp.isfinite(out)))
    print("KERNEL_OK")
</pallas_src>

<mosaic_0001>
module attributes {stable_mosaic.version = 11 : i64} {
  func.func @lier_kernel(%arg0: i32, %arg1: memref<8x1536xbf16, #tpu.memory_space<vmem>>, %arg2: memref<1536x512xbf16, #tpu.memory_space<vmem>>, %arg3: memref<1x512xf32, #tpu.memory_space<vmem>>, %arg4: memref<512x512xbf16, #tpu.memory_space<vmem>>, %arg5: memref<1x512xf32, #tpu.memory_space<vmem>>, %arg6: memref<512x512xbf16, #tpu.memory_space<vmem>>, %arg7: memref<1x512xf32, #tpu.memory_space<vmem>>, %arg8: memref<512x128xbf16, #tpu.memory_space<vmem>>, %arg9: memref<1x128xf32, #tpu.memory_space<vmem>>, %arg10: memref<128x128xbf16, #tpu.memory_space<vmem>>, %arg11: memref<1x128xf32, #tpu.memory_space<vmem>>, %arg12: memref<1x128xf32, #tpu.memory_space<vmem>>, %arg13: memref<5x128xf32, #tpu.memory_space<vmem>>, %arg14: memref<5xf32, #tpu.memory_space<smem>>, %arg15: memref<5xf32, #tpu.memory_space<smem>>, %arg16: memref<1x1xf32, #tpu.memory_space<vmem>>, %arg17: memref<8x1xf32, #tpu.memory_space<vmem>>) attributes {dimension_semantics = [#tpu.dimension_semantics<parallel>], iteration_bounds = array<i64: 1>, scalar_prefetch = 0 : i64, scratch_operands = 0 : i64, tpu.core_type = #tpu.core_type<tc>, window_params = [{transform_indices = @transform_0, window_bounds = array<i64: 8, 1536>}, {pipeline_mode = #tpu.pipeline_mode<synchronous>, transform_indices = @transform_1, window_bounds = array<i64: 1536, 512>}, {pipeline_mode = #tpu.pipeline_mode<synchronous>, transform_indices = @transform_2, window_bounds = array<i64: 1, 512>}, {pipeline_mode = #tpu.pipeline_mode<synchronous>, transform_indices = @transform_3, window_bounds = array<i64: 512, 512>}, {pipeline_mode = #tpu.pipeline_mode<synchronous>, transform_indices = @transform_4, window_bounds = array<i64: 1, 512>}, {pipeline_mode = #tpu.pipeline_mode<synchronous>, transform_indices = @transform_5, window_bounds = array<i64: 512, 512>}, {pipeline_mode = #tpu.pipeline_mode<synchronous>, transform_indices = @transform_6, window_bounds = array<i64: 1, 512>}, {pipeline_mode = #tpu.pipeline_mode<synchronous>, transform_indices = @transform_7, window_bounds = array<i64: 512, 128>}, {pipeline_mode = #tpu.pipeline_mode<synchronous>, transform_indices = @transform_8, window_bounds = array<i64: 1, 128>}, {pipeline_mode = #tpu.pipeline_mode<synchronous>, transform_indices = @transform_9, window_bounds = array<i64: 128, 128>}, {pipeline_mode = #tpu.pipeline_mode<synchronous>, transform_indices = @transform_10, window_bounds = array<i64: 1, 128>}, {pipeline_mode = #tpu.pipeline_mode<synchronous>, transform_indices = @transform_11, window_bounds = array<i64: 1, 128>}, {pipeline_mode = #tpu.pipeline_mode<synchronous>, transform_indices = @transform_12, window_bounds = array<i64: 5, 128>}, {transform_indices = @transform_13, window_bounds = array<i64: 5>}, {transform_indices = @transform_14, window_bounds = array<i64: 5>}, {pipeline_mode = #tpu.pipeline_mode<synchronous>, transform_indices = @transform_15, window_bounds = array<i64: 1, 1>}, {transform_indices = @transform_16, window_bounds = array<i64: 8, 1>}]} {
    %c0 = arith.constant 0 : index
    %c0_0 = arith.constant 0 : index
    %0 = vector.load %arg1[%c0, %c0_0] : memref<8x1536xbf16, #tpu.memory_space<vmem>>, vector<8x1536xbf16>
    %c0_1 = arith.constant 0 : index
    %c0_2 = arith.constant 0 : index
    %1 = vector.load %arg2[%c0_1, %c0_2] : memref<1536x512xbf16, #tpu.memory_space<vmem>>, vector<1536x512xbf16>
    %cst = arith.constant dense<0.000000e+00> : vector<8x512xf32>
    %2 = tpu.matmul %0, %1, %cst {dimension_numbers = #tpu.dot_dimension_numbers<[1], [0], [0], [1], [0, 0, 1, 1], [], []>} : vector<8x1536xbf16>, vector<1536x512xbf16>, vector<8x512xf32> -> vector<8x512xf32>
    %c0_3 = arith.constant 0 : index
    %c0_4 = arith.constant 0 : index
    %3 = vector.load %arg3[%c0_3, %c0_4] : memref<1x512xf32, #tpu.memory_space<vmem>>, vector<1x512xf32>
    %4 = vector.broadcast %3 : vector<1x512xf32> to vector<8x512xf32>
    %5 = arith.addf %2, %4 : vector<8x512xf32>
    %cst_5 = arith.constant 0.000000e+00 : f32
    %6 = vector.broadcast %cst_5 : f32 to vector<8x512xf32>
    %7 = arith.cmpf oge, %5, %6 : vector<8x512xf32>
    %cst_6 = arith.constant 0.00999999977 : f32
    %8 = vector.broadcast %cst_6 : f32 to vector<8x512xf32>
    %9 = arith.mulf %8, %5 : vector<8x512xf32>
    %10 = arith.select %7, %5, %9 : vector<8x512xi1>, vector<8x512xf32>
    %11 = arith.truncf %10 : vector<8x512xf32> to vector<8x512xbf16>
    %c0_7 = arith.constant 0 : index
    %c0_8 = arith.constant 0 : index
    %12 = vector.load %arg4[%c0_7, %c0_8] : memref<512x512xbf16, #tpu.memory_space<vmem>>, vector<512x512xbf16>
    %cst_9 = arith.constant dense<0.000000e+00> : vector<8x512xf32>
    %13 = tpu.matmul %11, %12, %cst_9 {dimension_numbers = #tpu.dot_dimension_numbers<[1], [0], [0], [1], [0, 0, 1, 1], [], []>} : vector<8x512xbf16>, vector<512x512xbf16>, vector<8x512xf32> -> vector<8x512xf32>
    %c0_10 = arith.constant 0 : index
    %c0_11 = arith.constant 0 : index
    %14 = vector.load %arg5[%c0_10, %c0_11] : memref<1x512xf32, #tpu.memory_space<vmem>>, vector<1x512xf32>
    %15 = vector.broadcast %14 : vector<1x512xf32> to vector<8x512xf32>
    %16 = arith.addf %13, %15 : vector<8x512xf32>
    %cst_12 = arith.constant 0.000000e+00 : f32
    %17 = vector.broadcast %cst_12 : f32 to vector<8x512xf32>
    %18 = arith.cmpf oge, %16, %17 : vector<8x512xf32>
    %cst_13 = arith.constant 0.00999999977 : f32
    %19 = vector.broadcast %cst_13 : f32 to vector<8x512xf32>
    %20 = arith.mulf %19, %16 : vector<8x512xf32>
    %21 = arith.select %18, %16, %20 : vector<8x512xi1>, vector<8x512xf32>
    %22 = arith.truncf %21 : vector<8x512xf32> to vector<8x512xbf16>
    %c0_14 = arith.constant 0 : index
    %c0_15 = arith.constant 0 : index
    %23 = vector.load %arg6[%c0_14, %c0_15] : memref<512x512xbf16, #tpu.memory_space<vmem>>, vector<512x512xbf16>
    %cst_16 = arith.constant dense<0.000000e+00> : vector<8x512xf32>
    %24 = tpu.matmul %22, %23, %cst_16 {dimension_numbers = #tpu.dot_dimension_numbers<[1], [0], [0], [1], [0, 0, 1, 1], [], []>} : vector<8x512xbf16>, vector<512x512xbf16>, vector<8x512xf32> -> vector<8x512xf32>
    %c0_17 = arith.constant 0 : index
    %c0_18 = arith.constant 0 : index
    %25 = vector.load %arg7[%c0_17, %c0_18] : memref<1x512xf32, #tpu.memory_space<vmem>>, vector<1x512xf32>
    %26 = vector.broadcast %25 : vector<1x512xf32> to vector<8x512xf32>
    %27 = arith.addf %24, %26 : vector<8x512xf32>
    %cst_19 = arith.constant 0.000000e+00 : f32
    %28 = vector.broadcast %cst_19 : f32 to vector<8x512xf32>
    %29 = arith.cmpf oge, %27, %28 : vector<8x512xf32>
    %cst_20 = arith.constant 0.00999999977 : f32
    %30 = vector.broadcast %cst_20 : f32 to vector<8x512xf32>
    %31 = arith.mulf %30, %27 : vector<8x512xf32>
    %32 = arith.select %29, %27, %31 : vector<8x512xi1>, vector<8x512xf32>
    %33 = arith.truncf %32 : vector<8x512xf32> to vector<8x512xbf16>
    %c0_21 = arith.constant 0 : index
    %c0_22 = arith.constant 0 : index
    %34 = vector.load %arg8[%c0_21, %c0_22] : memref<512x128xbf16, #tpu.memory_space<vmem>>, vector<512x128xbf16>
    %cst_23 = arith.constant dense<0.000000e+00> : vector<8x128xf32>
    %35 = tpu.matmul %33, %34, %cst_23 {dimension_numbers = #tpu.dot_dimension_numbers<[1], [0], [0], [1], [0, 0, 1, 1], [], []>} : vector<8x512xbf16>, vector<512x128xbf16>, vector<8x128xf32> -> vector<8x128xf32>
    %c0_24 = arith.constant 0 : index
    %c0_25 = arith.constant 0 : index
    %36 = vector.load %arg9[%c0_24, %c0_25] : memref<1x128xf32, #tpu.memory_space<vmem>>, vector<1x128xf32>
    %37 = vector.broadcast %36 : vector<1x128xf32> to vector<8x128xf32>
    %38 = arith.addf %35, %37 : vector<8x128xf32>
    %cst_26 = arith.constant 0.000000e+00 : f32
    %39 = vector.broadcast %cst_26 : f32 to vector<8x128xf32>
    %40 = arith.cmpf oge, %38, %39 : vector<8x128xf32>
    %cst_27 = arith.constant 0.00999999977 : f32
    %41 = vector.broadcast %cst_27 : f32 to vector<8x128xf32>
    %42 = arith.mulf %41, %38 : vector<8x128xf32>
    %43 = arith.select %40, %38, %42 : vector<8x128xi1>, vector<8x128xf32>
    %44 = arith.truncf %43 : vector<8x128xf32> to vector<8x128xbf16>
    %c0_28 = arith.constant 0 : index
    %c0_29 = arith.constant 0 : index
    %45 = vector.load %arg10[%c0_28, %c0_29] : memref<128x128xbf16, #tpu.memory_space<vmem>>, vector<128x128xbf16>
    %cst_30 = arith.constant dense<0.000000e+00> : vector<8x128xf32>
    %46 = tpu.matmul %44, %45, %cst_30 {dimension_numbers = #tpu.dot_dimension_numbers<[1], [0], [0], [1], [0, 0, 1, 1], [], []>} : vector<8x128xbf16>, vector<128x128xbf16>, vector<8x128xf32> -> vector<8x128xf32>
    %c0_31 = arith.constant 0 : index
    %c0_32 = arith.constant 0 : index
    %47 = vector.load %arg11[%c0_31, %c0_32] : memref<1x128xf32, #tpu.memory_space<vmem>>, vector<1x128xf32>
    %48 = vector.broadcast %47 : vector<1x128xf32> to vector<8x128xf32>
    %49 = arith.addf %46, %48 : vector<8x128xf32>
    %cst_33 = arith.constant 0.000000e+00 : f32
    %50 = vector.broadcast %cst_33 : f32 to vector<8x128xf32>
    %51 = arith.cmpf oge, %49, %50 : vector<8x128xf32>
    %cst_34 = arith.constant 0.00999999977 : f32
    %52 = vector.broadcast %cst_34 : f32 to vector<8x128xf32>
    %53 = arith.mulf %52, %49 : vector<8x128xf32>
    %54 = arith.select %51, %49, %53 : vector<8x128xi1>, vector<8x128xf32>
    %c0_35 = arith.constant 0 : index
    %c0_36 = arith.constant 0 : index
    %55 = vector.load %arg12[%c0_35, %c0_36] : memref<1x128xf32, #tpu.memory_space<vmem>>, vector<1x128xf32>
    %56 = vector.broadcast %55 : vector<1x128xf32> to vector<8x128xf32>
    %57 = arith.mulf %54, %56 : vector<8x128xf32>
    %cst_37 = arith.constant dense<0.000000e+00> : vector<8xf32>
    %58 = vector.multi_reduction <add>, %57, %cst_37 [1] : vector<8x128xf32> to vector<8xf32>
    %59 = vector.shape_cast %58 : vector<8xf32> to vector<8x1xf32>
    %60 = vector.extract_strided_slice %0 {offsets = [0, 1408], sizes = [8, 128], strides = [1, 1]} : vector<8x1536xbf16> to vector<8x128xbf16>
    %61 = arith.extf %60 : vector<8x128xbf16> to vector<8x128xf32>
    %cst_38 = arith.constant 0.000000e+00 : f32
    %62 = vector.broadcast %cst_38 : f32 to vector<8x1xf32>
    %c0_39 = arith.constant 0 : index
    %c0_40 = arith.constant 0 : index
    %63 = vector.load %arg13[%c0_39, %c0_40] : memref<5x128xf32, #tpu.memory_space<vmem>>, vector<1x128xf32>
    %64 = vector.broadcast %63 : vector<1x128xf32> to vector<8x128xf32>
    %65 = arith.mulf %61, %64 : vector<8x128xf32>
    %cst_41 = arith.constant dense<0.000000e+00> : vector<8xf32>
    %66 = vector.multi_reduction <add>, %65, %cst_41 [1] : vector<8x128xf32> to vector<8xf32>
    %67 = vector.shape_cast %66 : vector<8xf32> to vector<8x1xf32>
    %c0_42 = arith.constant 0 : index
    %68 = memref.load %arg14[%c0_42] : memref<5xf32, #tpu.memory_space<smem>>
    %69 = vector.broadcast %68 : f32 to vector<8x1xf32>
    %70 = arith.addf %67, %69 : vector<8x1xf32>
    %cst_43 = arith.constant 0.000000e+00 : f32
    %71 = vector.broadcast %cst_43 : f32 to vector<8x1xf32>
    %72 = arith.maximumf %70, %71 : vector<8x1xf32>
    %c0_44 = arith.constant 0 : index
    %73 = memref.load %arg15[%c0_44] : memref<5xf32, #tpu.memory_space<smem>>
    %74 = vector.broadcast %73 : f32 to vector<8x1xf32>
    %75 = arith.mulf %72, %74 : vector<8x1xf32>
    %76 = arith.addf %62, %75 : vector<8x1xf32>
    %c1 = arith.constant 1 : index
    %c0_45 = arith.constant 0 : index
    %77 = vector.load %arg13[%c1, %c0_45] : memref<5x128xf32, #tpu.memory_space<vmem>>, vector<1x128xf32>
    %78 = vector.broadcast %77 : vector<1x128xf32> to vector<8x128xf32>
    %79 = arith.mulf %61, %78 : vector<8x128xf32>
    %cst_46 = arith.constant dense<0.000000e+00> : vector<8xf32>
    %80 = vector.multi_reduction <add>, %79, %cst_46 [1] : vector<8x128xf32> to vector<8xf32>
    %81 = vector.shape_cast %80 : vector<8xf32> to vector<8x1xf32>
    %c1_47 = arith.constant 1 : index
    %82 = memref.load %arg14[%c1_47] : memref<5xf32, #tpu.memory_space<smem>>
    %83 = vector.broadcast %82 : f32 to vector<8x1xf32>
    %84 = arith.addf %81, %83 : vector<8x1xf32>
    %cst_48 = arith.constant 0.000000e+00 : f32
    %85 = vector.broadcast %cst_48 : f32 to vector<8x1xf32>
    %86 = arith.maximumf %84, %85 : vector<8x1xf32>
    %c1_49 = arith.constant 1 : index
    %87 = memref.load %arg15[%c1_49] : memref<5xf32, #tpu.memory_space<smem>>
    %88 = vector.broadcast %87 : f32 to vector<8x1xf32>
    %89 = arith.mulf %86, %88 : vector<8x1xf32>
    %90 = arith.addf %76, %89 : vector<8x1xf32>
    %c2 = arith.constant 2 : index
    %c0_50 = arith.constant 0 : index
    %91 = vector.load %arg13[%c2, %c0_50] : memref<5x128xf32, #tpu.memory_space<vmem>>, vector<1x128xf32>
    %92 = vector.broadcast %91 : vector<1x128xf32> to vector<8x128xf32>
    %93 = arith.mulf %61, %92 : vector<8x128xf32>
    %cst_51 = arith.constant dense<0.000000e+00> : vector<8xf32>
    %94 = vector.multi_reduction <add>, %93, %cst_51 [1] : vector<8x128xf32> to vector<8xf32>
    %95 = vector.shape_cast %94 : vector<8xf32> to vector<8x1xf32>
    %c2_52 = arith.constant 2 : index
    %96 = memref.load %arg14[%c2_52] : memref<5xf32, #tpu.memory_space<smem>>
    %97 = vector.broadcast %96 : f32 to vector<8x1xf32>
    %98 = arith.addf %95, %97 : vector<8x1xf32>
    %cst_53 = arith.constant 0.000000e+00 : f32
    %99 = vector.broadcast %cst_53 : f32 to vector<8x1xf32>
    %100 = arith.maximumf %98, %99 : vector<8x1xf32>
    %c2_54 = arith.constant 2 : index
    %101 = memref.load %arg15[%c2_54] : memref<5xf32, #tpu.memory_space<smem>>
    %102 = vector.broadcast %101 : f32 to vector<8x1xf32>
    %103 = arith.mulf %100, %102 : vector<8x1xf32>
    %104 = arith.addf %90, %103 : vector<8x1xf32>
    %c3 = arith.constant 3 : index
    %c0_55 = arith.constant 0 : index
    %105 = vector.load %arg13[%c3, %c0_55] : memref<5x128xf32, #tpu.memory_space<vmem>>, vector<1x128xf32>
    %106 = vector.broadcast %105 : vector<1x128xf32> to vector<8x128xf32>
    %107 = arith.mulf %61, %106 : vector<8x128xf32>
    %cst_56 = arith.constant dense<0.000000e+00> : vector<8xf32>
    %108 = vector.multi_reduction <add>, %107, %cst_56 [1] : vector<8x128xf32> to vector<8xf32>
    %109 = vector.shape_cast %108 : vector<8xf32> to vector<8x1xf32>
    %c3_57 = arith.constant 3 : index
    %110 = memref.load %arg14[%c3_57] : memref<5xf32, #tpu.memory_space<smem>>
    %111 = vector.broadcast %110 : f32 to vector<8x1xf32>
    %112 = arith.addf %109, %111 : vector<8x1xf32>
    %cst_58 = arith.constant 0.000000e+00 : f32
    %113 = vector.broadcast %cst_58 : f32 to vector<8x1xf32>
    %114 = arith.maximumf %112, %113 : vector<8x1xf32>
    %c3_59 = arith.constant 3 : index
    %115 = memref.load %arg15[%c3_59] : memref<5xf32, #tpu.memory_space<smem>>
    %116 = vector.broadcast %115 : f32 to vector<8x1xf32>
    %117 = arith.mulf %114, %116 : vector<8x1xf32>
    %118 = arith.addf %104, %117 : vector<8x1xf32>
    %c4 = arith.constant 4 : index
    %c0_60 = arith.constant 0 : index
    %119 = vector.load %arg13[%c4, %c0_60] : memref<5x128xf32, #tpu.memory_space<vmem>>, vector<1x128xf32>
    %120 = vector.broadcast %119 : vector<1x128xf32> to vector<8x128xf32>
    %121 = arith.mulf %61, %120 : vector<8x128xf32>
    %cst_61 = arith.constant dense<0.000000e+00> : vector<8xf32>
    %122 = vector.multi_reduction <add>, %121, %cst_61 [1] : vector<8x128xf32> to vector<8xf32>
    %123 = vector.shape_cast %122 : vector<8xf32> to vector<8x1xf32>
    %c4_62 = arith.constant 4 : index
    %124 = memref.load %arg14[%c4_62] : memref<5xf32, #tpu.memory_space<smem>>
    %125 = vector.broadcast %124 : f32 to vector<8x1xf32>
    %126 = arith.addf %123, %125 : vector<8x1xf32>
    %cst_63 = arith.constant 0.000000e+00 : f32
    %127 = vector.broadcast %cst_63 : f32 to vector<8x1xf32>
    %128 = arith.maximumf %126, %127 : vector<8x1xf32>
    %c4_64 = arith.constant 4 : index
    %129 = memref.load %arg15[%c4_64] : memref<5xf32, #tpu.memory_space<smem>>
    %130 = vector.broadcast %129 : f32 to vector<8x1xf32>
    %131 = arith.mulf %128, %130 : vector<8x1xf32>
    %132 = arith.addf %118, %131 : vector<8x1xf32>
    %133 = arith.addf %59, %132 : vector<8x1xf32>
    %c0_65 = arith.constant 0 : index
    %c0_66 = arith.constant 0 : index
    %134 = vector.load %arg16[%c0_65, %c0_66] : memref<1x1xf32, #tpu.memory_space<vmem>>, vector<1x1xf32>
    %135 = vector.broadcast %134 : vector<1x1xf32> to vector<8x1xf32>
    %136 = arith.addf %133, %135 : vector<8x1xf32>
    %137 = arith.negf %136 : vector<8x1xf32>
    %138 = math.exp %137 : vector<8x1xf32>
    %cst_67 = arith.constant 1.000000e+00 : f32
    %139 = vector.broadcast %cst_67 : f32 to vector<8x1xf32>
    %140 = arith.addf %139, %138 : vector<8x1xf32>
    %141 = arith.divf %139, %140 : vector<8x1xf32>
    %c0_68 = arith.constant 0 : index
    %c0_69 = arith.constant 0 : index
    %142 = vector.load %arg17[%c0_68, %c0_69] : memref<8x1xf32, #tpu.memory_space<vmem>>, vector<8x1xf32>
    tpu.vector_store %arg17[%c0_68, %c0_69], %141 {strides = array<i32>} : memref<8x1xf32, #tpu.memory_space<vmem>>, vector<8x1xf32>,
    return
  }
  func.func @transform_0(%arg0: i32) -> (i32, i32) {
    %c0_i32 = arith.constant 0 : i32
    %c0_i32_0 = arith.constant 0 : i32
    return %arg0, %c0_i32 : i32, i32
  }
  func.func @transform_1(%arg0: i32) -> (i32, i32) {
    %c0_i32 = arith.constant 0 : i32
    %c0_i32_0 = arith.constant 0 : i32
    %c0_i32_1 = arith.constant 0 : i32
    return %c0_i32, %c0_i32_0 : i32, i32
  }
  func.func @transform_2(%arg0: i32) -> (i32, i32) {
    %c0_i32 = arith.constant 0 : i32
    %c0_i32_0 = arith.constant 0 : i32
    %c0_i32_1 = arith.constant 0 : i32
    return %c0_i32, %c0_i32_0 : i32, i32
  }
  func.func @transform_3(%arg0: i32) -> (i32, i32) {
    %c0_i32 = arith.constant 0 : i32
    %c0_i32_0 = arith.constant 0 : i32
    %c0_i32_1 = arith.constant 0 : i32
    return %c0_i32, %c0_i32_0 : i32, i32
  }
  func.func @transform_4(%arg0: i32) -> (i32, i32) {
    %c0_i32 = arith.constant 0 : i32
    %c0_i32_0 = arith.constant 0 : i32
    %c0_i32_1 = arith.constant 0 : i32
    return %c0_i32, %c0_i32_0 : i32, i32
  }
  func.func @transform_5(%arg0: i32) -> (i32, i32) {
    %c0_i32 = arith.constant 0 : i32
    %c0_i32_0 = arith.constant 0 : i32
    %c0_i32_1 = arith.constant 0 : i32
    return %c0_i32, %c0_i32_0 : i32, i32
  }
  func.func @transform_6(%arg0: i32) -> (i32, i32) {
    %c0_i32 = arith.constant 0 : i32
    %c0_i32_0 = arith.constant 0 : i32
    %c0_i32_1 = arith.constant 0 : i32
    return %c0_i32, %c0_i32_0 : i32, i32
  }
  func.func @transform_7(%arg0: i32) -> (i32, i32) {
    %c0_i32 = arith.constant 0 : i32
    %c0_i32_0 = arith.constant 0 : i32
    %c0_i32_1 = arith.constant 0 : i32
    return %c0_i32, %c0_i32_0 : i32, i32
  }
  func.func @transform_8(%arg0: i32) -> (i32, i32) {
    %c0_i32 = arith.constant 0 : i32
    %c0_i32_0 = arith.constant 0 : i32
    %c0_i32_1 = arith.constant 0 : i32
    return %c0_i32, %c0_i32_0 : i32, i32
  }
  func.func @transform_9(%arg0: i32) -> (i32, i32) {
    %c0_i32 = arith.constant 0 : i32
    %c0_i32_0 = arith.constant 0 : i32
    %c0_i32_1 = arith.constant 0 : i32
    return %c0_i32, %c0_i32_0 : i32, i32
  }
  func.func @transform_10(%arg0: i32) -> (i32, i32) {
    %c0_i32 = arith.constant 0 : i32
    %c0_i32_0 = arith.constant 0 : i32
    %c0_i32_1 = arith.constant 0 : i32
    return %c0_i32, %c0_i32_0 : i32, i32
  }
  func.func @transform_11(%arg0: i32) -> (i32, i32) {
    %c0_i32 = arith.constant 0 : i32
    %c0_i32_0 = arith.constant 0 : i32
    %c0_i32_1 = arith.constant 0 : i32
    return %c0_i32, %c0_i32_0 : i32, i32
  }
  func.func @transform_12(%arg0: i32) -> (i32, i32) {
    %c0_i32 = arith.constant 0 : i32
    %c0_i32_0 = arith.constant 0 : i32
    %c0_i32_1 = arith.constant 0 : i32
    return %c0_i32, %c0_i32_0 : i32, i32
  }
  func.func @transform_13(%arg0: i32) -> i32 {
    %c0_i32 = arith.constant 0 : i32
    %c0_i32_0 = arith.constant 0 : i32
    return %c0_i32 : i32
  }
  func.func @transform_14(%arg0: i32) -> i32 {
    %c0_i32 = arith.constant 0 : i32
    %c0_i32_0 = arith.constant 0 : i32
    return %c0_i32 : i32
  }
  func.func @transform_15(%arg0: i32) -> (i32, i32) {
    %c0_i32 = arith.constant 0 : i32
    %c0_i32_0 = arith.constant 0 : i32
    %c0_i32_1 = arith.constant 0 : i32
    return %c0_i32, %c0_i32_0 : i32, i32
  }
  func.func @transform_16(%arg0: i32) -> (i32, i32) {
    %c0_i32 = arith.constant 0 : i32
    %c0_i32_0 = arith.constant 0 : i32
    return %arg0, %c0_i32 : i32, i32
  }
}

</mosaic_0001>

<bundles_post_ra>
// kernel: lier_detect_forward.1
= control target key start
LH: loop header
LB: loop body
LE: loop exit
PB: predicated region body
PF: predicated region fallthrough
CT: control target
= control target key end

     0   :  { %s9000_s0 = inlined_call_operand.vmem [shape: bf16[8,1536], index: 0, kind: input, shape index: {}]   ;;  %s9001_s1 = inlined_call_operand.vmem [shape: bf16[1536,512], index: 1, kind: input, shape index: {}]   ;;  %s9002_s2 = inlined_call_operand.vmem [shape: f32[1,512], index: 2, kind: input, shape index: {}]   ;;  %s9003_s3 = inlined_call_operand.hbm [shape: bf16[512,512], index: 3, kind: input, shape index: {}]   ;;  %s9004_s4 = inlined_call_operand.vmem [shape: f32[1,512], index: 4, kind: input, shape index: {}]   ;;  %s9005_s5 = inlined_call_operand.hbm [shape: bf16[512,512], index: 5, kind: input, shape index: {}]   ;;  %s9006_s6 = inlined_call_operand.vmem [shape: f32[1,512], index: 6, kind: input, shape index: {}]   ;;  %s9007_s7 = inlined_call_operand.vmem [shape: bf16[512,128], index: 7, kind: input, shape index: {}]   ;;  %s9008_s8 = inlined_call_operand.vmem [shape: f32[1,128], index: 8, kind: input, shape index: {}]   ;;  %s9009_s9 = inlined_call_operand.vmem [shape: bf16[128,128], index: 9, kind: input, shape index: {}]   ;;  %s9010_s10 = inlined_call_operand.vmem [shape: f32[1,128], index: 10, kind: input, shape index: {}]   ;;  %s9011_s11 = inlined_call_operand.vmem [shape: f32[1,128], index: 11, kind: input, shape index: {}]   ;;  %s9012_s12 = inlined_call_operand.vmem [shape: f32[5,128], index: 12, kind: input, shape index: {}]   ;;  %s9013_s13 = inlined_call_operand.vmem [shape: f32[5], index: 13, kind: input, shape index: {}]   ;;  %s9014_s14 = inlined_call_operand.vmem [shape: f32[5], index: 14, kind: input, shape index: {}]   ;;  %s9015_s15 = inlined_call_operand.<no memory space> [shape: f32[1,1], index: 15, kind: input, shape index: {}]   ;;  %s9016_s16 = inlined_call_operand.vmem [shape: f32[8,1], index: 16, kind: output, shape index: {}]  }
   0x1   :  { %9018 = sst [smem:[#allocation15_spill]] %s9000_s0  ;;  %v21_v0 = vstv %s9015_s15 }
   0x2   :  { %9019 = sst [smem:[#allocation16_spill]] %s9016_s16  ;;  %22 = vst [vmem:[#allocation2] sm:$0x1] %v21_v0 }
   0x3   :  { %23 = vsyncpa [#allocation4], 0 }
   0x4   :  { %24 = vsyncpa [#allocation7], 0 }
   0x5   :  { %25 = vsyncpa [#allocation5], 0 }
   0x6   :  { %26 = vsyncpa [#allocation10], 0  ;;  %s7462_s23 = smov [#allocation3]   ;;  %s7386_s27 = scalar_lea.hbm %s9003_s3, 16384 }
   0x7   :  { %s38_s24 = sshll.u32 %s7462_s23, 4  ;;  %p7387_p0 = scmp.ne.s32.totalorder %s9003_s3, %s7386_s27  ;;  %s39_s24 = int_to_ptr.vmem [resolvable:$true] %s38_s24 }
   0x8   :  { %p7390_p1 = scmp.lt.u32.totalorder %s7386_s27, %s9003_s3 }
   0xa   :  { %p7392_p2 = pnand %p7390_p1, %p7387_p0 }
   0xc   :  { %7395 = shalt.err (!%p7392_p2)
}
   0xd   :  { %s7396_s15 = scalar_lea.vmem %s39_s24, 16384  ;;  %p7401_p4 = scmp.lt.s32.totalorder %s39_s24, %s39_s24 }
   0xe   :  { %p7397_p3 = scmp.ne.s32.totalorder %s39_s24, %s7396_s15  ;;  %p7402_p5 = scmp.lt.s32.totalorder %s7396_s15, %s7396_s15 }
  0x10   :  { %p7403_p6 = por %p7402_p5, %p7401_p4 }
  0x12   :  { %p7404_p7 = pnand %p7403_p6, %p7397_p3 }
  0x14   :  { %7407 = shalt.err (!%p7404_p7)
}
  0x15   :  { %s7463_s17 = smov 256   ;;  %s7464_s18 = smov 16  }
  0x16   :  { %44 = dma.hbm_to_vmem [thread:$0]  %s9003_s3, 16384, %s39_s24, [#allocation4], %s7463_s17, %s7463_s17, %s7464_s18  }
  0x17   :  { %s7465_s21 = smov [#allocation6]   ;;  %s79_s26 = sshll.u32 %s9013_s13, 4  ;;  %s80_s26 = int_to_ptr.vmem [resolvable:$true] %s79_s26 }
  0x18   :  { %s52_s22 = sshll.u32 %s7465_s21, 4  ;;  %s7408_s29 = scalar_lea.hbm %s9005_s5, 16384  ;;  %s53_s22 = int_to_ptr.vmem [resolvable:$true] %s52_s22 }
  0x19   :  { %p7409_p8 = scmp.ne.s32.totalorder %s9005_s5, %s7408_s29  ;;  %p7412_p9 = scmp.lt.u32.totalorder %s7408_s29, %s9005_s5 }
  0x1b   :  { %p7414_p10 = pnand %p7412_p9, %p7409_p8 }
  0x1d   :  { %7417 = shalt.err (!%p7414_p10)
}
  0x1e   :  { %s7418_s3 = scalar_lea.vmem %s53_s22, 16384  ;;  %p7423_p12 = scmp.lt.s32.totalorder %s53_s22, %s53_s22 }
  0x1f   :  { %p7419_p11 = scmp.ne.s32.totalorder %s53_s22, %s7418_s3  ;;  %p7424_p13 = scmp.lt.s32.totalorder %s7418_s3, %s7418_s3 }
  0x21   :  { %p7425_p0 = por %p7424_p13, %p7423_p12 }
  0x23   :  { %p7426_p1 = pnand %p7425_p0, %p7419_p11 }
  0x25   :  { %7429 = shalt.err (!%p7426_p1)
}
  0x26   :  { %58 = dma.hbm_to_vmem [thread:$0]  %s9005_s5, 16384, %s53_s22, [#allocation7], %s7463_s17, %s7463_s17, %s7464_s18  }
  0x27   :  { %s89_s21 = sshll.u32 %s9014_s14, 4  ;;  %s7430_s23 = scalar_lea.vmem %s80_s26, 16  ;;  %s90_s21 = int_to_ptr.vmem [resolvable:$true] %s89_s21 }
  0x28   :  { %p7431_p2 = scmp.ne.s32.totalorder %s80_s26, %s7430_s23  ;;  %p7435_p3 = scmp.lt.s32.totalorder %s80_s26, %s80_s26 }
  0x29   :  { %p7436_p4 = scmp.lt.s32.totalorder %s7430_s23, %s7430_s23 }
  0x2b   :  { %p7437_p5 = por %p7436_p4, %p7435_p3 }
  0x2d   :  { %p7438_p6 = pnand %p7437_p5, %p7431_p2 }
  0x2f   :  { %7441 = shalt.err (!%p7438_p6)
}
  0x30   :  { %s7466_s16 = smov [#allocation8]   ;;  %s7442_s25 = scalar_lea.vmem %s90_s21, 16 }
  0x31   :  { %82 = dma.vmem_to_smem %s80_s26, 16, %s7466_s16, [#allocation5]  }
  0x32   :  { %p7443_p7 = scmp.ne.s32.totalorder %s90_s21, %s7442_s25  ;;  %p7447_p8 = scmp.lt.s32.totalorder %s90_s21, %s90_s21 }
  0x33   :  { %p7448_p9 = scmp.lt.s32.totalorder %s7442_s25, %s7442_s25 }
  0x35   :  { %p7449_p10 = por %p7448_p9, %p7447_p8 }
  0x37   :  { %p7450_p11 = pnand %p7449_p10, %p7443_p7 }
  0x39   :  { %7453 = shalt.err (!%p7450_p11)
}
  0x3a   :  { %s7467_s5 = smov [#allocation9]  }
  0x3b   :  { %92 = dma.vmem_to_smem %s90_s21, 16, %s7467_s5, [#allocation10]  }
  0x3c   :  { %7454 = dma.done.wait [#allocation4], 16384  }
  0x3d   :  { %7455 = vsyncadd [#allocation4], 4294950912 }
  0x3e   :  { %7456 = dma.done.wait [#allocation7], 16384  }
  0x3f   :  { %7457 = vsyncadd [#allocation7], 4294950912 }
  0x40   :  { %7458 = dma.done.wait [#allocation5], 16  }
  0x41   :  { %7459 = vsyncadd [#allocation5], 4294967280 }
  0x42   :  { %7460 = dma.done.wait [#allocation10], 16  }
  0x43   :  { %7461 = vsyncadd [#allocation10], 4294967280 }
  0x44   :  { %107 = sfence }
  0x45   :  { %v6369_v1 = vld [vmem:[%s9001_s1 + $0x4] ss:$16 sps:$4 sm:$0xff]   ;;  %v6371_v2 = vld [vmem:[%s9001_s1 + $0xc] ss:$16 sps:$4 sm:$0xff]   ;;  %v6373_v3 = vld [vmem:[%s9001_s1] ss:$16 sps:$4 sm:$0xff]  }
  0x46   :  { %2483 = vmatprep.subr.bf16.mxu0 %v6369_v1  ;;  %v6374_v4 = vld [vmem:[%s9001_s1 + $0x8] ss:$16 sps:$4 sm:$0xff]   ;;  %2729 = vmatprep.subr.bf16.mxu1 %v6371_v2  ;;  %v6375_v5 = vld [vmem:[%s9001_s1 + $0x24] ss:$16 sps:$4 sm:$0xff]   ;;  %v6377_v6 = vld [vmem:[%s9001_s1 + $0x2c] ss:$16 sps:$4 sm:$0xff]  }
  0x47   :  { %2484 = vmatpush1.bf16.msra.mxu0 %v6373_v3  ;;  %2730 = vmatpush1.bf16.msra.mxu1 %v6374_v4  ;;  %v6379_v7 = vld [vmem:[%s9001_s1 + $0x20] ss:$16 sps:$4 sm:$0xff]   ;;  %v6380_v8 = vld [vmem:[%s9001_s1 + $0x28] ss:$16 sps:$4 sm:$0xff]   ;;  %v6381_v9 = vld [vmem:[%s9001_s1 + $0x44] ss:$16 sps:$4 sm:$0xff]  }
  0x48   :  { %2485 = vmatprep.subr.bf16.mxu0 %v6375_v5  ;;  %2731 = vmatprep.subr.bf16.mxu1 %v6377_v6  ;;  %v6383_v10 = vld [vmem:[%s9001_s1 + $0x4c] ss:$16 sps:$4 sm:$0xff]   ;;  %v6385_v11 = vld [vmem:[%s9001_s1 + $0x40] ss:$16 sps:$4 sm:$0xff]   ;;  %v6386_v12 = vld [vmem:[%s9001_s1 + $0x48] ss:$16 sps:$4 sm:$0xff]  }
  0x49   :  { %v6387_v13 = vld [vmem:[%s9001_s1 + $0x64] ss:$16 sps:$4 sm:$0xff]   ;;  %v6389_v14 = vld [vmem:[%s9001_s1 + $0x6c] ss:$16 sps:$4 sm:$0xff]   ;;  %v6391_v15 = vld [vmem:[%s9001_s1 + $0x60] ss:$16 sps:$4 sm:$0xff]  }
  0x4a   :  { %v6392_v16 = vld [vmem:[%s9001_s1 + $0x68] ss:$16 sps:$4 sm:$0xff]   ;;  %v6393_v17 = vld [vmem:[%s9001_s1 + $0x84] ss:$16 sps:$4 sm:$0xff]   ;;  %v6395_v18 = vld [vmem:[%s9001_s1 + $0x8c] ss:$16 sps:$4 sm:$0xff]  }
  0x4b   :  { %2486 = vmatpush1.bf16.msra.mxu0 %v6379_v7  ;;  %2732 = vmatpush1.bf16.msra.mxu1 %v6380_v8  ;;  %v6397_v19 = vld [vmem:[%s9001_s1 + $0x80] ss:$16 sps:$4 sm:$0xff]   ;;  %v6398_v20 = vld [vmem:[%s9001_s1 + $0x88] ss:$16 sps:$4 sm:$0xff]   ;;  %v6399_v21 = vld [vmem:[%s9001_s1 + $0xa4] ss:$16 sps:$4 sm:$0xff]  }
  0x4c   :  { %2487 = vmatprep.subr.bf16.mxu0 %v6381_v9  ;;  %2733 = vmatprep.subr.bf16.mxu1 %v6383_v10  ;;  %v6401_v22 = vld [vmem:[%s9001_s1 + $0xac] ss:$16 sps:$4 sm:$0xff]   ;;  %v6403_v23 = vld [vmem:[%s9001_s1 + $0xa0] ss:$16 sps:$4 sm:$0xff]   ;;  %v6404_v24 = vld [vmem:[%s9001_s1 + $0xa8] ss:$16 sps:$4 sm:$0xff]  }
  0x4d   :  { %v6405_v25 = vld [vmem:[%s9001_s1 + $0xc4] ss:$16 sps:$4 sm:$0xff]   ;;  %v6407_v26 = vld [vmem:[%s9001_s1 + $0xcc] ss:$16 sps:$4 sm:$0xff]   ;;  %v6409_v27 = vld [vmem:[%s9001_s1 + $0xc0] ss:$16 sps:$4 sm:$0xff]  }
  0x4e   :  { %v6410_v28 = vld [vmem:[%s9001_s1 + $0xc8] ss:$16 sps:$4 sm:$0xff]   ;;  %v6411_v29 = vld [vmem:[%s9001_s1 + $0xe4] ss:$16 sps:$4 sm:$0xff]   ;;  %v6413_v30 = vld [vmem:[%s9001_s1 + $0xec] ss:$16 sps:$4 sm:$0xff]  }
  0x4f   :  { %2488 = vmatpush1.bf16.msra.mxu0 %v6385_v11  ;;  %2734 = vmatpush1.bf16.msra.mxu1 %v6386_v12  ;;  %v6415_v31 = vld [vmem:[%s9001_s1 + $0xe0] ss:$16 sps:$4 sm:$0xff]   ;;  %v6416_v32 = vld [vmem:[%s9001_s1 + $0xe8] ss:$16 sps:$4 sm:$0xff]   ;;  %v6417_v33 = vld [vmem:[%s9001_s1 + $0x104] ss:$16 sps:$4 sm:$0xff]  }
  0x50   :  { %2489 = vmatprep.subr.bf16.mxu0 %v6387_v13  ;;  %2735 = vmatprep.subr.bf16.mxu1 %v6389_v14  ;;  %v6419_v34 = vld [vmem:[%s9001_s1 + $0x10c] ss:$16 sps:$4 sm:$0xff]   ;;  %v6421_v35 = vld [vmem:[%s9001_s1 + $0x100] ss:$16 sps:$4 sm:$0xff]   ;;  %v6422_v36 = vld [vmem:[%s9001_s1 + $0x108] ss:$16 sps:$4 sm:$0xff]  }
  0x51   :  { %v6423_v37 = vld [vmem:[%s9001_s1 + $0x124] ss:$16 sps:$4 sm:$0xff]   ;;  %v6425_v38 = vld [vmem:[%s9001_s1 + $0x12c] ss:$16 sps:$4 sm:$0xff]   ;;  %v6427_v39 = vld [vmem:[%s9001_s1 + $0x120] ss:$16 sps:$4 sm:$0xff]  }
  0x52   :  { %v6428_v40 = vld [vmem:[%s9001_s1 + $0x128] ss:$16 sps:$4 sm:$0xff]   ;;  %v6429_v41 = vld [vmem:[%s9001_s1 + $0x144] ss:$16 sps:$4 sm:$0xff]   ;;  %v6431_v42 = vld [vmem:[%s9001_s1 + $0x14c] ss:$16 sps:$4 sm:$0xff]  }
  0x53   :  { %2490 = vmatpush1.bf16.msra.mxu0 %v6391_v15  ;;  %2736 = vmatpush1.bf16.msra.mxu1 %v6392_v16  ;;  %v6433_v43 = vld [vmem:[%s9001_s1 + $0x140] ss:$16 sps:$4 sm:$0xff]   ;;  %v6434_v44 = vld [vmem:[%s9001_s1 + $0x148] ss:$16 sps:$4 sm:$0xff]   ;;  %v6435_v45 = vld [vmem:[%s9001_s1 + $0x164] ss:$16 sps:$4 sm:$0xff]  }
  0x54   :  { %2491 = vmatprep.subr.bf16.mxu0 %v6393_v17  ;;  %2737 = vmatprep.subr.bf16.mxu1 %v6395_v18  ;;  %v6437_v46 = vld [vmem:[%s9001_s1 + $0x16c] ss:$16 sps:$4 sm:$0xff]   ;;  %s9020_s15 = sld [smem:[#allocation15_spill]]  ;;  %v6439_v48 = vld [vmem:[%s9001_s1 + $0x160] ss:$16 sps:$4 sm:$0xff]   ;;  %vm7469_vm12 = vmmov 0  }
  0x55   :  { %v6440_v50 = vld [vmem:[%s9001_s1 + $0x168] ss:$16 sps:$4 sm:$0xff]   ;;  %v6441_v51 = vld [vmem:[%s9001_s1 + $0x184] ss:$16 sps:$4 sm:$0xff]   ;;  %v6443_v52 = vld [vmem:[%s9001_s1 + $0x18c] ss:$16 sps:$4 sm:$0xff]  }
  0x56   :  { %v6445_v53 = vld [vmem:[%s9001_s1 + $0x180] ss:$16 sps:$4 sm:$0xff]   ;;  %v6446_v54 = vld [vmem:[%s9001_s1 + $0x188] ss:$16 sps:$4 sm:$0xff]   ;;  %v6447_v55 = vld [vmem:[%s9001_s1 + $0x1a4] ss:$16 sps:$4 sm:$0xff]  }
  0x57   :  { %2492 = vmatpush1.bf16.msra.mxu0 %v6397_v19  ;;  %2738 = vmatpush1.bf16.msra.mxu1 %v6398_v20  ;;  %v6449_v56 = vld [vmem:[%s9001_s1 + $0x1ac] ss:$16 sps:$4 sm:$0xff]   ;;  %v6451_v57 = vld [vmem:[%s9001_s1 + $0x1a0] ss:$16 sps:$4 sm:$0xff]   ;;  %v6452_v58 = vld [vmem:[%s9001_s1 + $0x1a8] ss:$16 sps:$4 sm:$0xff]  }
  0x58   :  { %2493 = vmatprep.subr.bf16.mxu0 %v6399_v21  ;;  %2739 = vmatprep.subr.bf16.mxu1 %v6401_v22  ;;  %v6453_v59 = vld [vmem:[%s9001_s1 + $0x1c4] ss:$16 sps:$4 sm:$0xff]   ;;  %v6455_v60 = vld [vmem:[%s9001_s1 + $0x1cc] ss:$16 sps:$4 sm:$0xff]   ;;  %v6457_v61 = vld [vmem:[%s9001_s1 + $0x1c0] ss:$16 sps:$4 sm:$0xff]  }
  0x59   :  { %v6458_v62 = vld [vmem:[%s9001_s1 + $0x1c8] ss:$16 sps:$4 sm:$0xff]   ;;  %v6459_v63 = vld [vmem:[%s9001_s1 + $0x1e4] ss:$16 sps:$4 sm:$0xff]   ;;  %v6461_v0 = vld [vmem:[%s9001_s1 + $0x1ec] ss:$16 sps:$4 sm:$0xff]  }
  0x5a   :  { %v109_v47 = vld [vmem:[%s9020_s15] sm:$0xff]  ;;  %v6464_v2 = vld [vmem:[%s9001_s1 + $0x1e8] ss:$16 sps:$4 sm:$0xff]   ;;  %v6472_v4 = vld [vmem:[%s9001_s1 + $0x20c] ss:$16 sps:$4 sm:$0xff]   ;;  %s6207_s25 = sld [smem:[#allocation8 + $0x1]] }
  0x5b   :  { %2494 = vmatpush1.bf16.msra.mxu0 %v6403_v23  ;;  %2740 = vmatpush1.bf16.msra.mxu1 %v6404_v24  ;;  %v5511_v49 = vcombine.high %v109_v47, %v109_v47  ;;  %v6463_v1 = vld [vmem:[%s9001_s1 + $0x1e0] ss:$16 sps:$4 sm:$0xff]   ;;  %v6469_v3 = vld [vmem:[%s9001_s1 + $0x204] ss:$16 sps:$4 sm:$0xff]   ;;  %v5510_v5 = vcombine.low %v109_v47, %v109_v47  ;;  %v6470_v7 = vld [vmem:[%s9001_s1 + $0x208] ss:$16 sps:$4 sm:$0xff]  }
  0x5c   :  { %2495 = vmatprep.subr.bf16.mxu0 %v6405_v25  ;;  %2741 = vmatprep.subr.bf16.mxu1 %v6407_v26  ;;  %v6467_v6 = vld [vmem:[%s9001_s1 + $0x200] ss:$16 sps:$4 sm:$0xff]   ;;  %v6475_v8 = vld [vmem:[%s9001_s1 + $0x224] ss:$16 sps:$4 sm:$0xff]   ;;  %v6478_v9 = vld [vmem:[%s9001_s1 + $0x22c] ss:$16 sps:$4 sm:$0xff]  }
  0x5d   :  { %2515 = vmatprep.mubr.bf16.mxu0 %v5511_v49  ;;  %2761 = vmatprep.mubr.bf16.mxu1 %v5511_v49  ;;  %v6473_v10 = vld [vmem:[%s9001_s1 + $0x220] ss:$16 sps:$4 sm:$0xff]   ;;  %v6476_v11 = vld [vmem:[%s9001_s1 + $0x228] ss:$16 sps:$4 sm:$0xff]   ;;  %v6481_v12 = vld [vmem:[%s9001_s1 + $0x244] ss:$16 sps:$4 sm:$0xff]  }
  0x5e   :  { %v6484_v13 = vld [vmem:[%s9001_s1 + $0x24c] ss:$16 sps:$4 sm:$0xff]   ;;  %v6479_v14 = vld [vmem:[%s9001_s1 + $0x240] ss:$16 sps:$4 sm:$0xff]   ;;  %v6482_v15 = vld [vmem:[%s9001_s1 + $0x248] ss:$16 sps:$4 sm:$0xff]  }
  0x5f   :  { %2496 = vmatpush1.bf16.msra.mxu0 %v6409_v27  ;;  %2742 = vmatpush1.bf16.msra.mxu1 %v6410_v28  ;;  %v6487_v16 = vld [vmem:[%s9001_s1 + $0x264] ss:$16 sps:$4 sm:$0xff]   ;;  %v6490_v17 = vld [vmem:[%s9001_s1 + $0x26c] ss:$16 sps:$4 sm:$0xff]   ;;  %v6485_v18 = vld [vmem:[%s9001_s1 + $0x260] ss:$16 sps:$4 sm:$0xff]  }
  0x60   :  { %2497 = vmatprep.subr.bf16.mxu0 %v6411_v29  ;;  %2743 = vmatprep.subr.bf16.mxu1 %v6413_v30  ;;  %v6488_v19 = vld [vmem:[%s9001_s1 + $0x268] ss:$16 sps:$4 sm:$0xff]   ;;  %v6493_v20 = vld [vmem:[%s9001_s1 + $0x284] ss:$16 sps:$4 sm:$0xff]   ;;  %v6496_v21 = vld [vmem:[%s9001_s1 + $0x28c] ss:$16 sps:$4 sm:$0xff]  }
  0x61   :  { %v6491_v22 = vld [vmem:[%s9001_s1 + $0x280] ss:$16 sps:$4 sm:$0xff]   ;;  %v6494_v23 = vld [vmem:[%s9001_s1 + $0x288] ss:$16 sps:$4 sm:$0xff]   ;;  %v6499_v24 = vld [vmem:[%s9001_s1 + $0x2a4] ss:$16 sps:$4 sm:$0xff]  }
  0x62   :  { %v6502_v25 = vld [vmem:[%s9001_s1 + $0x2ac] ss:$16 sps:$4 sm:$0xff]   ;;  %v6497_v26 = vld [vmem:[%s9001_s1 + $0x2a0] ss:$16 sps:$4 sm:$0xff]   ;;  %v6500_v27 = vld [vmem:[%s9001_s1 + $0x2a8] ss:$16 sps:$4 sm:$0xff]  }
  0x63   :  { %2498 = vmatpush1.bf16.msra.mxu0 %v6415_v31  ;;  %2744 = vmatpush1.bf16.msra.mxu1 %v6416_v32  ;;  %v6505_v28 = vld [vmem:[%s9001_s1 + $0x2c4] ss:$16 sps:$4 sm:$0xff]   ;;  %v6508_v29 = vld [vmem:[%s9001_s1 + $0x2cc] ss:$16 sps:$4 sm:$0xff]   ;;  %v6503_v32 = vld [vmem:[%s9001_s1 + $0x2c0] ss:$16 sps:$4 sm:$0xff]  }
  0x64   :  { %2499 = vmatprep.subr.bf16.mxu0 %v6417_v33  ;;  %2745 = vmatprep.subr.bf16.mxu1 %v6419_v34  ;;  %v7864_v30 = vld [vmem:[%s9020_s15 + $0x8] sm:$0xff]  ;;  %v6511_v34 = vld [vmem:[%s9001_s1 + $0x2e4] ss:$16 sps:$4 sm:$0xff]   ;;  %s6210_s5 = sld [smem:[#allocation8 + $0x2]]  ;;  %s5417_s14 = sld [smem:[#allocation9]]  ;;  %vm5500_vm15 = vcmask 7168  }
  0x65   :  { %v5513_v31 = vcombine.high %v7864_v30, %v7864_v30  ;;  %v6506_v33 = vld [vmem:[%s9001_s1 + $0x2c8] ss:$16 sps:$4 sm:$0xff]   ;;  %v6532_v47 = vld [vmem:[%s9001_s1 + $0x34c] ss:$16 sps:$4 sm:$0xff]   ;;  %s6213_s17 = sld [smem:[#allocation8 + $0x3]]  ;;  %s6211_s18 = sld [smem:[#allocation9 + $0x2]] }
  0x66   :  { %v6530_v49 = vld [vmem:[%s9001_s1 + $0x348] ss:$16 sps:$4 sm:$0xff]   ;;  %s6216_s22 = sld [smem:[#allocation8 + $0x4]]  ;;  %s9021_s29 = sld [smem:[#allocation16_spill]] }
  0x67   :  { %2500 = vmatpush1.bf16.msra.mxu0 %v6421_v35  ;;  %2746 = vmatpush1.bf16.msra.mxu1 %v6422_v36  ;;  %v6514_v35 = vld [vmem:[%s9001_s1 + $0x2ec] ss:$16 sps:$4 sm:$0xff]   ;;  %v6509_v36 = vld [vmem:[%s9001_s1 + $0x2e0] ss:$16 sps:$4 sm:$0xff]   ;;  %s6217_s26 = sld [smem:[#allocation9 + $0x4]] }
  0x68   :  { %2501 = vmatprep.subr.bf16.mxu0 %v6423_v37  ;;  %2747 = vmatprep.subr.bf16.mxu1 %v6425_v38  ;;  %v6512_v37 = vld [vmem:[%s9001_s1 + $0x2e8] ss:$16 sps:$4 sm:$0xff]   ;;  %v6517_v38 = vld [vmem:[%s9001_s1 + $0x304] ss:$16 sps:$4 sm:$0xff]  }
  0x6b   :  { %2502 = vmatpush1.bf16.msra.mxu0 %v6427_v39  ;;  %2748 = vmatpush1.bf16.msra.mxu1 %v6428_v40  ;;  %v6520_v39 = vld [vmem:[%s9001_s1 + $0x30c] ss:$16 sps:$4 sm:$0xff]   ;;  %v6515_v40 = vld [vmem:[%s9001_s1 + $0x300] ss:$16 sps:$4 sm:$0xff]  }
  0x6c   :  { %2503 = vmatprep.subr.bf16.mxu0 %v6429_v41  ;;  %2749 = vmatprep.subr.bf16.mxu1 %v6431_v42  ;;  %v6518_v41 = vld [vmem:[%s9001_s1 + $0x308] ss:$16 sps:$4 sm:$0xff]   ;;  %v6523_v42 = vld [vmem:[%s9001_s1 + $0x324] ss:$16 sps:$4 sm:$0xff]  }
  0x6f   :  { %2504 = vmatpush1.bf16.msra.mxu0 %v6433_v43  ;;  %2750 = vmatpush1.bf16.msra.mxu1 %v6434_v44  ;;  %v6526_v43 = vld [vmem:[%s9001_s1 + $0x32c] ss:$16 sps:$4 sm:$0xff]   ;;  %v6521_v44 = vld [vmem:[%s9001_s1 + $0x320] ss:$16 sps:$4 sm:$0xff]  }
  0x70   :  { %2505 = vmatprep.subr.bf16.mxu0 %v6435_v45  ;;  %2751 = vmatprep.subr.bf16.mxu1 %v6437_v46  ;;  %v6524_v45 = vld [vmem:[%s9001_s1 + $0x328] ss:$16 sps:$4 sm:$0xff]   ;;  %v6529_v46 = vld [vmem:[%s9001_s1 + $0x344] ss:$16 sps:$4 sm:$0xff]  }
  0x73   :  { %2506 = vmatpush1.bf16.msra.mxu0 %v6439_v48  ;;  %2752 = vmatpush1.bf16.msra.mxu1 %v6440_v50  ;;  %v6527_v48 = vld [vmem:[%s9001_s1 + $0x340] ss:$16 sps:$4 sm:$0xff]   ;;  %v6535_v50 = vld [vmem:[%s9001_s1 + $0x364] ss:$16 sps:$4 sm:$0xff]  }
  0x74   :  { %2507 = vmatprep.subr.bf16.mxu0 %v6441_v51  ;;  %2753 = vmatprep.subr.bf16.mxu1 %v6443_v52  ;;  %v6538_v51 = vld [vmem:[%s9001_s1 + $0x36c] ss:$16 sps:$4 sm:$0xff]   ;;  %v6533_v52 = vld [vmem:[%s9001_s1 + $0x360] ss:$16 sps:$4 sm:$0xff]  }
  0x77   :  { %2508 = vmatpush1.bf16.msra.mxu0 %v6445_v53  ;;  %2754 = vmatpush1.bf16.msra.mxu1 %v6446_v54  ;;  %v6536_v53 = vld [vmem:[%s9001_s1 + $0x368] ss:$16 sps:$4 sm:$0xff]   ;;  %v6541_v54 = vld [vmem:[%s9001_s1 + $0x384] ss:$16 sps:$4 sm:$0xff]  }
  0x78   :  { %2509 = vmatprep.subr.bf16.mxu0 %v6447_v55  ;;  %2755 = vmatprep.subr.bf16.mxu1 %v6449_v56  ;;  %v6544_v55 = vld [vmem:[%s9001_s1 + $0x38c] ss:$16 sps:$4 sm:$0xff]   ;;  %v6539_v56 = vld [vmem:[%s9001_s1 + $0x380] ss:$16 sps:$4 sm:$0xff]  }
  0x7b   :  { %2510 = vmatpush1.bf16.msra.mxu0 %v6451_v57  ;;  %2756 = vmatpush1.bf16.msra.mxu1 %v6452_v58  ;;  %v6542_v57 = vld [vmem:[%s9001_s1 + $0x388] ss:$16 sps:$4 sm:$0xff]   ;;  %v6547_v58 = vld [vmem:[%s9001_s1 + $0x3a4] ss:$16 sps:$4 sm:$0xff]  }
  0x7c   :  { %2511 = vmatprep.subr.bf16.mxu0 %v6453_v59  ;;  %2757 = vmatprep.subr.bf16.mxu1 %v6455_v60  ;;  %v6550_v59 = vld [vmem:[%s9001_s1 + $0x3ac] ss:$16 sps:$4 sm:$0xff]   ;;  %v6545_v60 = vld [vmem:[%s9001_s1 + $0x3a0] ss:$16 sps:$4 sm:$0xff]  }
  0x7f   :  { %2512 = vmatpush1.bf16.msra.mxu0 %v6457_v61  ;;  %2758 = vmatpush1.bf16.msra.mxu1 %v6458_v62  ;;  %v6548_v61 = vld [vmem:[%s9001_s1 + $0x3a8] ss:$16 sps:$4 sm:$0xff]   ;;  %v6553_v62 = vld [vmem:[%s9001_s1 + $0x3c4] ss:$16 sps:$4 sm:$0xff]  }
  0x80   :  { %2513 = vmatprep.subr.bf16.mxu0 %v6459_v63  ;;  %2759 = vmatprep.subr.bf16.mxu1 %v6461_v0  ;;  %v6556_v63 = vld [vmem:[%s9001_s1 + $0x3cc] ss:$16 sps:$4 sm:$0xff]   ;;  %v6551_v0 = vld [vmem:[%s9001_s1 + $0x3c0] ss:$16 sps:$4 sm:$0xff]  }
  0x83   :  { %2514 = vmatpush1.bf16.msra.mxu0 %v6463_v1  ;;  %2760 = vmatpush1.bf16.msra.mxu1 %v6464_v2  ;;  %v6554_v1 = vld [vmem:[%s9001_s1 + $0x3c8] ss:$16 sps:$4 sm:$0xff]   ;;  %v6559_v2 = vld [vmem:[%s9001_s1 + $0x3e4] ss:$16 sps:$4 sm:$0xff]  }
  0x84   :  { %2524 = vmatprep.subr.bf16.mxu0 %v6469_v3  ;;  %2770 = vmatprep.subr.bf16.mxu1 %v6472_v4  ;;  %v6562_v3 = vld [vmem:[%s9001_s1 + $0x3ec] ss:$16 sps:$4 sm:$0xff]   ;;  %v6557_v4 = vld [vmem:[%s9001_s1 + $0x3e0] ss:$16 sps:$4 sm:$0xff]  }
  0x86   :  { %2516 = vmatmul.mubr.bf16.vlgmr.msra.gmra.mrb[0].mxu0 %v5510_v5  ;;  %2762 = vmatmul.mubr.bf16.vlgmr.msra.gmra.mrb[0].mxu1 %v5510_v5  ;;  %v6560_v5 = vld [vmem:[%s9001_s1 + $0x3e8] ss:$16 sps:$4 sm:$0xff]  }
  0x87   :  { %2525 = vmatpush1.bf16.msra.mxu0 %v6467_v6  ;;  %2771 = vmatpush1.bf16.msra.mxu1 %v6470_v7  ;;  %v6567_v6 = vld [vmem:[%s9001_s1 + $0x404] ss:$16 sps:$4 sm:$0xff]   ;;  %v6570_v7 = vld [vmem:[%s9001_s1 + $0x40c] ss:$16 sps:$4 sm:$0xff]  }
  0x88   :  { %2526 = vmatprep.subr.bf16.mxu0 %v6475_v8  ;;  %2772 = vmatprep.subr.bf16.mxu1 %v6478_v9  ;;  %v5512_v8 = vcombine.low %v7864_v30, %v7864_v30  ;;  %v6565_v9 = vld [vmem:[%s9001_s1 + $0x400] ss:$16 sps:$4 sm:$0xff]   ;;  %v6600_v30 = vld [vmem:[%s9001_s1 + $0x4ac] ss:$16 sps:$4 sm:$0xff]  }
  0x89   :  { %2556 = vmatprep.mubr.bf16.mxu0 %v5513_v31  ;;  %2802 = vmatprep.mubr.bf16.mxu1 %v5513_v31  ;;  %v6595_v31 = vld [vmem:[%s9001_s1 + $0x4a0] ss:$16 sps:$4 sm:$0xff]  }
  0x8b   :  { %2527 = vmatpush1.bf16.msra.mxu0 %v6473_v10  ;;  %2773 = vmatpush1.bf16.msra.mxu1 %v6476_v11  ;;  %v6568_v10 = vld [vmem:[%s9001_s1 + $0x408] ss:$16 sps:$4 sm:$0xff]   ;;  %v6573_v11 = vld [vmem:[%s9001_s1 + $0x424] ss:$16 sps:$4 sm:$0xff]  }
  0x8c   :  { %2528 = vmatprep.subr.bf16.mxu0 %v6481_v12  ;;  %2774 = vmatprep.subr.bf16.mxu1 %v6484_v13  ;;  %v8002_v12 = vld [vmem:[%s9020_s15 + $0x10] sm:$0xff]  ;;  %v6576_v13 = vld [vmem:[%s9001_s1 + $0x42c] ss:$16 sps:$4 sm:$0xff]  }
  0x8f   :  { %2529 = vmatpush1.bf16.msra.mxu0 %v6479_v14  ;;  %2775 = vmatpush1.bf16.msra.mxu1 %v6482_v15  ;;  %v5515_v14 = vcombine.high %v8002_v12, %v8002_v12  ;;  %v6571_v15 = vld [vmem:[%s9001_s1 + $0x420] ss:$16 sps:$4 sm:$0xff]  }
  0x90   :  { %2530 = vmatprep.subr.bf16.mxu0 %v6487_v16  ;;  %2776 = vmatprep.subr.bf16.mxu1 %v6490_v17  ;;  %v6574_v16 = vld [vmem:[%s9001_s1 + $0x428] ss:$16 sps:$4 sm:$0xff]   ;;  %v6579_v17 = vld [vmem:[%s9001_s1 + $0x444] ss:$16 sps:$4 sm:$0xff]  }
  0x93   :  { %2531 = vmatpush1.bf16.msra.mxu0 %v6485_v18  ;;  %2777 = vmatpush1.bf16.msra.mxu1 %v6488_v19  ;;  %v6582_v18 = vld [vmem:[%s9001_s1 + $0x44c] ss:$16 sps:$4 sm:$0xff]   ;;  %v6577_v19 = vld [vmem:[%s9001_s1 + $0x440] ss:$16 sps:$4 sm:$0xff]  }
  0x94   :  { %2532 = vmatprep.subr.bf16.mxu0 %v6493_v20  ;;  %2778 = vmatprep.subr.bf16.mxu1 %v6496_v21  ;;  %v6580_v20 = vld [vmem:[%s9001_s1 + $0x448] ss:$16 sps:$4 sm:$0xff]   ;;  %v6585_v21 = vld [vmem:[%s9001_s1 + $0x464] ss:$16 sps:$4 sm:$0xff]  }
  0x97   :  { %2533 = vmatpush1.bf16.msra.mxu0 %v6491_v22  ;;  %2779 = vmatpush1.bf16.msra.mxu1 %v6494_v23  ;;  %v6588_v22 = vld [vmem:[%s9001_s1 + $0x46c] ss:$16 sps:$4 sm:$0xff]   ;;  %v6583_v23 = vld [vmem:[%s9001_s1 + $0x460] ss:$16 sps:$4 sm:$0xff]  }
  0x98   :  { %2534 = vmatprep.subr.bf16.mxu0 %v6499_v24  ;;  %2780 = vmatprep.subr.bf16.mxu1 %v6502_v25  ;;  %v6586_v24 = vld [vmem:[%s9001_s1 + $0x468] ss:$16 sps:$4 sm:$0xff]   ;;  %v6591_v25 = vld [vmem:[%s9001_s1 + $0x484] ss:$16 sps:$4 sm:$0xff]  }
  0x9b   :  { %2535 = vmatpush1.bf16.msra.mxu0 %v6497_v26  ;;  %2781 = vmatpush1.bf16.msra.mxu1 %v6500_v27  ;;  %v6594_v26 = vld [vmem:[%s9001_s1 + $0x48c] ss:$16 sps:$4 sm:$0xff]   ;;  %v6589_v27 = vld [vmem:[%s9001_s1 + $0x480] ss:$16 sps:$4 sm:$0xff]  }
  0x9c   :  { %2536 = vmatprep.subr.bf16.mxu0 %v6505_v28  ;;  %2782 = vmatprep.subr.bf16.mxu1 %v6508_v29  ;;  %v6592_v28 = vld [vmem:[%s9001_s1 + $0x488] ss:$16 sps:$4 sm:$0xff]   ;;  %v6597_v29 = vld [vmem:[%s9001_s1 + $0x4a4] ss:$16 sps:$4 sm:$0xff]  }
  0x9f   :  { %2537 = vmatpush1.bf16.msra.mxu0 %v6503_v32  ;;  %2783 = vmatpush1.bf16.msra.mxu1 %v6506_v33  ;;  %v6598_v32 = vld [vmem:[%s9001_s1 + $0x4a8] ss:$16 sps:$4 sm:$0xff]   ;;  %v6603_v33 = vld [vmem:[%s9001_s1 + $0x4c4] ss:$16 sps:$4 sm:$0xff]  }
  0xa0   :  { %2538 = vmatprep.subr.bf16.mxu0 %v6511_v34  ;;  %2784 = vmatprep.subr.bf16.mxu1 %v6514_v35  ;;  %v6606_v34 = vld [vmem:[%s9001_s1 + $0x4cc] ss:$16 sps:$4 sm:$0xff]   ;;  %v6601_v35 = vld [vmem:[%s9001_s1 + $0x4c0] ss:$16 sps:$4 sm:$0xff]  }
  0xa3   :  { %2539 = vmatpush1.bf16.msra.mxu0 %v6509_v36  ;;  %2785 = vmatpush1.bf16.msra.mxu1 %v6512_v37  ;;  %v6604_v36 = vld [vmem:[%s9001_s1 + $0x4c8] ss:$16 sps:$4 sm:$0xff]   ;;  %v6609_v37 = vld [vmem:[%s9001_s1 + $0x4e4] ss:$16 sps:$4 sm:$0xff]  }
  0xa4   :  { %2540 = vmatprep.subr.bf16.mxu0 %v6517_v38  ;;  %2786 = vmatprep.subr.bf16.mxu1 %v6520_v39  ;;  %v6612_v38 = vld [vmem:[%s9001_s1 + $0x4ec] ss:$16 sps:$4 sm:$0xff]   ;;  %v6607_v39 = vld [vmem:[%s9001_s1 + $0x4e0] ss:$16 sps:$4 sm:$0xff]  }
  0xa7   :  { %2541 = vmatpush1.bf16.msra.mxu0 %v6515_v40  ;;  %2787 = vmatpush1.bf16.msra.mxu1 %v6518_v41  ;;  %v6610_v40 = vld [vmem:[%s9001_s1 + $0x4e8] ss:$16 sps:$4 sm:$0xff]   ;;  %v6615_v41 = vld [vmem:[%s9001_s1 + $0x504] ss:$16 sps:$4 sm:$0xff]  }
  0xa8   :  { %2542 = vmatprep.subr.bf16.mxu0 %v6523_v42  ;;  %2788 = vmatprep.subr.bf16.mxu1 %v6526_v43  ;;  %v6618_v42 = vld [vmem:[%s9001_s1 + $0x50c] ss:$16 sps:$4 sm:$0xff]   ;;  %v6613_v43 = vld [vmem:[%s9001_s1 + $0x500] ss:$16 sps:$4 sm:$0xff]  }
  0xab   :  { %2543 = vmatpush1.bf16.msra.mxu0 %v6521_v44  ;;  %2789 = vmatpush1.bf16.msra.mxu1 %v6524_v45  ;;  %v6616_v44 = vld [vmem:[%s9001_s1 + $0x508] ss:$16 sps:$4 sm:$0xff]   ;;  %v6621_v45 = vld [vmem:[%s9001_s1 + $0x524] ss:$16 sps:$4 sm:$0xff]  }
  0xac   :  { %2544 = vmatprep.subr.bf16.mxu0 %v6529_v46  ;;  %2790 = vmatprep.subr.bf16.mxu1 %v6532_v47  ;;  %v6624_v46 = vld [vmem:[%s9001_s1 + $0x52c] ss:$16 sps:$4 sm:$0xff]   ;;  %v6619_v47 = vld [vmem:[%s9001_s1 + $0x520] ss:$16 sps:$4 sm:$0xff]  }
  0xaf   :  { %2545 = vmatpush1.bf16.msra.mxu0 %v6527_v48  ;;  %2791 = vmatpush1.bf16.msra.mxu1 %v6530_v49  ;;  %v6622_v48 = vld [vmem:[%s9001_s1 + $0x528] ss:$16 sps:$4 sm:$0xff]   ;;  %v6627_v49 = vld [vmem:[%s9001_s1 + $0x544] ss:$16 sps:$4 sm:$0xff]  }
  0xb0   :  { %2546 = vmatprep.subr.bf16.mxu0 %v6535_v50  ;;  %2792 = vmatprep.subr.bf16.mxu1 %v6538_v51  ;;  %v6630_v50 = vld [vmem:[%s9001_s1 + $0x54c] ss:$16 sps:$4 sm:$0xff]   ;;  %v6625_v51 = vld [vmem:[%s9001_s1 + $0x540] ss:$16 sps:$4 sm:$0xff]  }
  0xb3   :  { %2547 = vmatpush1.bf16.msra.mxu0 %v6533_v52  ;;  %2793 = vmatpush1.bf16.msra.mxu1 %v6536_v53  ;;  %v6628_v52 = vld [vmem:[%s9001_s1 + $0x548] ss:$16 sps:$4 sm:$0xff]   ;;  %v6633_v53 = vld [vmem:[%s9001_s1 + $0x564] ss:$16 sps:$4 sm:$0xff]  }
  0xb4   :  { %2548 = vmatprep.subr.bf16.mxu0 %v6541_v54  ;;  %2794 = vmatprep.subr.bf16.mxu1 %v6544_v55  ;;  %v6636_v54 = vld [vmem:[%s9001_s1 + $0x56c] ss:$16 sps:$4 sm:$0xff]   ;;  %v6631_v55 = vld [vmem:[%s9001_s1 + $0x560] ss:$16 sps:$4 sm:$0xff]  }
  0xb7   :  { %2549 = vmatpush1.bf16.msra.mxu0 %v6539_v56  ;;  %2795 = vmatpush1.bf16.msra.mxu1 %v6542_v57  ;;  %v6634_v56 = vld [vmem:[%s9001_s1 + $0x568] ss:$16 sps:$4 sm:$0xff]   ;;  %v6639_v57 = vld [vmem:[%s9001_s1 + $0x584] ss:$16 sps:$4 sm:$0xff]  }
  0xb8   :  { %2550 = vmatprep.subr.bf16.mxu0 %v6547_v58  ;;  %2796 = vmatprep.subr.bf16.mxu1 %v6550_v59  ;;  %v6642_v58 = vld [vmem:[%s9001_s1 + $0x58c] ss:$16 sps:$4 sm:$0xff]   ;;  %v6637_v59 = vld [vmem:[%s9001_s1 + $0x580] ss:$16 sps:$4 sm:$0xff]  }
  0xbb   :  { %2551 = vmatpush1.bf16.msra.mxu0 %v6545_v60  ;;  %2797 = vmatpush1.bf16.msra.mxu1 %v6548_v61  ;;  %v6640_v60 = vld [vmem:[%s9001_s1 + $0x588] ss:$16 sps:$4 sm:$0xff]   ;;  %v6645_v61 = vld [vmem:[%s9001_s1 + $0x5a4] ss:$16 sps:$4 sm:$0xff]  }
  0xbc   :  { %2552 = vmatprep.subr.bf16.mxu0 %v6553_v62  ;;  %2798 = vmatprep.subr.bf16.mxu1 %v6556_v63  ;;  %v6648_v62 = vld [vmem:[%s9001_s1 + $0x5ac] ss:$16 sps:$4 sm:$0xff]   ;;  %v6643_v63 = vld [vmem:[%s9001_s1 + $0x5a0] ss:$16 sps:$4 sm:$0xff]  }
  0xbf   :  { %2553 = vmatpush1.bf16.msra.mxu0 %v6551_v0  ;;  %2799 = vmatpush1.bf16.msra.mxu1 %v6554_v1  ;;  %v6646_v0 = vld [vmem:[%s9001_s1 + $0x5a8] ss:$16 sps:$4 sm:$0xff]   ;;  %v6651_v1 = vld [vmem:[%s9001_s1 + $0x5c4] ss:$16 sps:$4 sm:$0xff]  }
  0xc0   :  { %2554 = vmatprep.subr.bf16.mxu0 %v6559_v2  ;;  %2800 = vmatprep.subr.bf16.mxu1 %v6562_v3  ;;  %v6654_v2 = vld [vmem:[%s9001_s1 + $0x5cc] ss:$16 sps:$4 sm:$0xff]   ;;  %v6649_v3 = vld [vmem:[%s9001_s1 + $0x5c0] ss:$16 sps:$4 sm:$0xff]  }
  0xc3   :  { %2555 = vmatpush1.bf16.msra.mxu0 %v6557_v4  ;;  %2801 = vmatpush1.bf16.msra.mxu1 %v6560_v5  ;;  %v6652_v4 = vld [vmem:[%s9001_s1 + $0x5c8] ss:$16 sps:$4 sm:$0xff]   ;;  %v6657_v5 = vld [vmem:[%s9001_s1 + $0x5e4] ss:$16 sps:$4 sm:$0xff]  }
  0xc4   :  { %2565 = vmatprep.subr.bf16.mxu0 %v6567_v6  ;;  %2811 = vmatprep.subr.bf16.mxu1 %v6570_v7  ;;  %v6660_v6 = vld [vmem:[%s9001_s1 + $0x5ec] ss:$16 sps:$4 sm:$0xff]   ;;  %v6655_v7 = vld [vmem:[%s9001_s1 + $0x5e0] ss:$16 sps:$4 sm:$0xff]  }
  0xc6   :  { %2557 = vmatmul.mubr.bf16.vlgmr.msra.gmra.mrb[0].mxu0 %v5512_v8  ;;  %2803 = vmatmul.mubr.bf16.vlgmr.msra.gmra.mrb[0].mxu1 %v5512_v8  ;;  %v6658_v8 = vld [vmem:[%s9001_s1 + $0x5e8] ss:$16 sps:$4 sm:$0xff]  }
  0xc7   :  { %2566 = vmatpush1.bf16.msra.mxu0 %v6565_v9  ;;  %2812 = vmatpush1.bf16.msra.mxu1 %v6568_v10  ;;  %v6665_v9 = vld [vmem:[%s9001_s1 + $0x604] ss:$16 sps:$4 sm:$0xff]   ;;  %v6668_v10 = vld [vmem:[%s9001_s1 + $0x60c] ss:$16 sps:$4 sm:$0xff]  }
  0xc8   :  { %2567 = vmatprep.subr.bf16.mxu0 %v6573_v11  ;;  %2813 = vmatprep.subr.bf16.mxu1 %v6576_v13  ;;  %v6663_v11 = vld [vmem:[%s9001_s1 + $0x600] ss:$16 sps:$4 sm:$0xff]   ;;  %v5514_v13 = vcombine.low %v8002_v12, %v8002_v12  ;;  %v6674_v12 = vld [vmem:[%s9001_s1 + $0x62c] ss:$16 sps:$4 sm:$0xff]  }
  0xc9   :  { %2597 = vmatprep.mubr.bf16.mxu0 %v5515_v14  ;;  %2843 = vmatprep.mubr.bf16.mxu1 %v5515_v14  ;;  %v6666_v14 = vld [vmem:[%s9001_s1 + $0x608] ss:$16 sps:$4 sm:$0xff]  }
  0xcb   :  { %2568 = vmatpush1.bf16.msra.mxu0 %v6571_v15  ;;  %2814 = vmatpush1.bf16.msra.mxu1 %v6574_v16  ;;  %v8200_v15 = vld [vmem:[%s9020_s15 + $0x18] sm:$0xff]  ;;  %v6671_v16 = vld [vmem:[%s9001_s1 + $0x624] ss:$16 sps:$4 sm:$0xff]  }
  0xcc   :  { %2569 = vmatprep.subr.bf16.mxu0 %v6579_v17  ;;  %2815 = vmatprep.subr.bf16.mxu1 %v6582_v18  ;;  %v5517_v17 = vcombine.high %v8200_v15, %v8200_v15  ;;  %v6669_v18 = vld [vmem:[%s9001_s1 + $0x620] ss:$16 sps:$4 sm:$0xff]  }
  0xcf   :  { %2570 = vmatpush1.bf16.msra.mxu0 %v6577_v19  ;;  %2816 = vmatpush1.bf16.msra.mxu1 %v6580_v20  ;;  %v6672_v19 = vld [vmem:[%s9001_s1 + $0x628] ss:$16 sps:$4 sm:$0xff]   ;;  %v6677_v20 = vld [vmem:[%s9001_s1 + $0x644] ss:$16 sps:$4 sm:$0xff]  }
  0xd0   :  { %2571 = vmatprep.subr.bf16.mxu0 %v6585_v21  ;;  %2817 = vmatprep.subr.bf16.mxu1 %v6588_v22  ;;  %v6680_v21 = vld [vmem:[%s9001_s1 + $0x64c] ss:$16 sps:$4 sm:$0xff]   ;;  %v6675_v22 = vld [vmem:[%s9001_s1 + $0x640] ss:$16 sps:$4 sm:$0xff]  }
  0xd3   :  { %2572 = vmatpush1.bf16.msra.mxu0 %v6583_v23  ;;  %2818 = vmatpush1.bf16.msra.mxu1 %v6586_v24  ;;  %v6678_v23 = vld [vmem:[%s9001_s1 + $0x648] ss:$16 sps:$4 sm:$0xff]   ;;  %v6683_v24 = vld [vmem:[%s9001_s1 + $0x664] ss:$16 sps:$4 sm:$0xff]  }
  0xd4   :  { %2573 = vmatprep.subr.bf16.mxu0 %v6591_v25  ;;  %2819 = vmatprep.subr.bf16.mxu1 %v6594_v26  ;;  %v6686_v25 = vld [vmem:[%s9001_s1 + $0x66c] ss:$16 sps:$4 sm:$0xff]   ;;  %v6681_v26 = vld [vmem:[%s9001_s1 + $0x660] ss:$16 sps:$4 sm:$0xff]  }
  0xd7   :  { %2574 = vmatpush1.bf16.msra.mxu0 %v6589_v27  ;;  %2820 = vmatpush1.bf16.msra.mxu1 %v6592_v28  ;;  %v6684_v27 = vld [vmem:[%s9001_s1 + $0x668] ss:$16 sps:$4 sm:$0xff]   ;;  %v6689_v28 = vld [vmem:[%s9001_s1 + $0x684] ss:$16 sps:$4 sm:$0xff]  }
  0xd8   :  { %2575 = vmatprep.subr.bf16.mxu0 %v6597_v29  ;;  %2821 = vmatprep.subr.bf16.mxu1 %v6600_v30  ;;  %v6692_v29 = vld [vmem:[%s9001_s1 + $0x68c] ss:$16 sps:$4 sm:$0xff]   ;;  %v6687_v30 = vld [vmem:[%s9001_s1 + $0x680] ss:$16 sps:$4 sm:$0xff]  }
  0xdb   :  { %2576 = vmatpush1.bf16.msra.mxu0 %v6595_v31  ;;  %2822 = vmatpush1.bf16.msra.mxu1 %v6598_v32  ;;  %v6690_v31 = vld [vmem:[%s9001_s1 + $0x688] ss:$16 sps:$4 sm:$0xff]   ;;  %v6695_v32 = vld [vmem:[%s9001_s1 + $0x6a4] ss:$16 sps:$4 sm:$0xff]  }
  0xdc   :  { %2577 = vmatprep.subr.bf16.mxu0 %v6603_v33  ;;  %2823 = vmatprep.subr.bf16.mxu1 %v6606_v34  ;;  %v6698_v33 = vld [vmem:[%s9001_s1 + $0x6ac] ss:$16 sps:$4 sm:$0xff]   ;;  %v6693_v34 = vld [vmem:[%s9001_s1 + $0x6a0] ss:$16 sps:$4 sm:$0xff]  }
  0xdf   :  { %2578 = vmatpush1.bf16.msra.mxu0 %v6601_v35  ;;  %2824 = vmatpush1.bf16.msra.mxu1 %v6604_v36  ;;  %v6696_v35 = vld [vmem:[%s9001_s1 + $0x6a8] ss:$16 sps:$4 sm:$0xff]   ;;  %v6701_v36 = vld [vmem:[%s9001_s1 + $0x6c4] ss:$16 sps:$4 sm:$0xff]  }
  0xe0   :  { %2579 = vmatprep.subr.bf16.mxu0 %v6609_v37  ;;  %2825 = vmatprep.subr.bf16.mxu1 %v6612_v38  ;;  %v6704_v37 = vld [vmem:[%s9001_s1 + $0x6cc] ss:$16 sps:$4 sm:$0xff]   ;;  %v6699_v38 = vld [vmem:[%s9001_s1 + $0x6c0] ss:$16 sps:$4 sm:$0xff]  }
  0xe3   :  { %2580 = vmatpush1.bf16.msra.mxu0 %v6607_v39  ;;  %2826 = vmatpush1.bf16.msra.mxu1 %v6610_v40  ;;  %v6702_v39 = vld [vmem:[%s9001_s1 + $0x6c8] ss:$16 sps:$4 sm:$0xff]   ;;  %v6707_v40 = vld [vmem:[%s9001_s1 + $0x6e4] ss:$16 sps:$4 sm:$0xff]  }
  0xe4   :  { %2581 = vmatprep.subr.bf16.mxu0 %v6615_v41  ;;  %2827 = vmatprep.subr.bf16.mxu1 %v6618_v42  ;;  %v6710_v41 = vld [vmem:[%s9001_s1 + $0x6ec] ss:$16 sps:$4 sm:$0xff]   ;;  %v6705_v42 = vld [vmem:[%s9001_s1 + $0x6e0] ss:$16 sps:$4 sm:$0xff]  }
  0xe7   :  { %2582 = vmatpush1.bf16.msra.mxu0 %v6613_v43  ;;  %2828 = vmatpush1.bf16.msra.mxu1 %v6616_v44  ;;  %v6708_v43 = vld [vmem:[%s9001_s1 + $0x6e8] ss:$16 sps:$4 sm:$0xff]   ;;  %v6713_v44 = vld [vmem:[%s9001_s1 + $0x704] ss:$16 sps:$4 sm:$0xff]  }
  0xe8   :  { %2583 = vmatprep.subr.bf16.mxu0 %v6621_v45  ;;  %2829 = vmatprep.subr.bf16.mxu1 %v6624_v46  ;;  %v6716_v45 = vld [vmem:[%s9001_s1 + $0x70c] ss:$16 sps:$4 sm:$0xff]   ;;  %v6711_v46 = vld [vmem:[%s9001_s1 + $0x700] ss:$16 sps:$4 sm:$0xff]  }
  0xeb   :  { %2584 = vmatpush1.bf16.msra.mxu0 %v6619_v47  ;;  %2830 = vmatpush1.bf16.msra.mxu1 %v6622_v48  ;;  %v6714_v47 = vld [vmem:[%s9001_s1 + $0x708] ss:$16 sps:$4 sm:$0xff]   ;;  %v6719_v48 = vld [vmem:[%s9001_s1 + $0x724] ss:$16 sps:$4 sm:$0xff]  }
  0xec   :  { %2585 = vmatprep.subr.bf16.mxu0 %v6627_v49  ;;  %2831 = vmatprep.subr.bf16.mxu1 %v6630_v50  ;;  %v6722_v49 = vld [vmem:[%s9001_s1 + $0x72c] ss:$16 sps:$4 sm:$0xff]   ;;  %v6717_v50 = vld [vmem:[%s9001_s1 + $0x720] ss:$16 sps:$4 sm:$0xff]  }
  0xef   :  { %2586 = vmatpush1.bf16.msra.mxu0 %v6625_v51  ;;  %2832 = vmatpush1.bf16.msra.mxu1 %v6628_v52  ;;  %v6720_v51 = vld [vmem:[%s9001_s1 + $0x728] ss:$16 sps:$4 sm:$0xff]   ;;  %v6725_v52 = vld [vmem:[%s9001_s1 + $0x744] ss:$16 sps:$4 sm:$0xff]  }
  0xf0   :  { %2587 = vmatprep.subr.bf16.mxu0 %v6633_v53  ;;  %2833 = vmatprep.subr.bf16.mxu1 %v6636_v54  ;;  %v6728_v53 = vld [vmem:[%s9001_s1 + $0x74c] ss:$16 sps:$4 sm:$0xff]   ;;  %v6723_v54 = vld [vmem:[%s9001_s1 + $0x740] ss:$16 sps:$4 sm:$0xff]  }
  0xf3   :  { %2588 = vmatpush1.bf16.msra.mxu0 %v6631_v55  ;;  %2834 = vmatpush1.bf16.msra.mxu1 %v6634_v56  ;;  %v6726_v55 = vld [vmem:[%s9001_s1 + $0x748] ss:$16 sps:$4 sm:$0xff]   ;;  %v6731_v56 = vld [vmem:[%s9001_s1 + $0x764] ss:$16 sps:$4 sm:$0xff]  }
  0xf4   :  { %2589 = vmatprep.subr.bf16.mxu0 %v6639_v57  ;;  %2835 = vmatprep.subr.bf16.mxu1 %v6642_v58  ;;  %v6734_v57 = vld [vmem:[%s9001_s1 + $0x76c] ss:$16 sps:$4 sm:$0xff]   ;;  %v6729_v58 = vld [vmem:[%s9001_s1 + $0x760] ss:$16 sps:$4 sm:$0xff]  }
  0xf7   :  { %2590 = vmatpush1.bf16.msra.mxu0 %v6637_v59  ;;  %2836 = vmatpush1.bf16.msra.mxu1 %v6640_v60  ;;  %v6732_v59 = vld [vmem:[%s9001_s1 + $0x768] ss:$16 sps:$4 sm:$0xff]   ;;  %v6737_v60 = vld [vmem:[%s9001_s1 + $0x784] ss:$16 sps:$4 sm:$0xff]  }
  0xf8   :  { %2591 = vmatprep.subr.bf16.mxu0 %v6645_v61  ;;  %2837 = vmatprep.subr.bf16.mxu1 %v6648_v62  ;;  %v6740_v61 = vld [vmem:[%s9001_s1 + $0x78c] ss:$16 sps:$4 sm:$0xff]   ;;  %v6735_v62 = vld [vmem:[%s9001_s1 + $0x780] ss:$16 sps:$4 sm:$0xff]  }
  0xfb   :  { %2592 = vmatpush1.bf16.msra.mxu0 %v6643_v63  ;;  %2838 = vmatpush1.bf16.msra.mxu1 %v6646_v0  ;;  %v6738_v63 = vld [vmem:[%s9001_s1 + $0x788] ss:$16 sps:$4 sm:$0xff]   ;;  %v6743_v0 = vld [vmem:[%s9001_s1 + $0x7a4] ss:$16 sps:$4 sm:$0xff]  }
  0xfc   :  { %2593 = vmatprep.subr.bf16.mxu0 %v6651_v1  ;;  %2839 = vmatprep.subr.bf16.mxu1 %v6654_v2  ;;  %v6746_v1 = vld [vmem:[%s9001_s1 + $0x7ac] ss:$16 sps:$4 sm:$0xff]   ;;  %v6741_v2 = vld [vmem:[%s9001_s1 + $0x7a0] ss:$16 sps:$4 sm:$0xff]  }
  0xff   :  { %2594 = vmatpush1.bf16.msra.mxu0 %v6649_v3  ;;  %2840 = vmatpush1.bf16.msra.mxu1 %v6652_v4  ;;  %v6744_v3 = vld [vmem:[%s9001_s1 + $0x7a8] ss:$16 sps:$4 sm:$0xff]   ;;  %v6749_v4 = vld [vmem:[%s9001_s1 + $0x7c4] ss:$16 sps:$4 sm:$0xff]  }
 0x100   :  { %2595 = vmatprep.subr.bf16.mxu0 %v6657_v5  ;;  %2841 = vmatprep.subr.bf16.mxu1 %v6660_v6  ;;  %v6752_v5 = vld [vmem:[%s9001_s1 + $0x7cc] ss:$16 sps:$4 sm:$0xff]   ;;  %v6747_v6 = vld [vmem:[%s9001_s1 + $0x7c0] ss:$16 sps:$4 sm:$0xff]  }
 0x103   :  { %2596 = vmatpush1.bf16.msra.mxu0 %v6655_v7  ;;  %2842 = vmatpush1.bf16.msra.mxu1 %v6658_v8  ;;  %v6750_v7 = vld [vmem:[%s9001_s1 + $0x7c8] ss:$16 sps:$4 sm:$0xff]   ;;  %v6755_v8 = vld [vmem:[%s9001_s1 + $0x7e4] ss:$16 sps:$4 sm:$0xff]  }
 0x104   :  { %2606 = vmatprep.subr.bf16.mxu0 %v6665_v9  ;;  %2852 = vmatprep.subr.bf16.mxu1 %v6668_v10  ;;  %v6758_v9 = vld [vmem:[%s9001_s1 + $0x7ec] ss:$16 sps:$4 sm:$0xff]   ;;  %v6753_v10 = vld [vmem:[%s9001_s1 + $0x7e0] ss:$16 sps:$4 sm:$0xff]  }
 0x106   :  { %2598 = vmatmul.mubr.bf16.vlgmr.msra.gmra.mrb[0].mxu0 %v5514_v13  ;;  %2844 = vmatmul.mubr.bf16.vlgmr.msra.gmra.mrb[0].mxu1 %v5514_v13  ;;  %v6763_v13 = vld [vmem:[%s9001_s1 + $0x804] ss:$16 sps:$4 sm:$0xff]  }
 0x107   :  { %2607 = vmatpush1.bf16.msra.mxu0 %v6663_v11  ;;  %2853 = vmatpush1.bf16.msra.mxu1 %v6666_v14  ;;  %v6756_v11 = vld [vmem:[%s9001_s1 + $0x7e8] ss:$16 sps:$4 sm:$0xff]   ;;  %v6766_v14 = vld [vmem:[%s9001_s1 + $0x80c] ss:$16 sps:$4 sm:$0xff]  }
 0x108   :  { %2608 = vmatprep.subr.bf16.mxu0 %v6671_v16  ;;  %2854 = vmatprep.subr.bf16.mxu1 %v6674_v12  ;;  %v6761_v16 = vld [vmem:[%s9001_s1 + $0x800] ss:$16 sps:$4 sm:$0xff]   ;;  %v5516_v12 = vcombine.low %v8200_v15, %v8200_v15  ;;  %v6772_v15 = vld [vmem:[%s9001_s1 + $0x82c] ss:$16 sps:$4 sm:$0xff]  }
 0x109   :  { %2638 = vmatprep.mubr.bf16.mxu0 %v5517_v17  ;;  %2884 = vmatprep.mubr.bf16.mxu1 %v5517_v17  ;;  %v8398_v17 = vld [vmem:[%s9020_s15 + $0x20] sm:$0xff] }
 0x10b   :  { %2609 = vmatpush1.bf16.msra.mxu0 %v6669_v18  ;;  %2855 = vmatpush1.bf16.msra.mxu1 %v6672_v19  ;;  %v6764_v18 = vld [vmem:[%s9001_s1 + $0x808] ss:$16 sps:$4 sm:$0xff]   ;;  %v6769_v19 = vld [vmem:[%s9001_s1 + $0x824] ss:$16 sps:$4 sm:$0xff]  }
 0x10c   :  { %2610 = vmatprep.subr.bf16.mxu0 %v6677_v20  ;;  %2856 = vmatprep.subr.bf16.mxu1 %v6680_v21  ;;  %v5519_v20 = vcombine.high %v8398_v17, %v8398_v17  ;;  %v6767_v21 = vld [vmem:[%s9001_s1 + $0x820] ss:$16 sps:$4 sm:$0xff]  }
 0x10f   :  { %2611 = vmatpush1.bf16.msra.mxu0 %v6675_v22  ;;  %2857 = vmatpush1.bf16.msra.mxu1 %v6678_v23  ;;  %v6770_v22 = vld [vmem:[%s9001_s1 + $0x828] ss:$16 sps:$4 sm:$0xff]   ;;  %v6775_v23 = vld [vmem:[%s9001_s1 + $0x844] ss:$16 sps:$4 sm:$0xff]  }
 0x110   :  { %2612 = vmatprep.subr.bf16.mxu0 %v6683_v24  ;;  %2858 = vmatprep.subr.bf16.mxu1 %v6686_v25  ;;  %v6778_v24 = vld [vmem:[%s9001_s1 + $0x84c] ss:$16 sps:$4 sm:$0xff]   ;;  %v6773_v25 = vld [vmem:[%s9001_s1 + $0x840] ss:$16 sps:$4 sm:$0xff]  }
 0x113   :  { %2613 = vmatpush1.bf16.msra.mxu0 %v6681_v26  ;;  %2859 = vmatpush1.bf16.msra.mxu1 %v6684_v27  ;;  %v6776_v26 = vld [vmem:[%s9001_s1 + $0x848] ss:$16 sps:$4 sm:$0xff]   ;;  %v6781_v27 = vld [vmem:[%s9001_s1 + $0x864] ss:$16 sps:$4 sm:$0xff]  }
 0x114   :  { %2614 = vmatprep.subr.bf16.mxu0 %v6689_v28  ;;  %2860 = vmatprep.subr.bf16.mxu1 %v6692_v29  ;;  %v6784_v28 = vld [vmem:[%s9001_s1 + $0x86c] ss:$16 sps:$4 sm:$0xff]   ;;  %v6779_v29 = vld [vmem:[%s9001_s1 + $0x860] ss:$16 sps:$4 sm:$0xff]  }
 0x117   :  { %2615 = vmatpush1.bf16.msra.mxu0 %v6687_v30  ;;  %2861 = vmatpush1.bf16.msra.mxu1 %v6690_v31  ;;  %v6782_v30 = vld [vmem:[%s9001_s1 + $0x868] ss:$16 sps:$4 sm:$0xff]   ;;  %v6787_v31 = vld [vmem:[%s9001_s1 + $0x884] ss:$16 sps:$4 sm:$0xff]  }
 0x118   :  { %2616 = vmatprep.subr.bf16.mxu0 %v6695_v32  ;;  %2862 = vmatprep.subr.bf16.mxu1 %v6698_v33  ;;  %v6790_v32 = vld [vmem:[%s9001_s1 + $0x88c] ss:$16 sps:$4 sm:$0xff]   ;;  %v6785_v33 = vld [vmem:[%s9001_s1 + $0x880] ss:$16 sps:$4 sm:$0xff]  }
 0x11b   :  { %2617 = vmatpush1.bf16.msra.mxu0 %v6693_v34  ;;  %2863 = vmatpush1.bf16.msra.mxu1 %v6696_v35  ;;  %v6788_v34 = vld [vmem:[%s9001_s1 + $0x888] ss:$16 sps:$4 sm:$0xff]   ;;  %v6793_v35 = vld [vmem:[%s9001_s1 + $0x8a4] ss:$16 sps:$4 sm:$0xff]  }
 0x11c   :  { %2618 = vmatprep.subr.bf16.mxu0 %v6701_v36  ;;  %2864 = vmatprep.subr.bf16.mxu1 %v6704_v37  ;;  %v6796_v36 = vld [vmem:[%s9001_s1 + $0x8ac] ss:$16 sps:$4 sm:$0xff]   ;;  %v6791_v37 = vld [vmem:[%s9001_s1 + $0x8a0] ss:$16 sps:$4 sm:$0xff]  }
 0x11f   :  { %2619 = vmatpush1.bf16.msra.mxu0 %v6699_v38  ;;  %2865 = vmatpush1.bf16.msra.mxu1 %v6702_v39  ;;  %v6794_v38 = vld [vmem:[%s9001_s1 + $0x8a8] ss:$16 sps:$4 sm:$0xff]   ;;  %v6799_v39 = vld [vmem:[%s9001_s1 + $0x8c4] ss:$16 sps:$4 sm:$0xff]  }
 0x120   :  { %2620 = vmatprep.subr.bf16.mxu0 %v6707_v40  ;;  %2866 = vmatprep.subr.bf16.mxu1 %v6710_v41  ;;  %v6802_v40 = vld [vmem:[%s9001_s1 + $0x8cc] ss:$16 sps:$4 sm:$0xff]   ;;  %v6797_v41 = vld [vmem:[%s9001_s1 + $0x8c0] ss:$16 sps:$4 sm:$0xff]  }
 0x123   :  { %2621 = vmatpush1.bf16.msra.mxu0 %v6705_v42  ;;  %2867 = vmatpush1.bf16.msra.mxu1 %v6708_v43  ;;  %v6800_v42 = vld [vmem:[%s9001_s1 + $0x8c8] ss:$16 sps:$4 sm:$0xff]   ;;  %v6805_v43 = vld [vmem:[%s9001_s1 + $0x8e4] ss:$16 sps:$4 sm:$0xff]  }
 0x124   :  { %2622 = vmatprep.subr.bf16.mxu0 %v6713_v44  ;;  %2868 = vmatprep.subr.bf16.mxu1 %v6716_v45  ;;  %v6808_v44 = vld [vmem:[%s9001_s1 + $0x8ec] ss:$16 sps:$4 sm:$0xff]   ;;  %v6803_v45 = vld [vmem:[%s9001_s1 + $0x8e0] ss:$16 sps:$4 sm:$0xff]  }
 0x127   :  { %2623 = vmatpush1.bf16.msra.mxu0 %v6711_v46  ;;  %2869 = vmatpush1.bf16.msra.mxu1 %v6714_v47  ;;  %v6806_v46 = vld [vmem:[%s9001_s1 + $0x8e8] ss:$16 sps:$4 sm:$0xff]   ;;  %v6811_v47 = vld [vmem:[%s9001_s1 + $0x904] ss:$16 sps:$4 sm:$0xff]  }
 0x128   :  { %2624 = vmatprep.subr.bf16.mxu0 %v6719_v48  ;;  %2870 = vmatprep.subr.bf16.mxu1 %v6722_v49  ;;  %v6814_v48 = vld [vmem:[%s9001_s1 + $0x90c] ss:$16 sps:$4 sm:$0xff]   ;;  %v6809_v49 = vld [vmem:[%s9001_s1 + $0x900] ss:$16 sps:$4 sm:$0xff]  }
 0x12b   :  { %2625 = vmatpush1.bf16.msra.mxu0 %v6717_v50  ;;  %2871 = vmatpush1.bf16.msra.mxu1 %v6720_v51  ;;  %v6812_v50 = vld [vmem:[%s9001_s1 + $0x908] ss:$16 sps:$4 sm:$0xff]   ;;  %v6817_v51 = vld [vmem:[%s9001_s1 + $0x924] ss:$16 sps:$4 sm:$0xff]  }
 0x12c   :  { %2626 = vmatprep.subr.bf16.mxu0 %v6725_v52  ;;  %2872 = vmatprep.subr.bf16.mxu1 %v6728_v53  ;;  %v6820_v52 = vld [vmem:[%s9001_s1 + $0x92c] ss:$16 sps:$4 sm:$0xff]   ;;  %v6815_v53 = vld [vmem:[%s9001_s1 + $0x920] ss:$16 sps:$4 sm:$0xff]  }
 0x12f   :  { %2627 = vmatpush1.bf16.msra.mxu0 %v6723_v54  ;;  %2873 = vmatpush1.bf16.msra.mxu1 %v6726_v55  ;;  %v6818_v54 = vld [vmem:[%s9001_s1 + $0x928] ss:$16 sps:$4 sm:$0xff]   ;;  %v6823_v55 = vld [vmem:[%s9001_s1 + $0x944] ss:$16 sps:$4 sm:$0xff]  }
 0x130   :  { %2628 = vmatprep.subr.bf16.mxu0 %v6731_v56  ;;  %2874 = vmatprep.subr.bf16.mxu1 %v6734_v57  ;;  %v6826_v56 = vld [vmem:[%s9001_s1 + $0x94c] ss:$16 sps:$4 sm:$0xff]   ;;  %v6821_v57 = vld [vmem:[%s9001_s1 + $0x940] ss:$16 sps:$4 sm:$0xff]  }
 0x133   :  { %2629 = vmatpush1.bf16.msra.mxu0 %v6729_v58  ;;  %2875 = vmatpush1.bf16.msra.mxu1 %v6732_v59  ;;  %v6824_v58 = vld [vmem:[%s9001_s1 + $0x948] ss:$16 sps:$4 sm:$0xff]   ;;  %v6829_v59 = vld [vmem:[%s9001_s1 + $0x964] ss:$16 sps:$4 sm:$0xff]  }
 0x134   :  { %2630 = vmatprep.subr.bf16.mxu0 %v6737_v60  ;;  %2876 = vmatprep.subr.bf16.mxu1 %v6740_v61  ;;  %v6832_v60 = vld [vmem:[%s9001_s1 + $0x96c] ss:$16 sps:$4 sm:$0xff]   ;;  %v6827_v61 = vld [vmem:[%s9001_s1 + $0x960] ss:$16 sps:$4 sm:$0xff]  }
 0x137   :  { %2631 = vmatpush1.bf16.msra.mxu0 %v6735_v62  ;;  %2877 = vmatpush1.bf16.msra.mxu1 %v6738_v63  ;;  %v6830_v62 = vld [vmem:[%s9001_s1 + $0x968] ss:$16 sps:$4 sm:$0xff]   ;;  %v6835_v63 = vld [vmem:[%s9001_s1 + $0x984] ss:$16 sps:$4 sm:$0xff]  }
 0x138   :  { %2632 = vmatprep.subr.bf16.mxu0 %v6743_v0  ;;  %2878 = vmatprep.subr.bf16.mxu1 %v6746_v1  ;;  %v6838_v0 = vld [vmem:[%s9001_s1 + $0x98c] ss:$16 sps:$4 sm:$0xff]   ;;  %v6833_v1 = vld [vmem:[%s9001_s1 + $0x980] ss:$16 sps:$4 sm:$0xff]  }
 0x13b   :  { %2633 = vmatpush1.bf16.msra.mxu0 %v6741_v2  ;;  %2879 = vmatpush1.bf16.msra.mxu1 %v6744_v3  ;;  %v6836_v2 = vld [vmem:[%s9001_s1 + $0x988] ss:$16 sps:$4 sm:$0xff]   ;;  %v6841_v3 = vld [vmem:[%s9001_s1 + $0x9a4] ss:$16 sps:$4 sm:$0xff]  }
 0x13c   :  { %2634 = vmatprep.subr.bf16.mxu0 %v6749_v4  ;;  %2880 = vmatprep.subr.bf16.mxu1 %v6752_v5  ;;  %v6844_v4 = vld [vmem:[%s9001_s1 + $0x9ac] ss:$16 sps:$4 sm:$0xff]   ;;  %v6839_v5 = vld [vmem:[%s9001_s1 + $0x9a0] ss:$16 sps:$4 sm:$0xff]  }
 0x13f   :  { %2635 = vmatpush1.bf16.msra.mxu0 %v6747_v6  ;;  %2881 = vmatpush1.bf16.msra.mxu1 %v6750_v7  ;;  %v6842_v6 = vld [vmem:[%s9001_s1 + $0x9a8] ss:$16 sps:$4 sm:$0xff]   ;;  %v6847_v7 = vld [vmem:[%s9001_s1 + $0x9c4] ss:$16 sps:$4 sm:$0xff]  }
 0x140   :  { %2636 = vmatprep.subr.bf16.mxu0 %v6755_v8  ;;  %2882 = vmatprep.subr.bf16.mxu1 %v6758_v9  ;;  %v6850_v8 = vld [vmem:[%s9001_s1 + $0x9cc] ss:$16 sps:$4 sm:$0xff]   ;;  %v6845_v9 = vld [vmem:[%s9001_s1 + $0x9c0] ss:$16 sps:$4 sm:$0xff]  }
 0x143   :  { %2637 = vmatpush1.bf16.msra.mxu0 %v6753_v10  ;;  %2883 = vmatpush1.bf16.msra.mxu1 %v6756_v11  ;;  %v6848_v10 = vld [vmem:[%s9001_s1 + $0x9c8] ss:$16 sps:$4 sm:$0xff]   ;;  %v6853_v11 = vld [vmem:[%s9001_s1 + $0x9e4] ss:$16 sps:$4 sm:$0xff]  }
 0x144   :  { %2647 = vmatprep.subr.bf16.mxu0 %v6763_v13  ;;  %2893 = vmatprep.subr.bf16.mxu1 %v6766_v14  ;;  %v6856_v13 = vld [vmem:[%s9001_s1 + $0x9ec] ss:$16 sps:$4 sm:$0xff]   ;;  %v6851_v14 = vld [vmem:[%s9001_s1 + $0x9e0] ss:$16 sps:$4 sm:$0xff]  }
 0x146   :  { %2639 = vmatmul.mubr.bf16.vlgmr.msra.gmra.mrb[0].mxu0 %v5516_v12  ;;  %2885 = vmatmul.mubr.bf16.vlgmr.msra.gmra.mrb[0].mxu1 %v5516_v12  ;;  %v6861_v12 = vld [vmem:[%s9001_s1 + $0xa04] ss:$16 sps:$4 sm:$0xff]  }
 0x147   :  { %2648 = vmatpush1.bf16.msra.mxu0 %v6761_v16  ;;  %2894 = vmatpush1.bf16.msra.mxu1 %v6764_v18  ;;  %v6854_v16 = vld [vmem:[%s9001_s1 + $0x9e8] ss:$16 sps:$4 sm:$0xff]   ;;  %v6864_v18 = vld [vmem:[%s9001_s1 + $0xa0c] ss:$16 sps:$4 sm:$0xff]  }
 0x148   :  { %2649 = vmatprep.subr.bf16.mxu0 %v6769_v19  ;;  %2895 = vmatprep.subr.bf16.mxu1 %v6772_v15  ;;  %v8594_v19 = vld [vmem:[%s9020_s15 + $0x28] sm:$0xff]  ;;  %v6859_v15 = vld [vmem:[%s9001_s1 + $0xa00] ss:$16 sps:$4 sm:$0xff]  }
 0x149   :  { %2679 = vmatprep.mubr.bf16.mxu0 %v5519_v20  ;;  %2925 = vmatprep.mubr.bf16.mxu1 %v5519_v20  ;;  %v6862_v20 = vld [vmem:[%s9001_s1 + $0xa08] ss:$16 sps:$4 sm:$0xff]  }
 0x14b   :  { %2650 = vmatpush1.bf16.msra.mxu0 %v6767_v21  ;;  %2896 = vmatpush1.bf16.msra.mxu1 %v6770_v22  ;;  %v5518_v21 = vcombine.low %v8398_v17, %v8398_v17  ;;  %v6867_v22 = vld [vmem:[%s9001_s1 + $0xa24] ss:$16 sps:$4 sm:$0xff]   ;;  %v6868_v17 = vld [vmem:[%s9001_s1 + $0xa28] ss:$16 sps:$4 sm:$0xff]  }
 0x14c   :  { %2651 = vmatprep.subr.bf16.mxu0 %v6775_v23  ;;  %2897 = vmatprep.subr.bf16.mxu1 %v6778_v24  ;;  %v6870_v23 = vld [vmem:[%s9001_s1 + $0xa2c] ss:$16 sps:$4 sm:$0xff]   ;;  %v6865_v24 = vld [vmem:[%s9001_s1 + $0xa20] ss:$16 sps:$4 sm:$0xff]  }
 0x14f   :  { %2652 = vmatpush1.bf16.msra.mxu0 %v6773_v25  ;;  %2898 = vmatpush1.bf16.msra.mxu1 %v6776_v26  ;;  %v5521_v25 = vcombine.high %v8594_v19, %v8594_v19  ;;  %v6873_v26 = vld [vmem:[%s9001_s1 + $0xa44] ss:$16 sps:$4 sm:$0xff]  }
 0x150   :  { %2653 = vmatprep.subr.bf16.mxu0 %v6781_v27  ;;  %2899 = vmatprep.subr.bf16.mxu1 %v6784_v28  ;;  %v6876_v27 = vld [vmem:[%s9001_s1 + $0xa4c] ss:$16 sps:$4 sm:$0xff]   ;;  %v6871_v28 = vld [vmem:[%s9001_s1 + $0xa40] ss:$16 sps:$4 sm:$0xff]  }
 0x153   :  { %2654 = vmatpush1.bf16.msra.mxu0 %v6779_v29  ;;  %2900 = vmatpush1.bf16.msra.mxu1 %v6782_v30  ;;  %v6874_v29 = vld [vmem:[%s9001_s1 + $0xa48] ss:$16 sps:$4 sm:$0xff]   ;;  %v6879_v30 = vld [vmem:[%s9001_s1 + $0xa64] ss:$16 sps:$4 sm:$0xff]  }
 0x154   :  { %2655 = vmatprep.subr.bf16.mxu0 %v6787_v31  ;;  %2901 = vmatprep.subr.bf16.mxu1 %v6790_v32  ;;  %v6882_v31 = vld [vmem:[%s9001_s1 + $0xa6c] ss:$16 sps:$4 sm:$0xff]   ;;  %v6877_v32 = vld [vmem:[%s9001_s1 + $0xa60] ss:$16 sps:$4 sm:$0xff]  }
 0x157   :  { %2656 = vmatpush1.bf16.msra.mxu0 %v6785_v33  ;;  %2902 = vmatpush1.bf16.msra.mxu1 %v6788_v34  ;;  %v6880_v33 = vld [vmem:[%s9001_s1 + $0xa68] ss:$16 sps:$4 sm:$0xff]   ;;  %v6885_v34 = vld [vmem:[%s9001_s1 + $0xa84] ss:$16 sps:$4 sm:$0xff]  }
 0x158   :  { %2657 = vmatprep.subr.bf16.mxu0 %v6793_v35  ;;  %2903 = vmatprep.subr.bf16.mxu1 %v6796_v36  ;;  %v6888_v35 = vld [vmem:[%s9001_s1 + $0xa8c] ss:$16 sps:$4 sm:$0xff]   ;;  %v6883_v36 = vld [vmem:[%s9001_s1 + $0xa80] ss:$16 sps:$4 sm:$0xff]  }
 0x15b   :  { %2658 = vmatpush1.bf16.msra.mxu0 %v6791_v37  ;;  %2904 = vmatpush1.bf16.msra.mxu1 %v6794_v38  ;;  %v6886_v37 = vld [vmem:[%s9001_s1 + $0xa88] ss:$16 sps:$4 sm:$0xff]   ;;  %v6891_v38 = vld [vmem:[%s9001_s1 + $0xaa4] ss:$16 sps:$4 sm:$0xff]  }
 0x15c   :  { %2659 = vmatprep.subr.bf16.mxu0 %v6799_v39  ;;  %2905 = vmatprep.subr.bf16.mxu1 %v6802_v40  ;;  %v6894_v39 = vld [vmem:[%s9001_s1 + $0xaac] ss:$16 sps:$4 sm:$0xff]   ;;  %v6889_v40 = vld [vmem:[%s9001_s1 + $0xaa0] ss:$16 sps:$4 sm:$0xff]  }
 0x15f   :  { %2660 = vmatpush1.bf16.msra.mxu0 %v6797_v41  ;;  %2906 = vmatpush1.bf16.msra.mxu1 %v6800_v42  ;;  %v6892_v41 = vld [vmem:[%s9001_s1 + $0xaa8] ss:$16 sps:$4 sm:$0xff]   ;;  %v6897_v42 = vld [vmem:[%s9001_s1 + $0xac4] ss:$16 sps:$4 sm:$0xff]  }
 0x160   :  { %2661 = vmatprep.subr.bf16.mxu0 %v6805_v43  ;;  %2907 = vmatprep.subr.bf16.mxu1 %v6808_v44  ;;  %v6900_v43 = vld [vmem:[%s9001_s1 + $0xacc] ss:$16 sps:$4 sm:$0xff]   ;;  %v6895_v44 = vld [vmem:[%s9001_s1 + $0xac0] ss:$16 sps:$4 sm:$0xff]  }
 0x163   :  { %2662 = vmatpush1.bf16.msra.mxu0 %v6803_v45  ;;  %2908 = vmatpush1.bf16.msra.mxu1 %v6806_v46  ;;  %v6898_v45 = vld [vmem:[%s9001_s1 + $0xac8] ss:$16 sps:$4 sm:$0xff]   ;;  %v6903_v46 = vld [vmem:[%s9001_s1 + $0xae4] ss:$16 sps:$4 sm:$0xff]  }
 0x164   :  { %2663 = vmatprep.subr.bf16.mxu0 %v6811_v47  ;;  %2909 = vmatprep.subr.bf16.mxu1 %v6814_v48  ;;  %v6906_v47 = vld [vmem:[%s9001_s1 + $0xaec] ss:$16 sps:$4 sm:$0xff]   ;;  %v6901_v48 = vld [vmem:[%s9001_s1 + $0xae0] ss:$16 sps:$4 sm:$0xff]  }
 0x167   :  { %2664 = vmatpush1.bf16.msra.mxu0 %v6809_v49  ;;  %2910 = vmatpush1.bf16.msra.mxu1 %v6812_v50  ;;  %v6904_v49 = vld [vmem:[%s9001_s1 + $0xae8] ss:$16 sps:$4 sm:$0xff]   ;;  %v6909_v50 = vld [vmem:[%s9001_s1 + $0xb04] ss:$16 sps:$4 sm:$0xff]  }
 0x168   :  { %2665 = vmatprep.subr.bf16.mxu0 %v6817_v51  ;;  %2911 = vmatprep.subr.bf16.mxu1 %v6820_v52  ;;  %v6912_v51 = vld [vmem:[%s9001_s1 + $0xb0c] ss:$16 sps:$4 sm:$0xff]   ;;  %v6907_v52 = vld [vmem:[%s9001_s1 + $0xb00] ss:$16 sps:$4 sm:$0xff]  }
 0x16b   :  { %2666 = vmatpush1.bf16.msra.mxu0 %v6815_v53  ;;  %2912 = vmatpush1.bf16.msra.mxu1 %v6818_v54  ;;  %v6910_v53 = vld [vmem:[%s9001_s1 + $0xb08] ss:$16 sps:$4 sm:$0xff]   ;;  %v6915_v54 = vld [vmem:[%s9001_s1 + $0xb24] ss:$16 sps:$4 sm:$0xff]  }
 0x16c   :  { %2667 = vmatprep.subr.bf16.mxu0 %v6823_v55  ;;  %2913 = vmatprep.subr.bf16.mxu1 %v6826_v56  ;;  %v6918_v55 = vld [vmem:[%s9001_s1 + $0xb2c] ss:$16 sps:$4 sm:$0xff]   ;;  %v6913_v56 = vld [vmem:[%s9001_s1 + $0xb20] ss:$16 sps:$4 sm:$0xff]  }
 0x16f   :  { %2668 = vmatpush1.bf16.msra.mxu0 %v6821_v57  ;;  %2914 = vmatpush1.bf16.msra.mxu1 %v6824_v58  ;;  %v6916_v57 = vld [vmem:[%s9001_s1 + $0xb28] ss:$16 sps:$4 sm:$0xff]   ;;  %v6921_v58 = vld [vmem:[%s9001_s1 + $0xb44] ss:$16 sps:$4 sm:$0xff]  }
 0x170   :  { %2669 = vmatprep.subr.bf16.mxu0 %v6829_v59  ;;  %2915 = vmatprep.subr.bf16.mxu1 %v6832_v60  ;;  %v6924_v59 = vld [vmem:[%s9001_s1 + $0xb4c] ss:$16 sps:$4 sm:$0xff]   ;;  %v6919_v60 = vld [vmem:[%s9001_s1 + $0xb40] ss:$16 sps:$4 sm:$0xff]  }
 0x173   :  { %2670 = vmatpush1.bf16.msra.mxu0 %v6827_v61  ;;  %2916 = vmatpush1.bf16.msra.mxu1 %v6830_v62  ;;  %v6922_v61 = vld [vmem:[%s9001_s1 + $0xb48] ss:$16 sps:$4 sm:$0xff]   ;;  %v6927_v62 = vld [vmem:[%s9001_s1 + $0xb64] ss:$16 sps:$4 sm:$0xff]  }
 0x174   :  { %2671 = vmatprep.subr.bf16.mxu0 %v6835_v63  ;;  %2917 = vmatprep.subr.bf16.mxu1 %v6838_v0  ;;  %v6930_v63 = vld [vmem:[%s9001_s1 + $0xb6c] ss:$16 sps:$4 sm:$0xff]   ;;  %v6925_v0 = vld [vmem:[%s9001_s1 + $0xb60] ss:$16 sps:$4 sm:$0xff]  }
 0x177   :  { %2672 = vmatpush1.bf16.msra.mxu0 %v6833_v1  ;;  %2918 = vmatpush1.bf16.msra.mxu1 %v6836_v2  ;;  %v6928_v1 = vld [vmem:[%s9001_s1 + $0xb68] ss:$16 sps:$4 sm:$0xff]   ;;  %v6933_v2 = vld [vmem:[%s9001_s1 + $0xb84] ss:$16 sps:$4 sm:$0xff]  }
 0x178   :  { %2673 = vmatprep.subr.bf16.mxu0 %v6841_v3  ;;  %2919 = vmatprep.subr.bf16.mxu1 %v6844_v4  ;;  %v6936_v3 = vld [vmem:[%s9001_s1 + $0xb8c] ss:$16 sps:$4 sm:$0xff]   ;;  %v6931_v4 = vld [vmem:[%s9001_s1 + $0xb80] ss:$16 sps:$4 sm:$0xff]  }
 0x17b   :  { %2674 = vmatpush1.bf16.msra.mxu0 %v6839_v5  ;;  %2920 = vmatpush1.bf16.msra.mxu1 %v6842_v6  ;;  %v6934_v5 = vld [vmem:[%s9001_s1 + $0xb88] ss:$16 sps:$4 sm:$0xff]   ;;  %v6939_v6 = vld [vmem:[%s9001_s1 + $0xba4] ss:$16 sps:$4 sm:$0xff]  }
 0x17c   :  { %2675 = vmatprep.subr.bf16.mxu0 %v6847_v7  ;;  %2921 = vmatprep.subr.bf16.mxu1 %v6850_v8  ;;  %v6942_v7 = vld [vmem:[%s9001_s1 + $0xbac] ss:$16 sps:$4 sm:$0xff]   ;;  %v6937_v8 = vld [vmem:[%s9001_s1 + $0xba0] ss:$16 sps:$4 sm:$0xff]  }
 0x17f   :  { %2676 = vmatpush1.bf16.msra.mxu0 %v6845_v9  ;;  %2922 = vmatpush1.bf16.msra.mxu1 %v6848_v10  ;;  %v6940_v9 = vld [vmem:[%s9001_s1 + $0xba8] ss:$16 sps:$4 sm:$0xff]   ;;  %v6945_v10 = vld [vmem:[%s9001_s1 + $0xbc4] ss:$16 sps:$4 sm:$0xff]  }
 0x180   :  { %2677 = vmatprep.subr.bf16.mxu0 %v6853_v11  ;;  %2923 = vmatprep.subr.bf16.mxu1 %v6856_v13  ;;  %v6948_v11 = vld [vmem:[%s9001_s1 + $0xbcc] ss:$16 sps:$4 sm:$0xff]   ;;  %v6943_v13 = vld [vmem:[%s9001_s1 + $0xbc0] ss:$16 sps:$4 sm:$0xff]  }
 0x183   :  { %2678 = vmatpush1.bf16.msra.mxu0 %v6851_v14  ;;  %2924 = vmatpush1.bf16.msra.mxu1 %v6854_v16  ;;  %v6946_v14 = vld [vmem:[%s9001_s1 + $0xbc8] ss:$16 sps:$4 sm:$0xff]   ;;  %v6951_v16 = vld [vmem:[%s9001_s1 + $0xbe4] ss:$16 sps:$4 sm:$0xff]  }
 0x184   :  { %2688 = vmatprep.subr.bf16.mxu0 %v6861_v12  ;;  %2934 = vmatprep.subr.bf16.mxu1 %v6864_v18  ;;  %v6954_v12 = vld [vmem:[%s9001_s1 + $0xbec] ss:$16 sps:$4 sm:$0xff]   ;;  %v6949_v18 = vld [vmem:[%s9001_s1 + $0xbe0] ss:$16 sps:$4 sm:$0xff]  }
 0x186   :  { %2680 = vmatmul.mubr.bf16.vlgmr.msra.gmra.mrb[0].mxu0 %v5518_v21  ;;  %2926 = vmatmul.mubr.bf16.vlgmr.msra.gmra.mrb[0].mxu1 %v5518_v21  ;;  %v6962_v21 = vld [vmem:[#allocation3 + $0xc] ss:$16 sps:$4 sm:$0xff]  }
 0x187   :  { %2689 = vmatpush1.bf16.msra.mxu0 %v6859_v15  ;;  %2935 = vmatpush1.bf16.msra.mxu1 %v6862_v20  ;;  %v6952_v15 = vld [vmem:[%s9001_s1 + $0xbe8] ss:$16 sps:$4 sm:$0xff]  }
 0x188   :  { %2690 = vmatprep.subr.bf16.mxu0 %v6867_v22  ;;  %2936 = vmatprep.subr.bf16.mxu1 %v6870_v23  ;;  %v6959_v20 = vld [vmem:[#allocation3 + $0x4] ss:$16 sps:$4 sm:$0xff]   ;;  %v6957_v22 = vld [vmem:[#allocation3] ss:$16 sps:$4 sm:$0xff]   ;;  %v6960_v23 = vld [vmem:[#allocation3 + $0x8] ss:$16 sps:$4 sm:$0xff]  }
 0x189   :  { %2720 = vmatprep.mubr.bf16.mxu0 %v5521_v25  ;;  %2966 = vmatprep.mubr.bf16.mxu1 %v5521_v25  ;;  %v6968_v25 = vld [vmem:[#allocation3 + $0x2c] ss:$16 sps:$4 sm:$0xff]  }
 0x18b   :  { %2691 = vmatpush1.bf16.msra.mxu0 %v6865_v24  ;;  %2937 = vmatpush1.bf16.msra.mxu1 %v6868_v17  ;;  %v5520_v24 = vcombine.low %v8594_v19, %v8594_v19  ;;  %v6965_v17 = vld [vmem:[#allocation3 + $0x24] ss:$16 sps:$4 sm:$0xff]   ;;  %v6972_v19 = vld [vmem:[#allocation3 + $0x48] ss:$16 sps:$4 sm:$0xff]  }
 0x18c   :  { %2692 = vmatprep.subr.bf16.mxu0 %v6873_v26  ;;  %2938 = vmatprep.subr.bf16.mxu1 %v6876_v27  ;;  %v6963_v26 = vld [vmem:[#allocation3 + $0x20] ss:$16 sps:$4 sm:$0xff]   ;;  %v6966_v27 = vld [vmem:[#allocation3 + $0x28] ss:$16 sps:$4 sm:$0xff]  }
 0x18f   :  { %2693 = vmatpush1.bf16.msra.mxu0 %v6871_v28  ;;  %2939 = vmatpush1.bf16.msra.mxu1 %v6874_v29  ;;  %v6971_v28 = vld [vmem:[#allocation3 + $0x44] ss:$16 sps:$4 sm:$0xff]   ;;  %v6974_v29 = vld [vmem:[#allocation3 + $0x4c] ss:$16 sps:$4 sm:$0xff]  }
 0x190   :  { %2694 = vmatprep.subr.bf16.mxu0 %v6879_v30  ;;  %2940 = vmatprep.subr.bf16.mxu1 %v6882_v31  ;;  %v6969_v30 = vld [vmem:[#allocation3 + $0x40] ss:$16 sps:$4 sm:$0xff]   ;;  %v6977_v31 = vld [vmem:[#allocation3 + $0x64] ss:$16 sps:$4 sm:$0xff]  }
 0x193   :  { %2695 = vmatpush1.bf16.msra.mxu0 %v6877_v32  ;;  %2941 = vmatpush1.bf16.msra.mxu1 %v6880_v33  ;;  %v6980_v32 = vld [vmem:[#allocation3 + $0x6c] ss:$16 sps:$4 sm:$0xff]   ;;  %v6975_v33 = vld [vmem:[#allocation3 + $0x60] ss:$16 sps:$4 sm:$0xff]  }
 0x194   :  { %2696 = vmatprep.subr.bf16.mxu0 %v6885_v34  ;;  %2942 = vmatprep.subr.bf16.mxu1 %v6888_v35  ;;  %v6978_v34 = vld [vmem:[#allocation3 + $0x68] ss:$16 sps:$4 sm:$0xff]   ;;  %v6983_v35 = vld [vmem:[#allocation3 + $0x84] ss:$16 sps:$4 sm:$0xff]  }
 0x197   :  { %2697 = vmatpush1.bf16.msra.mxu0 %v6883_v36  ;;  %2943 = vmatpush1.bf16.msra.mxu1 %v6886_v37  ;;  %v6986_v36 = vld [vmem:[#allocation3 + $0x8c] ss:$16 sps:$4 sm:$0xff]   ;;  %v6981_v37 = vld [vmem:[#allocation3 + $0x80] ss:$16 sps:$4 sm:$0xff]  }
 0x198   :  { %2698 = vmatprep.subr.bf16.mxu0 %v6891_v38  ;;  %2944 = vmatprep.subr.bf16.mxu1 %v6894_v39  ;;  %v6984_v38 = vld [vmem:[#allocation3 + $0x88] ss:$16 sps:$4 sm:$0xff]   ;;  %v6989_v39 = vld [vmem:[#allocation3 + $0xa4] ss:$16 sps:$4 sm:$0xff]  }
 0x19b   :  { %2699 = vmatpush1.bf16.msra.mxu0 %v6889_v40  ;;  %2945 = vmatpush1.bf16.msra.mxu1 %v6892_v41  ;;  %v6992_v40 = vld [vmem:[#allocation3 + $0xac] ss:$16 sps:$4 sm:$0xff]   ;;  %v6987_v41 = vld [vmem:[#allocation3 + $0xa0] ss:$16 sps:$4 sm:$0xff]  }
 0x19c   :  { %2700 = vmatprep.subr.bf16.mxu0 %v6897_v42  ;;  %2946 = vmatprep.subr.bf16.mxu1 %v6900_v43  ;;  %v6990_v42 = vld [vmem:[#allocation3 + $0xa8] ss:$16 sps:$4 sm:$0xff]   ;;  %v6995_v43 = vld [vmem:[#allocation3 + $0xc4] ss:$16 sps:$4 sm:$0xff]  }
 0x19f   :  { %2701 = vmatpush1.bf16.msra.mxu0 %v6895_v44  ;;  %2947 = vmatpush1.bf16.msra.mxu1 %v6898_v45  ;;  %v6998_v44 = vld [vmem:[#allocation3 + $0xcc] ss:$16 sps:$4 sm:$0xff]   ;;  %v6993_v45 = vld [vmem:[#allocation3 + $0xc0] ss:$16 sps:$4 sm:$0xff]  }
 0x1a0   :  { %2702 = vmatprep.subr.bf16.mxu0 %v6903_v46  ;;  %2948 = vmatprep.subr.bf16.mxu1 %v6906_v47  ;;  %v6996_v46 = vld [vmem:[#allocation3 + $0xc8] ss:$16 sps:$4 sm:$0xff]   ;;  %v7001_v47 = vld [vmem:[#allocation3 + $0xe4] ss:$16 sps:$4 sm:$0xff]  }
 0x1a3   :  { %2703 = vmatpush1.bf16.msra.mxu0 %v6901_v48  ;;  %2949 = vmatpush1.bf16.msra.mxu1 %v6904_v49  ;;  %v7004_v48 = vld [vmem:[#allocation3 + $0xec] ss:$16 sps:$4 sm:$0xff]   ;;  %v6999_v49 = vld [vmem:[#allocation3 + $0xe0] ss:$16 sps:$4 sm:$0xff]  }
 0x1a4   :  { %2704 = vmatprep.subr.bf16.mxu0 %v6909_v50  ;;  %2950 = vmatprep.subr.bf16.mxu1 %v6912_v51  ;;  %v7002_v50 = vld [vmem:[#allocation3 + $0xe8] ss:$16 sps:$4 sm:$0xff]   ;;  %v7007_v51 = vld [vmem:[#allocation3 + $0x104] ss:$16 sps:$4 sm:$0xff]  }
 0x1a7   :  { %2705 = vmatpush1.bf16.msra.mxu0 %v6907_v52  ;;  %2951 = vmatpush1.bf16.msra.mxu1 %v6910_v53  ;;  %v7010_v52 = vld [vmem:[#allocation3 + $0x10c] ss:$16 sps:$4 sm:$0xff]   ;;  %v7005_v53 = vld [vmem:[#allocation3 + $0x100] ss:$16 sps:$4 sm:$0xff]  }
 0x1a8   :  { %2706 = vmatprep.subr.bf16.mxu0 %v6915_v54  ;;  %2952 = vmatprep.subr.bf16.mxu1 %v6918_v55  ;;  %v7008_v54 = vld [vmem:[#allocation3 + $0x108] ss:$16 sps:$4 sm:$0xff]   ;;  %v7013_v55 = vld [vmem:[#allocation3 + $0x124] ss:$16 sps:$4 sm:$0xff]  }
 0x1ab   :  { %2707 = vmatpush1.bf16.msra.mxu0 %v6913_v56  ;;  %2953 = vmatpush1.bf16.msra.mxu1 %v6916_v57  ;;  %v7016_v56 = vld [vmem:[#allocation3 + $0x12c] ss:$16 sps:$4 sm:$0xff]   ;;  %v7011_v57 = vld [vmem:[#allocation3 + $0x120] ss:$16 sps:$4 sm:$0xff]  }
 0x1ac   :  { %2708 = vmatprep.subr.bf16.mxu0 %v6921_v58  ;;  %2954 = vmatprep.subr.bf16.mxu1 %v6924_v59  ;;  %v7014_v58 = vld [vmem:[#allocation3 + $0x128] ss:$16 sps:$4 sm:$0xff]   ;;  %v7019_v59 = vld [vmem:[#allocation3 + $0x144] ss:$16 sps:$4 sm:$0xff]  }
 0x1af   :  { %2709 = vmatpush1.bf16.msra.mxu0 %v6919_v60  ;;  %2955 = vmatpush1.bf16.msra.mxu1 %v6922_v61  ;;  %v7022_v60 = vld [vmem:[#allocation3 + $0x14c] ss:$16 sps:$4 sm:$0xff]   ;;  %v7017_v61 = vld [vmem:[#allocation3 + $0x140] ss:$16 sps:$4 sm:$0xff]  }
 0x1b0   :  { %2710 = vmatprep.subr.bf16.mxu0 %v6927_v62  ;;  %2956 = vmatprep.subr.bf16.mxu1 %v6930_v63  ;;  %v7020_v62 = vld [vmem:[#allocation3 + $0x148] ss:$16 sps:$4 sm:$0xff]   ;;  %v7025_v63 = vld [vmem:[#allocation3 + $0x164] ss:$16 sps:$4 sm:$0xff]  }
 0x1b3   :  { %2711 = vmatpush1.bf16.msra.mxu0 %v6925_v0  ;;  %2957 = vmatpush1.bf16.msra.mxu1 %v6928_v1  ;;  %v7028_v0 = vld [vmem:[#allocation3 + $0x16c] ss:$16 sps:$4 sm:$0xff]   ;;  %v7023_v1 = vld [vmem:[#allocation3 + $0x160] ss:$16 sps:$4 sm:$0xff]  }
 0x1b4   :  { %2712 = vmatprep.subr.bf16.mxu0 %v6933_v2  ;;  %2958 = vmatprep.subr.bf16.mxu1 %v6936_v3  ;;  %v7026_v2 = vld [vmem:[#allocation3 + $0x168] ss:$16 sps:$4 sm:$0xff]   ;;  %v7031_v3 = vld [vmem:[#allocation3 + $0x184] ss:$16 sps:$4 sm:$0xff]  }
 0x1b7   :  { %2713 = vmatpush1.bf16.msra.mxu0 %v6931_v4  ;;  %2959 = vmatpush1.bf16.msra.mxu1 %v6934_v5  ;;  %v7034_v4 = vld [vmem:[#allocation3 + $0x18c] ss:$16 sps:$4 sm:$0xff]   ;;  %v7029_v5 = vld [vmem:[#allocation3 + $0x180] ss:$16 sps:$4 sm:$0xff]  }
 0x1b8   :  { %2714 = vmatprep.subr.bf16.mxu0 %v6939_v6  ;;  %2960 = vmatprep.subr.bf16.mxu1 %v6942_v7  ;;  %v7032_v6 = vld [vmem:[#allocation3 + $0x188] ss:$16 sps:$4 sm:$0xff]   ;;  %v7037_v7 = vld [vmem:[#allocation3 + $0x1a4] ss:$16 sps:$4 sm:$0xff]  }
 0x1bb   :  { %2715 = vmatpush1.bf16.msra.mxu0 %v6937_v8  ;;  %2961 = vmatpush1.bf16.msra.mxu1 %v6940_v9  ;;  %v7040_v8 = vld [vmem:[#allocation3 + $0x1ac] ss:$16 sps:$4 sm:$0xff]   ;;  %v7035_v9 = vld [vmem:[#allocation3 + $0x1a0] ss:$16 sps:$4 sm:$0xff]  }
 0x1bc   :  { %2716 = vmatprep.subr.bf16.mxu0 %v6945_v10  ;;  %2962 = vmatprep.subr.bf16.mxu1 %v6948_v11  ;;  %v7038_v10 = vld [vmem:[#allocation3 + $0x1a8] ss:$16 sps:$4 sm:$0xff]   ;;  %v7043_v11 = vld [vmem:[#allocation3 + $0x1c4] ss:$16 sps:$4 sm:$0xff]  }
 0x1bf   :  { %2717 = vmatpush1.bf16.msra.mxu0 %v6943_v13  ;;  %2963 = vmatpush1.bf16.msra.mxu1 %v6946_v14  ;;  %v7046_v13 = vld [vmem:[#allocation3 + $0x1cc] ss:$16 sps:$4 sm:$0xff]   ;;  %v7041_v14 = vld [vmem:[#allocation3 + $0x1c0] ss:$16 sps:$4 sm:$0xff]  }
 0x1c0   :  { %2718 = vmatprep.subr.bf16.mxu0 %v6951_v16  ;;  %2964 = vmatprep.subr.bf16.mxu1 %v6954_v12  ;;  %v7044_v16 = vld [vmem:[#allocation3 + $0x1c8] ss:$16 sps:$4 sm:$0xff]   ;;  %v7049_v12 = vld [vmem:[#allocation3 + $0x1e4] ss:$16 sps:$4 sm:$0xff]  }
 0x1c3   :  { %2719 = vmatpush1.bf16.msra.mxu0 %v6949_v18  ;;  %2965 = vmatpush1.bf16.msra.mxu1 %v6952_v15  ;;  %v7052_v18 = vld [vmem:[#allocation3 + $0x1ec] ss:$16 sps:$4 sm:$0xff]   ;;  %v7047_v15 = vld [vmem:[#allocation3 + $0x1e0] ss:$16 sps:$4 sm:$0xff]  }
 0x1c4   :  { %3781 = vmatprep.subr.bf16.mxu0 %v6959_v20  ;;  %3863 = vmatprep.subr.bf16.mxu1 %v6962_v21  ;;  %v7050_v20 = vld [vmem:[#allocation3 + $0x1e8] ss:$16 sps:$4 sm:$0xff]   ;;  %v7055_v21 = vld [vmem:[#allocation3 + $0x204] ss:$16 sps:$4 sm:$0xff]  }
 0x1c6   :  { %2721 = vmatmul.mubr.bf16.vlgmr.msra.gmra.mrb[0].mxu0 %v5520_v24  ;;  %2967 = vmatmul.mubr.bf16.vlgmr.msra.gmra.mrb[0].mxu1 %v5520_v24 }
 0x1c7   :  { %3782 = vmatpush1.bf16.msra.mxu0 %v6957_v22  ;;  %3864 = vmatpush1.bf16.msra.mxu1 %v6960_v23  ;;  %v7058_v22 = vld [vmem:[#allocation3 + $0x20c] ss:$16 sps:$4 sm:$0xff]   ;;  %v501_v23 = vlaneseq }
 0x1c8   :  { %3783 = vmatprep.subr.bf16.mxu0 %v6965_v17  ;;  %3865 = vmatprep.subr.bf16.mxu1 %v6968_v25  ;;  %v8796_v25 = vld [vmem:[%s9002_s2] sm:$0xf] }
 0x1c9   :  { %v8788_v24 = vshrl.u32 %v501_v23, 7  ;;  %v7112_v23 = vld [vmem:[#allocation3 + $0x32c] ss:$16 sps:$4 sm:$0xff]  }
 0x1cb   :  { %3784 = vmatpush1.bf16.msra.mxu0 %v6963_v26  ;;  %3866 = vmatpush1.bf16.msra.mxu1 %v6966_v27  ;;  %v8791_v17 = vsub.s32 0, %v8788_v24  ;;  %v8799_v26 = vsub.s32 1, %v8788_v24  ;;  %v8802_v27 = vsub.s32 3, %v8788_v24 }
 0x1cc   :  { %3785 = vmatprep.subr.bf16.mxu0 %v6971_v28  ;;  %3867 = vmatprep.subr.bf16.mxu1 %v6974_v29 }
 0x1cd   :  { %v504_v28 = vrot.slane %v8796_v25, %v8791_v17  ;;  %v508_v29 = vrot.slane %v8796_v25, %v8799_v26 }
 0x1cf   :  { %3786 = vmatpush1.bf16.msra.mxu0 %v6969_v30  ;;  %3868 = vmatpush1.bf16.msra.mxu1 %v6972_v19  ;;  %v516_v30 = vrot.slane %v8796_v25, %v8802_v27 }
 0x1d0   :  { %3787 = vmatprep.subr.bf16.mxu0 %v6977_v31  ;;  %3869 = vmatprep.subr.bf16.mxu1 %v6980_v32 }
 0x1d3   :  { %3788 = vmatpush1.bf16.msra.mxu0 %v6975_v33  ;;  %3870 = vmatpush1.bf16.msra.mxu1 %v6978_v34 }
 0x1d4   :  { %3789 = vmatprep.subr.bf16.mxu0 %v6983_v35  ;;  %3871 = vmatprep.subr.bf16.mxu1 %v6986_v36 }
 0x1d7   :  { %3790 = vmatpush1.bf16.msra.mxu0 %v6981_v37  ;;  %3872 = vmatpush1.bf16.msra.mxu1 %v6984_v38 }
 0x1d8   :  { %3791 = vmatprep.subr.bf16.mxu0 %v6989_v39  ;;  %3873 = vmatprep.subr.bf16.mxu1 %v6992_v40 }
 0x1db   :  { %3792 = vmatpush1.bf16.msra.mxu0 %v6987_v41  ;;  %3874 = vmatpush1.bf16.msra.mxu1 %v6990_v42 }
 0x1dc   :  { %3793 = vmatprep.subr.bf16.mxu0 %v6995_v43  ;;  %3875 = vmatprep.subr.bf16.mxu1 %v6998_v44 }
 0x1df   :  { %3794 = vmatpush1.bf16.msra.mxu0 %v6993_v45  ;;  %3876 = vmatpush1.bf16.msra.mxu1 %v6996_v46 }
 0x1e0   :  { %3795 = vmatprep.subr.bf16.mxu0 %v7001_v47  ;;  %3877 = vmatprep.subr.bf16.mxu1 %v7004_v48  ;;  %v7053_v47 = vld [vmem:[#allocation3 + $0x200] ss:$16 sps:$4 sm:$0xff]   ;;  %v7056_v48 = vld [vmem:[#allocation3 + $0x208] ss:$16 sps:$4 sm:$0xff]  }
 0x1e3   :  { %3796 = vmatpush1.bf16.msra.mxu0 %v6999_v49  ;;  %3878 = vmatpush1.bf16.msra.mxu1 %v7002_v50 }
 0x1e4   :  { %3797 = vmatprep.subr.bf16.mxu0 %v7007_v51  ;;  %3879 = vmatprep.subr.bf16.mxu1 %v7010_v52  ;;  %v7061_v51 = vld [vmem:[#allocation3 + $0x224] ss:$16 sps:$4 sm:$0xff]   ;;  %v7064_v52 = vld [vmem:[#allocation3 + $0x22c] ss:$16 sps:$4 sm:$0xff]  }
 0x1e7   :  { %3798 = vmatpush1.bf16.msra.mxu0 %v7005_v53  ;;  %3880 = vmatpush1.bf16.msra.mxu1 %v7008_v54  ;;  %v7059_v54 = vld [vmem:[#allocation3 + $0x220] ss:$16 sps:$4 sm:$0xff]  }
 0x1e8   :  { %3799 = vmatprep.subr.bf16.mxu0 %v7013_v55  ;;  %3881 = vmatprep.subr.bf16.mxu1 %v7016_v56  ;;  %v7062_v55 = vld [vmem:[#allocation3 + $0x228] ss:$16 sps:$4 sm:$0xff]   ;;  %v7067_v56 = vld [vmem:[#allocation3 + $0x244] ss:$16 sps:$4 sm:$0xff]  }
 0x1eb   :  { %3800 = vmatpush1.bf16.msra.mxu0 %v7011_v57  ;;  %3882 = vmatpush1.bf16.msra.mxu1 %v7014_v58  ;;  %v7070_v57 = vld [vmem:[#allocation3 + $0x24c] ss:$16 sps:$4 sm:$0xff]   ;;  %v7065_v58 = vld [vmem:[#allocation3 + $0x240] ss:$16 sps:$4 sm:$0xff]  }
 0x1ec   :  { %3801 = vmatprep.subr.bf16.mxu0 %v7019_v59  ;;  %3883 = vmatprep.subr.bf16.mxu1 %v7022_v60  ;;  %v7068_v59 = vld [vmem:[#allocation3 + $0x248] ss:$16 sps:$4 sm:$0xff]   ;;  %v7073_v60 = vld [vmem:[#allocation3 + $0x264] ss:$16 sps:$4 sm:$0xff]  }
 0x1ef   :  { %3802 = vmatpush1.bf16.msra.mxu0 %v7017_v61  ;;  %3884 = vmatpush1.bf16.msra.mxu1 %v7020_v62  ;;  %v7076_v61 = vld [vmem:[#allocation3 + $0x26c] ss:$16 sps:$4 sm:$0xff]   ;;  %v7071_v62 = vld [vmem:[#allocation3 + $0x260] ss:$16 sps:$4 sm:$0xff]  }
 0x1f0   :  { %3803 = vmatprep.subr.bf16.mxu0 %v7025_v63  ;;  %3885 = vmatprep.subr.bf16.mxu1 %v7028_v0  ;;  %v7074_v63 = vld [vmem:[#allocation3 + $0x268] ss:$16 sps:$4 sm:$0xff]   ;;  %v7079_v0 = vld [vmem:[#allocation3 + $0x284] ss:$16 sps:$4 sm:$0xff]  }
 0x1f3   :  { %3804 = vmatpush1.bf16.msra.mxu0 %v7023_v1  ;;  %3886 = vmatpush1.bf16.msra.mxu1 %v7026_v2  ;;  %v7082_v1 = vld [vmem:[#allocation3 + $0x28c] ss:$16 sps:$4 sm:$0xff]   ;;  %v7077_v2 = vld [vmem:[#allocation3 + $0x280] ss:$16 sps:$4 sm:$0xff]  }
 0x1f4   :  { %3805 = vmatprep.subr.bf16.mxu0 %v7031_v3  ;;  %3887 = vmatprep.subr.bf16.mxu1 %v7034_v4  ;;  %v7080_v3 = vld [vmem:[#allocation3 + $0x288] ss:$16 sps:$4 sm:$0xff]   ;;  %v7085_v4 = vld [vmem:[#allocation3 + $0x2a4] ss:$16 sps:$4 sm:$0xff]  }
 0x1f7   :  { %3806 = vmatpush1.bf16.msra.mxu0 %v7029_v5  ;;  %3888 = vmatpush1.bf16.msra.mxu1 %v7032_v6  ;;  %v7088_v5 = vld [vmem:[#allocation3 + $0x2ac] ss:$16 sps:$4 sm:$0xff]   ;;  %v7083_v6 = vld [vmem:[#allocation3 + $0x2a0] ss:$16 sps:$4 sm:$0xff]  }
 0x1f8   :  { %3807 = vmatprep.subr.bf16.mxu0 %v7037_v7  ;;  %3889 = vmatprep.subr.bf16.mxu1 %v7040_v8  ;;  %v7086_v7 = vld [vmem:[#allocation3 + $0x2a8] ss:$16 sps:$4 sm:$0xff]   ;;  %v7091_v8 = vld [vmem:[#allocation3 + $0x2c4] ss:$16 sps:$4 sm:$0xff]  }
 0x1fb   :  { %3808 = vmatpush1.bf16.msra.mxu0 %v7035_v9  ;;  %3890 = vmatpush1.bf16.msra.mxu1 %v7038_v10  ;;  %v7094_v9 = vld [vmem:[#allocation3 + $0x2cc] ss:$16 sps:$4 sm:$0xff]   ;;  %v7089_v10 = vld [vmem:[#allocation3 + $0x2c0] ss:$16 sps:$4 sm:$0xff]  }
 0x1fc   :  { %3809 = vmatprep.subr.bf16.mxu0 %v7043_v11  ;;  %3891 = vmatprep.subr.bf16.mxu1 %v7046_v13  ;;  %v7092_v11 = vld [vmem:[#allocation3 + $0x2c8] ss:$16 sps:$4 sm:$0xff]   ;;  %v7097_v13 = vld [vmem:[#allocation3 + $0x2e4] ss:$16 sps:$4 sm:$0xff]  }
 0x1ff   :  { %3810 = vmatpush1.bf16.msra.mxu0 %v7041_v14  ;;  %3892 = vmatpush1.bf16.msra.mxu1 %v7044_v16  ;;  %v7100_v14 = vld [vmem:[#allocation3 + $0x2ec] ss:$16 sps:$4 sm:$0xff]   ;;  %v7095_v16 = vld [vmem:[#allocation3 + $0x2e0] ss:$16 sps:$4 sm:$0xff]  }
 0x200   :  { %3811 = vmatprep.subr.bf16.mxu0 %v7049_v12  ;;  %3893 = vmatprep.subr.bf16.mxu1 %v7052_v18  ;;  %v7098_v12 = vld [vmem:[#allocation3 + $0x2e8] ss:$16 sps:$4 sm:$0xff]   ;;  %v7103_v18 = vld [vmem:[#allocation3 + $0x304] ss:$16 sps:$4 sm:$0xff]  }
 0x203   :  { %3812 = vmatpush1.bf16.msra.mxu0 %v7047_v15  ;;  %3894 = vmatpush1.bf16.msra.mxu1 %v7050_v20  ;;  %v7106_v15 = vld [vmem:[#allocation3 + $0x30c] ss:$16 sps:$4 sm:$0xff]   ;;  %v7101_v20 = vld [vmem:[#allocation3 + $0x300] ss:$16 sps:$4 sm:$0xff]  }
 0x204   :  { %3822 = vmatprep.subr.bf16.mxu0 %v7055_v21  ;;  %3904 = vmatprep.subr.bf16.mxu1 %v7058_v22  ;;  %v7104_v21 = vld [vmem:[#allocation3 + $0x308] ss:$16 sps:$4 sm:$0xff]   ;;  %v7109_v22 = vld [vmem:[#allocation3 + $0x324] ss:$16 sps:$4 sm:$0xff]  }
 0x299   :  { %v2722_v19 = vpop.f32.mrb[0].mxu0  ;;  %v8810_v31 = vpop.f32.mrb[0].mxu1 }
 0x29a   :  { %v6293_v32 = vadd.f32 %v2722_v19, %v504_v28  ;;  %v2724_v33 = vpop.f32.mrb[1].mxu0  ;;  %v2970_v34 = vpop.f32.mrb[1].mxu1  ;;  %v7107_v28 = vld [vmem:[#allocation3 + $0x320] ss:$16 sps:$4 sm:$0xff]   ;;  %v7118_v19 = vld [vmem:[#allocation3 + $0x34c] ss:$16 sps:$4 sm:$0xff]  }
 0x29b   :  { %v6294_v35 = vadd.f32 %v2724_v33, %v508_v29  ;;  %v6296_v36 = vadd.f32 %v2970_v34, %v516_v30  ;;  %v2726_v37 = vpop.f32.mrb[2].mxu0  ;;  %v2972_v38 = vpop.f32.mrb[2].mxu1  ;;  %v7110_v29 = vld [vmem:[#allocation3 + $0x328] ss:$16 sps:$4 sm:$0xff]   ;;  %v7115_v30 = vld [vmem:[#allocation3 + $0x344] ss:$16 sps:$4 sm:$0xff]  }
 0x29c   :  { %vm2975_vm0 = vcmp.ge.f32.partialorder %v6293_v32, 0.0  ;;  %v2979_v39 = vmul.f32 0.01, %v6293_v32  ;;  %v2727_v43 = vpop.f32.mrb[3].mxu0  ;;  %v2973_v44 = vpop.f32.mrb[3].mxu1 }
 0x29d   :  { %vm2976_vm1 = vcmp.ge.f32.partialorder %v6294_v35, 0.0  ;;  %v2980_v40 = vmul.f32 0.01, %v6294_v35  ;;  %vm2978_vm2 = vcmp.ge.f32.partialorder %v6296_v36, 0.0  ;;  %v2982_v41 = vmul.f32 0.01, %v6296_v36 }
 0x29e   :  { %v2983_v42 = vsel %vm2975_vm0, %v6293_v32, %v2979_v39  ;;  %v7113_v32 = vld [vmem:[#allocation3 + $0x340] ss:$16 sps:$4 sm:$0xff]   ;;  %v7116_v33 = vld [vmem:[#allocation3 + $0x348] ss:$16 sps:$4 sm:$0xff]   ;;  %v7121_v34 = vld [vmem:[#allocation3 + $0x364] ss:$16 sps:$4 sm:$0xff]  }
 0x29f   :  { %v2984_v45 = vsel %vm2976_vm1, %v6294_v35, %v2980_v40  ;;  %v2986_v49 = vsel %vm2978_vm2, %v6296_v36, %v2982_v41  ;;  %v2987_v50 = vpack.c.bf16 %v2983_v42, %v2983_v42  ;;  %v7124_v35 = vld [vmem:[#allocation3 + $0x36c] ss:$16 sps:$4 sm:$0xff]   ;;  %v7119_v36 = vld [vmem:[#allocation3 + $0x360] ss:$16 sps:$4 sm:$0xff]   ;;  %v7122_v37 = vld [vmem:[#allocation3 + $0x368] ss:$16 sps:$4 sm:$0xff]  }
 0x2a0   :  { %v2988_v46 = vpack.c.bf16 %v2984_v45, %v2984_v45  ;;  %v2990_v53 = vpack.c.bf16 %v2986_v49, %v2986_v49  ;;  %v7127_v38 = vld [vmem:[#allocation3 + $0x384] ss:$16 sps:$4 sm:$0xff]   ;;  %v7130_v39 = vld [vmem:[#allocation3 + $0x38c] ss:$16 sps:$4 sm:$0xff]   ;;  %v8813_v40 = vsub.s32 2, %v8788_v24 }
 0x2a1   :  { %v7125_v41 = vld [vmem:[#allocation3 + $0x380] ss:$16 sps:$4 sm:$0xff]   ;;  %v7128_v42 = vld [vmem:[#allocation3 + $0x388] ss:$16 sps:$4 sm:$0xff]   ;;  %v7133_v43 = vld [vmem:[#allocation3 + $0x3a4] ss:$16 sps:$4 sm:$0xff]  }
 0x2a2   :  { %3813 = vmatprep.mubr.bf16.mxu0 %v2988_v46  ;;  %3895 = vmatprep.mubr.bf16.mxu1 %v2988_v46  ;;  %v7136_v44 = vld [vmem:[#allocation3 + $0x3ac] ss:$16 sps:$4 sm:$0xff]   ;;  %v512_v45 = vrot.slane %v8796_v25, %v8813_v40  ;;  %v7131_v46 = vld [vmem:[#allocation3 + $0x3a0] ss:$16 sps:$4 sm:$0xff]  }
 0x2a3   :  { %3814 = vmatmul.mubr.bf16.vlgmr.msra.gmra.mrb[4].mxu0 %v2987_v50  ;;  %3896 = vmatmul.mubr.bf16.vlgmr.msra.gmra.mrb[4].mxu1 %v2987_v50  ;;  %v7142_v24 = vld [vmem:[#allocation3 + $0x3cc] ss:$16 sps:$4 sm:$0xff]   ;;  %v7137_v50 = vld [vmem:[#allocation3 + $0x3c0] ss:$16 sps:$4 sm:$0xff]  }
 0x2a4   :  { %3823 = vmatpush1.bf16.msra.mxu0 %v7053_v47  ;;  %3905 = vmatpush1.bf16.msra.mxu1 %v7056_v48  ;;  %v7134_v47 = vld [vmem:[#allocation3 + $0x3a8] ss:$16 sps:$4 sm:$0xff]   ;;  %v7139_v48 = vld [vmem:[#allocation3 + $0x3c4] ss:$16 sps:$4 sm:$0xff]   ;;  %v6295_v49 = vadd.f32 %v8810_v31, %v512_v45  ;;  %v7143_v25 = vld [vmem:[#allocation3 + $0x3e0] ss:$16 sps:$4 sm:$0xff]  }
 0x2a5   :  { %3854 = vmatprep.mubr.bf16.mxu0 %v2990_v53  ;;  %3936 = vmatprep.mubr.bf16.mxu1 %v2990_v53  ;;  %v7148_v53 = vld [vmem:[#allocation3 + $0x3ec] ss:$16 sps:$4 sm:$0xff]   ;;  %v7149_v31 = vld [vmem:[#allocation6] ss:$16 sps:$4 sm:$0xff]  }
 0x2a6   :  { %3824 = vmatprep.subr.bf16.mxu0 %v7061_v51  ;;  %3906 = vmatprep.subr.bf16.mxu1 %v7064_v52  ;;  %v7140_v51 = vld [vmem:[#allocation3 + $0x3c8] ss:$16 sps:$4 sm:$0xff]   ;;  %v7145_v52 = vld [vmem:[#allocation3 + $0x3e4] ss:$16 sps:$4 sm:$0xff]   ;;  %vm2977_vm3 = vcmp.ge.f32.partialorder %v6295_v49, 0.0 }
 0x2a7   :  { %v7220_v45 = vld [vmem:[#allocation6 + $0x16c] ss:$16 sps:$4 sm:$0xff]  }
 0x2a8   :  { %3825 = vmatpush1.bf16.msra.mxu0 %v7059_v54  ;;  %3907 = vmatpush1.bf16.msra.mxu1 %v7062_v55  ;;  %v2981_v54 = vmul.f32 0.01, %v6295_v49  ;;  %v7146_v55 = vld [vmem:[#allocation3 + $0x3e8] ss:$16 sps:$4 sm:$0xff]  }
 0x2a9   :  { %3826 = vmatprep.subr.bf16.mxu0 %v7067_v56  ;;  %3908 = vmatprep.subr.bf16.mxu1 %v7070_v57  ;;  %v7151_v56 = vld [vmem:[#allocation6 + $0x4] ss:$16 sps:$4 sm:$0xff]   ;;  %v7154_v57 = vld [vmem:[#allocation6 + $0xc] ss:$16 sps:$4 sm:$0xff]  }
 0x2ac   :  { %3827 = vmatpush1.bf16.msra.mxu0 %v7065_v58  ;;  %3909 = vmatpush1.bf16.msra.mxu1 %v7068_v59  ;;  %v2985_v58 = vsel %vm2977_vm3, %v6295_v49, %v2981_v54  ;;  %v7152_v59 = vld [vmem:[#allocation6 + $0x8] ss:$16 sps:$4 sm:$0xff]   ;;  %v7221_v49 = vld [vmem:[#allocation6 + $0x180] ss:$16 sps:$4 sm:$0xff]  }
 0x2ad   :  { %3828 = vmatprep.subr.bf16.mxu0 %v7073_v60  ;;  %3910 = vmatprep.subr.bf16.mxu1 %v7076_v61  ;;  %v2989_v60 = vpack.c.bf16 %v2985_v58, %v2985_v58  ;;  %v7157_v61 = vld [vmem:[#allocation6 + $0x24] ss:$16 sps:$4 sm:$0xff]   ;;  %v7230_v54 = vld [vmem:[#allocation6 + $0x1a8] ss:$16 sps:$4 sm:$0xff]  }
 0x2ae   :  { %v7241_v58 = vld [vmem:[#allocation6 + $0x1e4] ss:$16 sps:$4 sm:$0xff]  }
 0x2b0   :  { %3829 = vmatpush1.bf16.msra.mxu0 %v7071_v62  ;;  %3911 = vmatpush1.bf16.msra.mxu1 %v7074_v63  ;;  %v7160_v62 = vld [vmem:[#allocation6 + $0x2c] ss:$16 sps:$4 sm:$0xff]   ;;  %v7155_v63 = vld [vmem:[#allocation6 + $0x20] ss:$16 sps:$4 sm:$0xff]  }
 0x2b1   :  { %3830 = vmatprep.subr.bf16.mxu0 %v7079_v0  ;;  %3912 = vmatprep.subr.bf16.mxu1 %v7082_v1  ;;  %v7158_v0 = vld [vmem:[#allocation6 + $0x28] ss:$16 sps:$4 sm:$0xff]   ;;  %v7163_v1 = vld [vmem:[#allocation6 + $0x44] ss:$16 sps:$4 sm:$0xff]  }
 0x2b4   :  { %3831 = vmatpush1.bf16.msra.mxu0 %v7077_v2  ;;  %3913 = vmatpush1.bf16.msra.mxu1 %v7080_v3  ;;  %v7166_v2 = vld [vmem:[#allocation6 + $0x4c] ss:$16 sps:$4 sm:$0xff]   ;;  %v7161_v3 = vld [vmem:[#allocation6 + $0x40] ss:$16 sps:$4 sm:$0xff]  }
 0x2b5   :  { %3832 = vmatprep.subr.bf16.mxu0 %v7085_v4  ;;  %3914 = vmatprep.subr.bf16.mxu1 %v7088_v5  ;;  %v7164_v4 = vld [vmem:[#allocation6 + $0x48] ss:$16 sps:$4 sm:$0xff]   ;;  %v7169_v5 = vld [vmem:[#allocation6 + $0x64] ss:$16 sps:$4 sm:$0xff]  }
 0x2b8   :  { %3833 = vmatpush1.bf16.msra.mxu0 %v7083_v6  ;;  %3915 = vmatpush1.bf16.msra.mxu1 %v7086_v7  ;;  %v7172_v6 = vld [vmem:[#allocation6 + $0x6c] ss:$16 sps:$4 sm:$0xff]   ;;  %v7167_v7 = vld [vmem:[#allocation6 + $0x60] ss:$16 sps:$4 sm:$0xff]  }
 0x2b9   :  { %3834 = vmatprep.subr.bf16.mxu0 %v7091_v8  ;;  %3916 = vmatprep.subr.bf16.mxu1 %v7094_v9  ;;  %v7170_v8 = vld [vmem:[#allocation6 + $0x68] ss:$16 sps:$4 sm:$0xff]   ;;  %v7175_v9 = vld [vmem:[#allocation6 + $0x84] ss:$16 sps:$4 sm:$0xff]  }
 0x2bc   :  { %3835 = vmatpush1.bf16.msra.mxu0 %v7089_v10  ;;  %3917 = vmatpush1.bf16.msra.mxu1 %v7092_v11  ;;  %v7178_v10 = vld [vmem:[#allocation6 + $0x8c] ss:$16 sps:$4 sm:$0xff]   ;;  %v7173_v11 = vld [vmem:[#allocation6 + $0x80] ss:$16 sps:$4 sm:$0xff]  }
 0x2bd   :  { %3836 = vmatprep.subr.bf16.mxu0 %v7097_v13  ;;  %3918 = vmatprep.subr.bf16.mxu1 %v7100_v14  ;;  %v7176_v13 = vld [vmem:[#allocation6 + $0x88] ss:$16 sps:$4 sm:$0xff]   ;;  %v7181_v14 = vld [vmem:[#allocation6 + $0xa4] ss:$16 sps:$4 sm:$0xff]  }
 0x2c0   :  { %3837 = vmatpush1.bf16.msra.mxu0 %v7095_v16  ;;  %3919 = vmatpush1.bf16.msra.mxu1 %v7098_v12  ;;  %v7184_v16 = vld [vmem:[#allocation6 + $0xac] ss:$16 sps:$4 sm:$0xff]   ;;  %v7179_v12 = vld [vmem:[#allocation6 + $0xa0] ss:$16 sps:$4 sm:$0xff]  }
 0x2c1   :  { %3838 = vmatprep.subr.bf16.mxu0 %v7103_v18  ;;  %3920 = vmatprep.subr.bf16.mxu1 %v7106_v15  ;;  %v7182_v18 = vld [vmem:[#allocation6 + $0xa8] ss:$16 sps:$4 sm:$0xff]   ;;  %v7187_v15 = vld [vmem:[#allocation6 + $0xc4] ss:$16 sps:$4 sm:$0xff]  }
 0x2c4   :  { %3839 = vmatpush1.bf16.msra.mxu0 %v7101_v20  ;;  %3921 = vmatpush1.bf16.msra.mxu1 %v7104_v21  ;;  %v7190_v20 = vld [vmem:[#allocation6 + $0xcc] ss:$16 sps:$4 sm:$0xff]   ;;  %v7185_v21 = vld [vmem:[#allocation6 + $0xc0] ss:$16 sps:$4 sm:$0xff]  }
 0x2c5   :  { %3840 = vmatprep.subr.bf16.mxu0 %v7109_v22  ;;  %3922 = vmatprep.subr.bf16.mxu1 %v7112_v23  ;;  %v7188_v22 = vld [vmem:[#allocation6 + $0xc8] ss:$16 sps:$4 sm:$0xff]   ;;  %v7193_v23 = vld [vmem:[#allocation6 + $0xe4] ss:$16 sps:$4 sm:$0xff]  }
 0x2c8   :  { %3841 = vmatpush1.bf16.msra.mxu0 %v7107_v28  ;;  %3923 = vmatpush1.bf16.msra.mxu1 %v7110_v29  ;;  %v7196_v28 = vld [vmem:[#allocation6 + $0xec] ss:$16 sps:$4 sm:$0xff]   ;;  %v7191_v29 = vld [vmem:[#allocation6 + $0xe0] ss:$16 sps:$4 sm:$0xff]  }
 0x2c9   :  { %3842 = vmatprep.subr.bf16.mxu0 %v7115_v30  ;;  %3924 = vmatprep.subr.bf16.mxu1 %v7118_v19  ;;  %v7194_v30 = vld [vmem:[#allocation6 + $0xe8] ss:$16 sps:$4 sm:$0xff]   ;;  %v7199_v19 = vld [vmem:[#allocation6 + $0x104] ss:$16 sps:$4 sm:$0xff]  }
 0x2cc   :  { %3843 = vmatpush1.bf16.msra.mxu0 %v7113_v32  ;;  %3925 = vmatpush1.bf16.msra.mxu1 %v7116_v33  ;;  %v7202_v32 = vld [vmem:[#allocation6 + $0x10c] ss:$16 sps:$4 sm:$0xff]   ;;  %v7197_v33 = vld [vmem:[#allocation6 + $0x100] ss:$16 sps:$4 sm:$0xff]  }
 0x2cd   :  { %3844 = vmatprep.subr.bf16.mxu0 %v7121_v34  ;;  %3926 = vmatprep.subr.bf16.mxu1 %v7124_v35  ;;  %v7200_v34 = vld [vmem:[#allocation6 + $0x108] ss:$16 sps:$4 sm:$0xff]   ;;  %v7205_v35 = vld [vmem:[#allocation6 + $0x124] ss:$16 sps:$4 sm:$0xff]  }
 0x2d0   :  { %3845 = vmatpush1.bf16.msra.mxu0 %v7119_v36  ;;  %3927 = vmatpush1.bf16.msra.mxu1 %v7122_v37  ;;  %v7208_v36 = vld [vmem:[#allocation6 + $0x12c] ss:$16 sps:$4 sm:$0xff]   ;;  %v7203_v37 = vld [vmem:[#allocation6 + $0x120] ss:$16 sps:$4 sm:$0xff]  }
 0x2d1   :  { %3846 = vmatprep.subr.bf16.mxu0 %v7127_v38  ;;  %3928 = vmatprep.subr.bf16.mxu1 %v7130_v39  ;;  %v7206_v38 = vld [vmem:[#allocation6 + $0x128] ss:$16 sps:$4 sm:$0xff]   ;;  %v7211_v39 = vld [vmem:[#allocation6 + $0x144] ss:$16 sps:$4 sm:$0xff]  }
 0x2d4   :  { %3847 = vmatpush1.bf16.msra.mxu0 %v7125_v41  ;;  %3929 = vmatpush1.bf16.msra.mxu1 %v7128_v42  ;;  %v7214_v41 = vld [vmem:[#allocation6 + $0x14c] ss:$16 sps:$4 sm:$0xff]   ;;  %v7209_v42 = vld [vmem:[#allocation6 + $0x140] ss:$16 sps:$4 sm:$0xff]  }
 0x2d5   :  { %3848 = vmatprep.subr.bf16.mxu0 %v7133_v43  ;;  %3930 = vmatprep.subr.bf16.mxu1 %v7136_v44  ;;  %v7212_v43 = vld [vmem:[#allocation6 + $0x148] ss:$16 sps:$4 sm:$0xff]   ;;  %v7217_v44 = vld [vmem:[#allocation6 + $0x164] ss:$16 sps:$4 sm:$0xff]  }
 0x2d8   :  { %3849 = vmatpush1.bf16.msra.mxu0 %v7131_v46  ;;  %3931 = vmatpush1.bf16.msra.mxu1 %v7134_v47  ;;  %v7215_v46 = vld [vmem:[#allocation6 + $0x160] ss:$16 sps:$4 sm:$0xff]   ;;  %v7218_v47 = vld [vmem:[#allocation6 + $0x168] ss:$16 sps:$4 sm:$0xff]  }
 0x2d9   :  { %3850 = vmatprep.subr.bf16.mxu0 %v7139_v48  ;;  %3932 = vmatprep.subr.bf16.mxu1 %v7142_v24  ;;  %v7223_v48 = vld [vmem:[#allocation6 + $0x184] ss:$16 sps:$4 sm:$0xff]   ;;  %v7226_v24 = vld [vmem:[#allocation6 + $0x18c] ss:$16 sps:$4 sm:$0xff]  }
 0x2dc   :  { %3851 = vmatpush1.bf16.msra.mxu0 %v7137_v50  ;;  %3933 = vmatpush1.bf16.msra.mxu1 %v7140_v51  ;;  %v7224_v50 = vld [vmem:[#allocation6 + $0x188] ss:$16 sps:$4 sm:$0xff]   ;;  %v7229_v51 = vld [vmem:[#allocation6 + $0x1a4] ss:$16 sps:$4 sm:$0xff]  }
 0x2dd   :  { %3852 = vmatprep.subr.bf16.mxu0 %v7145_v52  ;;  %3934 = vmatprep.subr.bf16.mxu1 %v7148_v53  ;;  %v7232_v52 = vld [vmem:[#allocation6 + $0x1ac] ss:$16 sps:$4 sm:$0xff]   ;;  %v7227_v53 = vld [vmem:[#allocation6 + $0x1a0] ss:$16 sps:$4 sm:$0xff]  }
 0x2e0   :  { %3853 = vmatpush1.bf16.msra.mxu0 %v7143_v25  ;;  %3935 = vmatpush1.bf16.msra.mxu1 %v7146_v55  ;;  %v7235_v25 = vld [vmem:[#allocation6 + $0x1c4] ss:$16 sps:$4 sm:$0xff]   ;;  %v7238_v55 = vld [vmem:[#allocation6 + $0x1cc] ss:$16 sps:$4 sm:$0xff]  }
 0x2e1   :  { %4751 = vmatprep.subr.bf16.mxu0 %v7151_v56  ;;  %4833 = vmatprep.subr.bf16.mxu1 %v7154_v57  ;;  %v7233_v56 = vld [vmem:[#allocation6 + $0x1c0] ss:$16 sps:$4 sm:$0xff]   ;;  %v7236_v57 = vld [vmem:[#allocation6 + $0x1c8] ss:$16 sps:$4 sm:$0xff]  }
 0x2e3   :  { %3855 = vmatmul.mubr.bf16.vlgmr.msra.gmra.mrb[4].mxu0 %v2989_v60  ;;  %3937 = vmatmul.mubr.bf16.vlgmr.msra.gmra.mrb[4].mxu1 %v2989_v60  ;;  %v7242_v60 = vld [vmem:[#allocation6 + $0x1e8] ss:$16 sps:$4 sm:$0xff]  }
 0x2e4   :  { %4752 = vmatpush1.bf16.msra.mxu0 %v7149_v31  ;;  %4834 = vmatpush1.bf16.msra.mxu1 %v7152_v59  ;;  %v7244_v31 = vld [vmem:[#allocation6 + $0x1ec] ss:$16 sps:$4 sm:$0xff]   ;;  %v7239_v59 = vld [vmem:[#allocation6 + $0x1e0] ss:$16 sps:$4 sm:$0xff]  }
 0x2e5   :  { %4753 = vmatprep.subr.bf16.mxu0 %v7157_v61  ;;  %4835 = vmatprep.subr.bf16.mxu1 %v7160_v62  ;;  %v7247_v61 = vld [vmem:[#allocation6 + $0x204] ss:$16 sps:$4 sm:$0xff]   ;;  %v7250_v62 = vld [vmem:[#allocation6 + $0x20c] ss:$16 sps:$4 sm:$0xff]  }
 0x2e8   :  { %4754 = vmatpush1.bf16.msra.mxu0 %v7155_v63  ;;  %4836 = vmatpush1.bf16.msra.mxu1 %v7158_v0  ;;  %v8821_v63 = vld [vmem:[%s9004_s4] sm:$0xf]  ;;  %s5413_s4 = sld [smem:[#allocation8]] }
 0x2e9   :  { %4755 = vmatprep.subr.bf16.mxu0 %v7163_v1  ;;  %4837 = vmatprep.subr.bf16.mxu1 %v7166_v2  ;;  %v3124_v0 = vrot.slane %v8821_v63, %v8791_v17  ;;  %v3128_v1 = vrot.slane %v8821_v63, %v8799_v26  ;;  %v3136_v2 = vrot.slane %v8821_v63, %v8802_v27 }
 0x2ec   :  { %4756 = vmatpush1.bf16.msra.mxu0 %v7161_v3  ;;  %4838 = vmatpush1.bf16.msra.mxu1 %v7164_v4 }
 0x2ed   :  { %4757 = vmatprep.subr.bf16.mxu0 %v7169_v5  ;;  %4839 = vmatprep.subr.bf16.mxu1 %v7172_v6 }
 0x2f0   :  { %4758 = vmatpush1.bf16.msra.mxu0 %v7167_v7  ;;  %4840 = vmatpush1.bf16.msra.mxu1 %v7170_v8 }
 0x2f1   :  { %4759 = vmatprep.subr.bf16.mxu0 %v7175_v9  ;;  %4841 = vmatprep.subr.bf16.mxu1 %v7178_v10 }
 0x2f4   :  { %4760 = vmatpush1.bf16.msra.mxu0 %v7173_v11  ;;  %4842 = vmatpush1.bf16.msra.mxu1 %v7176_v13 }
 0x2f5   :  { %4761 = vmatprep.subr.bf16.mxu0 %v7181_v14  ;;  %4843 = vmatprep.subr.bf16.mxu1 %v7184_v16 }
 0x2f8   :  { %4762 = vmatpush1.bf16.msra.mxu0 %v7179_v12  ;;  %4844 = vmatpush1.bf16.msra.mxu1 %v7182_v18 }
 0x2f9   :  { %4763 = vmatprep.subr.bf16.mxu0 %v7187_v15  ;;  %4845 = vmatprep.subr.bf16.mxu1 %v7190_v20 }
 0x2fc   :  { %4764 = vmatpush1.bf16.msra.mxu0 %v7185_v21  ;;  %4846 = vmatpush1.bf16.msra.mxu1 %v7188_v22  ;;  %v7245_v22 = vld [vmem:[#allocation6 + $0x200] ss:$16 sps:$4 sm:$0xff]  }
 0x2fd   :  { %4765 = vmatprep.subr.bf16.mxu0 %v7193_v23  ;;  %4847 = vmatprep.subr.bf16.mxu1 %v7196_v28  ;;  %v7248_v23 = vld [vmem:[#allocation6 + $0x208] ss:$16 sps:$4 sm:$0xff]  }
 0x300   :  { %4766 = vmatpush1.bf16.msra.mxu0 %v7191_v29  ;;  %4848 = vmatpush1.bf16.msra.mxu1 %v7194_v30  ;;  %v7253_v30 = vld [vmem:[#allocation6 + $0x224] ss:$16 sps:$4 sm:$0xff]  }
 0x301   :  { %4767 = vmatprep.subr.bf16.mxu0 %v7199_v19  ;;  %4849 = vmatprep.subr.bf16.mxu1 %v7202_v32  ;;  %v7256_v19 = vld [vmem:[#allocation6 + $0x22c] ss:$16 sps:$4 sm:$0xff]  }
 0x304   :  { %4768 = vmatpush1.bf16.msra.mxu0 %v7197_v33  ;;  %4850 = vmatpush1.bf16.msra.mxu1 %v7200_v34  ;;  %v7251_v33 = vld [vmem:[#allocation6 + $0x220] ss:$16 sps:$4 sm:$0xff]   ;;  %v7254_v34 = vld [vmem:[#allocation6 + $0x228] ss:$16 sps:$4 sm:$0xff]  }
 0x305   :  { %4769 = vmatprep.subr.bf16.mxu0 %v7205_v35  ;;  %4851 = vmatprep.subr.bf16.mxu1 %v7208_v36  ;;  %v7259_v35 = vld [vmem:[#allocation6 + $0x244] ss:$16 sps:$4 sm:$0xff]   ;;  %v7262_v36 = vld [vmem:[#allocation6 + $0x24c] ss:$16 sps:$4 sm:$0xff]  }
 0x308   :  { %4770 = vmatpush1.bf16.msra.mxu0 %v7203_v37  ;;  %4852 = vmatpush1.bf16.msra.mxu1 %v7206_v38  ;;  %v7257_v37 = vld [vmem:[#allocation6 + $0x240] ss:$16 sps:$4 sm:$0xff]   ;;  %v7260_v38 = vld [vmem:[#allocation6 + $0x248] ss:$16 sps:$4 sm:$0xff]  }
 0x309   :  { %4771 = vmatprep.subr.bf16.mxu0 %v7211_v39  ;;  %4853 = vmatprep.subr.bf16.mxu1 %v7214_v41  ;;  %v7265_v39 = vld [vmem:[#allocation6 + $0x264] ss:$16 sps:$4 sm:$0xff]   ;;  %v7268_v41 = vld [vmem:[#allocation6 + $0x26c] ss:$16 sps:$4 sm:$0xff]  }
 0x30c   :  { %4772 = vmatpush1.bf16.msra.mxu0 %v7209_v42  ;;  %4854 = vmatpush1.bf16.msra.mxu1 %v7212_v43  ;;  %v7263_v42 = vld [vmem:[#allocation6 + $0x260] ss:$16 sps:$4 sm:$0xff]   ;;  %v7266_v43 = vld [vmem:[#allocation6 + $0x268] ss:$16 sps:$4 sm:$0xff]  }
 0x30d   :  { %4773 = vmatprep.subr.bf16.mxu0 %v7217_v44  ;;  %4855 = vmatprep.subr.bf16.mxu1 %v7220_v45  ;;  %v7271_v44 = vld [vmem:[#allocation6 + $0x284] ss:$16 sps:$4 sm:$0xff]   ;;  %v7274_v45 = vld [vmem:[#allocation6 + $0x28c] ss:$16 sps:$4 sm:$0xff]  }
 0x310   :  { %4774 = vmatpush1.bf16.msra.mxu0 %v7215_v46  ;;  %4856 = vmatpush1.bf16.msra.mxu1 %v7218_v47  ;;  %v7269_v46 = vld [vmem:[#allocation6 + $0x280] ss:$16 sps:$4 sm:$0xff]   ;;  %v7272_v47 = vld [vmem:[#allocation6 + $0x288] ss:$16 sps:$4 sm:$0xff]  }
 0x311   :  { %4775 = vmatprep.subr.bf16.mxu0 %v7223_v48  ;;  %4857 = vmatprep.subr.bf16.mxu1 %v7226_v24  ;;  %v7277_v48 = vld [vmem:[#allocation6 + $0x2a4] ss:$16 sps:$4 sm:$0xff]   ;;  %v7280_v24 = vld [vmem:[#allocation6 + $0x2ac] ss:$16 sps:$4 sm:$0xff]  }
 0x314   :  { %4776 = vmatpush1.bf16.msra.mxu0 %v7221_v49  ;;  %4858 = vmatpush1.bf16.msra.mxu1 %v7224_v50  ;;  %v7275_v49 = vld [vmem:[#allocation6 + $0x2a0] ss:$16 sps:$4 sm:$0xff]   ;;  %v7278_v50 = vld [vmem:[#allocation6 + $0x2a8] ss:$16 sps:$4 sm:$0xff]  }
 0x315   :  { %4777 = vmatprep.subr.bf16.mxu0 %v7229_v51  ;;  %4859 = vmatprep.subr.bf16.mxu1 %v7232_v52  ;;  %v7283_v51 = vld [vmem:[#allocation6 + $0x2c4] ss:$16 sps:$4 sm:$0xff]   ;;  %v7286_v52 = vld [vmem:[#allocation6 + $0x2cc] ss:$16 sps:$4 sm:$0xff]  }
 0x318   :  { %4778 = vmatpush1.bf16.msra.mxu0 %v7227_v53  ;;  %4860 = vmatpush1.bf16.msra.mxu1 %v7230_v54  ;;  %v7281_v53 = vld [vmem:[#allocation6 + $0x2c0] ss:$16 sps:$4 sm:$0xff]   ;;  %v7284_v54 = vld [vmem:[#allocation6 + $0x2c8] ss:$16 sps:$4 sm:$0xff]  }
 0x319   :  { %4779 = vmatprep.subr.bf16.mxu0 %v7235_v25  ;;  %4861 = vmatprep.subr.bf16.mxu1 %v7238_v55  ;;  %v7289_v25 = vld [vmem:[#allocation6 + $0x2e4] ss:$16 sps:$4 sm:$0xff]   ;;  %v7292_v55 = vld [vmem:[#allocation6 + $0x2ec] ss:$16 sps:$4 sm:$0xff]  }
 0x31c   :  { %4780 = vmatpush1.bf16.msra.mxu0 %v7233_v56  ;;  %4862 = vmatpush1.bf16.msra.mxu1 %v7236_v57  ;;  %v7287_v56 = vld [vmem:[#allocation6 + $0x2e0] ss:$16 sps:$4 sm:$0xff]   ;;  %v7290_v57 = vld [vmem:[#allocation6 + $0x2e8] ss:$16 sps:$4 sm:$0xff]  }
 0x31d   :  { %4781 = vmatprep.subr.bf16.mxu0 %v7241_v58  ;;  %4863 = vmatprep.subr.bf16.mxu1 %v7244_v31  ;;  %v7295_v58 = vld [vmem:[#allocation6 + $0x304] ss:$16 sps:$4 sm:$0xff]   ;;  %v7298_v31 = vld [vmem:[#allocation6 + $0x30c] ss:$16 sps:$4 sm:$0xff]  }
 0x320   :  { %4782 = vmatpush1.bf16.msra.mxu0 %v7239_v59  ;;  %4864 = vmatpush1.bf16.msra.mxu1 %v7242_v60  ;;  %v7293_v59 = vld [vmem:[#allocation6 + $0x300] ss:$16 sps:$4 sm:$0xff]   ;;  %v7296_v60 = vld [vmem:[#allocation6 + $0x308] ss:$16 sps:$4 sm:$0xff]  }
 0x321   :  { %4792 = vmatprep.subr.bf16.mxu0 %v7247_v61  ;;  %4874 = vmatprep.subr.bf16.mxu1 %v7250_v62  ;;  %v7301_v61 = vld [vmem:[#allocation6 + $0x324] ss:$16 sps:$4 sm:$0xff]   ;;  %v7304_v62 = vld [vmem:[#allocation6 + $0x32c] ss:$16 sps:$4 sm:$0xff]  }
 0x3b6   :  { %v3856_v3 = vpop.f32.mrb[4].mxu0  ;;  %v8829_v4 = vpop.f32.mrb[4].mxu1 }
 0x3b7   :  { %v6297_v5 = vadd.f32 %v3856_v3, %v3124_v0  ;;  %v3858_v6 = vpop.f32.mrb[5].mxu0  ;;  %v3940_v7 = vpop.f32.mrb[5].mxu1  ;;  %v7299_v0 = vld [vmem:[#allocation6 + $0x320] ss:$16 sps:$4 sm:$0xff]   ;;  %v7310_v3 = vld [vmem:[#allocation6 + $0x34c] ss:$16 sps:$4 sm:$0xff]  }
 0x3b8   :  { %v6298_v8 = vadd.f32 %v3858_v6, %v3128_v1  ;;  %v6300_v9 = vadd.f32 %v3940_v7, %v3136_v2  ;;  %v3860_v10 = vpop.f32.mrb[6].mxu0  ;;  %v3942_v11 = vpop.f32.mrb[6].mxu1  ;;  %v7302_v1 = vld [vmem:[#allocation6 + $0x328] ss:$16 sps:$4 sm:$0xff]   ;;  %v7307_v2 = vld [vmem:[#allocation6 + $0x344] ss:$16 sps:$4 sm:$0xff]  }
 0x3b9   :  { %vm3945_vm4 = vcmp.ge.f32.partialorder %v6297_v5, 0.0  ;;  %v3949_v13 = vmul.f32 0.01, %v6297_v5  ;;  %v3861_v18 = vpop.f32.mrb[7].mxu0  ;;  %v3943_v15 = vpop.f32.mrb[7].mxu1 }
 0x3ba   :  { %vm3946_vm5 = vcmp.ge.f32.partialorder %v6298_v8, 0.0  ;;  %v3950_v14 = vmul.f32 0.01, %v6298_v8  ;;  %vm3948_vm6 = vcmp.ge.f32.partialorder %v6300_v9, 0.0  ;;  %v3952_v16 = vmul.f32 0.01, %v6300_v9 }
 0x3bb   :  { %v3953_v12 = vsel %vm3945_vm4, %v6297_v5, %v3949_v13  ;;  %v7305_v5 = vld [vmem:[#allocation6 + $0x340] ss:$16 sps:$4 sm:$0xff]   ;;  %v7308_v6 = vld [vmem:[#allocation6 + $0x348] ss:$16 sps:$4 sm:$0xff]   ;;  %v7313_v7 = vld [vmem:[#allocation6 + $0x364] ss:$16 sps:$4 sm:$0xff]   ;;  %v3132_v15 = vrot.slane %v8821_v63, %v8813_v40 }
 0x3bc   :  { %v3954_v20 = vsel %vm3946_vm5, %v6298_v8, %v3950_v14  ;;  %v3956_v28 = vsel %vm3948_vm6, %v6300_v9, %v3952_v16  ;;  %v3957_v29 = vpack.c.bf16 %v3953_v12, %v3953_v12  ;;  %v7316_v8 = vld [vmem:[#allocation6 + $0x36c] ss:$16 sps:$4 sm:$0xff]   ;;  %v7311_v9 = vld [vmem:[#allocation6 + $0x360] ss:$16 sps:$4 sm:$0xff]   ;;  %v7314_v10 = vld [vmem:[#allocation6 + $0x368] ss:$16 sps:$4 sm:$0xff]  }
 0x3bd   :  { %v3958_v21 = vpack.c.bf16 %v3954_v20, %v3954_v20  ;;  %v3960_v32 = vpack.c.bf16 %v3956_v28, %v3956_v28  ;;  %v7319_v11 = vld [vmem:[#allocation6 + $0x384] ss:$16 sps:$4 sm:$0xff]   ;;  %v7322_v13 = vld [vmem:[#allocation6 + $0x38c] ss:$16 sps:$4 sm:$0xff]   ;;  %v7317_v14 = vld [vmem:[#allocation6 + $0x380] ss:$16 sps:$4 sm:$0xff]   ;;  %v6299_v28 = vadd.f32 %v8829_v4, %v3132_v15 }
 0x3be   :  { %v7320_v16 = vld [vmem:[#allocation6 + $0x388] ss:$16 sps:$4 sm:$0xff]   ;;  %v7325_v12 = vld [vmem:[#allocation6 + $0x3a4] ss:$16 sps:$4 sm:$0xff]   ;;  %v7328_v18 = vld [vmem:[#allocation6 + $0x3ac] ss:$16 sps:$4 sm:$0xff]  }
 0x3bf   :  { %4783 = vmatprep.mubr.bf16.mxu0 %v3958_v21  ;;  %4865 = vmatprep.mubr.bf16.mxu1 %v3958_v21  ;;  %v7323_v20 = vld [vmem:[#allocation6 + $0x3a0] ss:$16 sps:$4 sm:$0xff]   ;;  %v7326_v21 = vld [vmem:[#allocation6 + $0x3a8] ss:$16 sps:$4 sm:$0xff]   ;;  %vm3947_vm7 = vcmp.ge.f32.partialorder %v6299_v28, 0.0 }
 0x3c0   :  { %4784 = vmatmul.mubr.bf16.vlgmr.msra.gmra.mrb[8].mxu0 %v3957_v29  ;;  %4866 = vmatmul.mubr.bf16.vlgmr.msra.gmra.mrb[8].mxu1 %v3957_v29  ;;  %v7329_v29 = vld [vmem:[#allocation6 + $0x3c0] ss:$16 sps:$4 sm:$0xff]  }
 0x3c1   :  { %4793 = vmatpush1.bf16.msra.mxu0 %v7245_v22  ;;  %4875 = vmatpush1.bf16.msra.mxu1 %v7248_v23  ;;  %v7331_v22 = vld [vmem:[#allocation6 + $0x3c4] ss:$16 sps:$4 sm:$0xff]   ;;  %v7334_v23 = vld [vmem:[#allocation6 + $0x3cc] ss:$16 sps:$4 sm:$0xff]   ;;  %v7335_v63 = vld [vmem:[#allocation6 + $0x3e0] ss:$16 sps:$4 sm:$0xff]  }
 0x3c2   :  { %4824 = vmatprep.mubr.bf16.mxu0 %v3960_v32  ;;  %4906 = vmatprep.mubr.bf16.mxu1 %v3960_v32  ;;  %v7340_v32 = vld [vmem:[#allocation6 + $0x3ec] ss:$16 sps:$4 sm:$0xff]  }
 0x3c3   :  { %4794 = vmatprep.subr.bf16.mxu0 %v7253_v30  ;;  %4876 = vmatprep.subr.bf16.mxu1 %v7256_v19  ;;  %v7332_v30 = vld [vmem:[#allocation6 + $0x3c8] ss:$16 sps:$4 sm:$0xff]   ;;  %v7337_v19 = vld [vmem:[#allocation6 + $0x3e4] ss:$16 sps:$4 sm:$0xff]  }
 0x3c4   :  { %v7341_v4 = vld [vmem:[%s9007_s7 + $0x40] sm:$0xff]  }
 0x3c5   :  { %4795 = vmatpush1.bf16.msra.mxu0 %v7251_v33  ;;  %4877 = vmatpush1.bf16.msra.mxu1 %v7254_v34  ;;  %v3951_v33 = vmul.f32 0.01, %v6299_v28  ;;  %v7338_v34 = vld [vmem:[#allocation6 + $0x3e8] ss:$16 sps:$4 sm:$0xff]  }
 0x3c6   :  { %4796 = vmatprep.subr.bf16.mxu0 %v7259_v35  ;;  %4878 = vmatprep.subr.bf16.mxu1 %v7262_v36  ;;  %v7342_v35 = vld [vmem:[%s9007_s7 + $0xc0] sm:$0xff]  }
 0x3c7   :  { %v3955_v36 = vsel %vm3947_vm7, %v6299_v28, %v3951_v33 }
 0x3c9   :  { %4797 = vmatpush1.bf16.msra.mxu0 %v7257_v37  ;;  %4879 = vmatpush1.bf16.msra.mxu1 %v7260_v38  ;;  %v7343_v37 = vld [vmem:[%s9007_s7] sm:$0xff]  }
 0x3ca   :  { %4798 = vmatprep.subr.bf16.mxu0 %v7265_v39  ;;  %4880 = vmatprep.subr.bf16.mxu1 %v7268_v41  ;;  %v7344_v38 = vld [vmem:[%s9007_s7 + $0x80] sm:$0xff]   ;;  %v3959_v39 = vpack.c.bf16 %v3955_v36, %v3955_v36  ;;  %v7345_v41 = vld [vmem:[%s9007_s7 + $0x48] sm:$0xff]   ;;  %v7375_v36 = vld [vmem:[%s9009_s9 + $0x10] sm:$0xff]  }
 0x3cd   :  { %4799 = vmatpush1.bf16.msra.mxu0 %v7263_v42  ;;  %4881 = vmatpush1.bf16.msra.mxu1 %v7266_v43  ;;  %v7346_v42 = vld [vmem:[%s9007_s7 + $0xc8] sm:$0xff]  }
 0x3ce   :  { %4800 = vmatprep.subr.bf16.mxu0 %v7271_v44  ;;  %4882 = vmatprep.subr.bf16.mxu1 %v7274_v45  ;;  %v7347_v43 = vld [vmem:[%s9007_s7 + $0x8] sm:$0xff]   ;;  %v7349_v45 = vld [vmem:[%s9007_s7 + $0x50] sm:$0xff]  }
 0x3cf   :  { %v7348_v44 = vld [vmem:[%s9007_s7 + $0x88] sm:$0xff]  }
 0x3d1   :  { %4801 = vmatpush1.bf16.msra.mxu0 %v7269_v46  ;;  %4883 = vmatpush1.bf16.msra.mxu1 %v7272_v47  ;;  %v7350_v46 = vld [vmem:[%s9007_s7 + $0xd0] sm:$0xff]  }
 0x3d2   :  { %4802 = vmatprep.subr.bf16.mxu0 %v7277_v48  ;;  %4884 = vmatprep.subr.bf16.mxu1 %v7280_v24  ;;  %v7351_v47 = vld [vmem:[%s9007_s7 + $0x10] sm:$0xff]   ;;  %v7353_v24 = vld [vmem:[%s9007_s7 + $0x58] sm:$0xff]  }
 0x3d3   :  { %v7352_v48 = vld [vmem:[%s9007_s7 + $0x90] sm:$0xff]  }
 0x3d5   :  { %4803 = vmatpush1.bf16.msra.mxu0 %v7275_v49  ;;  %4885 = vmatpush1.bf16.msra.mxu1 %v7278_v50  ;;  %v7354_v49 = vld [vmem:[%s9007_s7 + $0xd8] sm:$0xff]  }
 0x3d6   :  { %4804 = vmatprep.subr.bf16.mxu0 %v7283_v51  ;;  %4886 = vmatprep.subr.bf16.mxu1 %v7286_v52  ;;  %v7355_v50 = vld [vmem:[%s9007_s7 + $0x18] sm:$0xff]   ;;  %v7357_v52 = vld [vmem:[%s9007_s7 + $0x60] sm:$0xff]  }
 0x3d7   :  { %v7356_v51 = vld [vmem:[%s9007_s7 + $0x98] sm:$0xff]  }
 0x3d9   :  { %4805 = vmatpush1.bf16.msra.mxu0 %v7281_v53  ;;  %4887 = vmatpush1.bf16.msra.mxu1 %v7284_v54  ;;  %v7358_v53 = vld [vmem:[%s9007_s7 + $0xe0] sm:$0xff]  }
 0x3da   :  { %4806 = vmatprep.subr.bf16.mxu0 %v7289_v25  ;;  %4888 = vmatprep.subr.bf16.mxu1 %v7292_v55  ;;  %v7359_v54 = vld [vmem:[%s9007_s7 + $0x20] sm:$0xff]   ;;  %v7361_v55 = vld [vmem:[%s9007_s7 + $0x68] sm:$0xff]  }
 0x3db   :  { %v7360_v25 = vld [vmem:[%s9007_s7 + $0xa0] sm:$0xff]  }
 0x3dd   :  { %4807 = vmatpush1.bf16.msra.mxu0 %v7287_v56  ;;  %4889 = vmatpush1.bf16.msra.mxu1 %v7290_v57  ;;  %v7362_v56 = vld [vmem:[%s9007_s7 + $0xe8] sm:$0xff]  }
 0x3de   :  { %4808 = vmatprep.subr.bf16.mxu0 %v7295_v58  ;;  %4890 = vmatprep.subr.bf16.mxu1 %v7298_v31  ;;  %v7363_v57 = vld [vmem:[%s9007_s7 + $0x28] sm:$0xff]   ;;  %v7365_v31 = vld [vmem:[%s9007_s7 + $0x70] sm:$0xff]  }
 0x3df   :  { %v7364_v58 = vld [vmem:[%s9007_s7 + $0xa8] sm:$0xff]  }
 0x3e1   :  { %4809 = vmatpush1.bf16.msra.mxu0 %v7293_v59  ;;  %4891 = vmatpush1.bf16.msra.mxu1 %v7296_v60  ;;  %v7366_v59 = vld [vmem:[%s9007_s7 + $0xf0] sm:$0xff]  }
 0x3e2   :  { %4810 = vmatprep.subr.bf16.mxu0 %v7301_v61  ;;  %4892 = vmatprep.subr.bf16.mxu1 %v7304_v62  ;;  %v7367_v60 = vld [vmem:[%s9007_s7 + $0x30] sm:$0xff]   ;;  %v7369_v62 = vld [vmem:[%s9007_s7 + $0x78] sm:$0xff]  }
 0x3e3   :  { %v7368_v61 = vld [vmem:[%s9007_s7 + $0xb0] sm:$0xff]  }
 0x3e5   :  { %4811 = vmatpush1.bf16.msra.mxu0 %v7299_v0  ;;  %4893 = vmatpush1.bf16.msra.mxu1 %v7302_v1  ;;  %v7370_v0 = vld [vmem:[%s9007_s7 + $0xf8] sm:$0xff]  }
 0x3e6   :  { %4812 = vmatprep.subr.bf16.mxu0 %v7307_v2  ;;  %4894 = vmatprep.subr.bf16.mxu1 %v7310_v3  ;;  %v7371_v1 = vld [vmem:[%s9007_s7 + $0x38] sm:$0xff]   ;;  %v7468_v3 = vmov 0.0  }
 0x3e7   :  { %v7372_v2 = vld [vmem:[%s9007_s7 + $0xb8] sm:$0xff]  }
 0x3e9   :  { %4813 = vmatpush1.bf16.msra.mxu0 %v7305_v5  ;;  %4895 = vmatpush1.bf16.msra.mxu1 %v7308_v6  ;;  %v4089_v5 = vld [vmem:[%s9006_s6] sm:$0xf] }
 0x3ea   :  { %4814 = vmatprep.subr.bf16.mxu0 %v7313_v7  ;;  %4896 = vmatprep.subr.bf16.mxu1 %v7316_v8  ;;  %v4094_v6 = vrot.slane %v4089_v5, %v8791_v17  ;;  %v4102_v7 = vrot.slane %v4089_v5, %v8813_v40  ;;  %v4098_v8 = vrot.slane %v4089_v5, %v8799_v26 }
 0x3ed   :  { %4815 = vmatpush1.bf16.msra.mxu0 %v7311_v9  ;;  %4897 = vmatpush1.bf16.msra.mxu1 %v7314_v10  ;;  %v4106_v9 = vrot.slane %v4089_v5, %v8802_v27 }
 0x3ee   :  { %4816 = vmatprep.subr.bf16.mxu0 %v7319_v11  ;;  %4898 = vmatprep.subr.bf16.mxu1 %v7322_v13 }
 0x3f1   :  { %4817 = vmatpush1.bf16.msra.mxu0 %v7317_v14  ;;  %4899 = vmatpush1.bf16.msra.mxu1 %v7320_v16 }
 0x3f2   :  { %4818 = vmatprep.subr.bf16.mxu0 %v7325_v12  ;;  %4900 = vmatprep.subr.bf16.mxu1 %v7328_v18 }
 0x3f5   :  { %4819 = vmatpush1.bf16.msra.mxu0 %v7323_v20  ;;  %4901 = vmatpush1.bf16.msra.mxu1 %v7326_v21 }
 0x3f6   :  { %4820 = vmatprep.subr.bf16.mxu0 %v7331_v22  ;;  %4902 = vmatprep.subr.bf16.mxu1 %v7334_v23 }
 0x3f9   :  { %4821 = vmatpush1.bf16.msra.mxu0 %v7329_v29  ;;  %4903 = vmatpush1.bf16.msra.mxu1 %v7332_v30 }
 0x3fa   :  { %4822 = vmatprep.subr.bf16.mxu0 %v7337_v19  ;;  %4904 = vmatprep.subr.bf16.mxu1 %v7340_v32 }
 0x3fd   :  { %4823 = vmatpush1.bf16.msra.mxu0 %v7335_v63  ;;  %4905 = vmatpush1.bf16.msra.mxu1 %v7338_v34  ;;  %v7373_v63 = vld [vmem:[%s9009_s9] sm:$0xff]  }
 0x3fe   :  { %6220 = vmatprep.subr.bf16.mxu0 %v7341_v4  ;;  %6242 = vmatprep.subr.bf16.mxu1 %v7342_v35  ;;  %v7374_v35 = vld [vmem:[%s9009_s9 + $0x8] sm:$0xff]  }
 0x400   :  { %4825 = vmatmul.mubr.bf16.vlgmr.msra.gmra.mrb[8].mxu0 %v3959_v39  ;;  %4907 = vmatmul.mubr.bf16.vlgmr.msra.gmra.mrb[8].mxu1 %v3959_v39  ;;  %v7378_v39 = vld [vmem:[%s9009_s9 + $0x28] sm:$0xff]  }
 0x401   :  { %6221 = vmatpush3.bf16.msra.mxu0 %v7343_v37  ;;  %6243 = vmatpush3.bf16.msra.mxu1 %v7344_v38  ;;  %v7376_v37 = vld [vmem:[%s9009_s9 + $0x18] sm:$0xff]   ;;  %v7377_v38 = vld [vmem:[%s9009_s9 + $0x20] sm:$0xff]  }
 0x402   :  { %6222 = vmatprep.subr.bf16.mxu0 %v7345_v41  ;;  %6244 = vmatprep.subr.bf16.mxu1 %v7346_v42  ;;  %v7385_v41 = vld [vmem:[%s9020_s15 + $0x28] sm:$0xff] }
 0x403   :  { %v5402_v42 = vrot.slane %v7385_v41, 4 }
 0x405   :  { %6223 = vmatpush3.bf16.msra.mxu0 %v7347_v43  ;;  %6245 = vmatpush3.bf16.msra.mxu1 %v7348_v44  ;;  %v7379_v43 = vld [vmem:[%s9009_s9 + $0x30] sm:$0xff]   ;;  %v5404_v44 = vunpack.c.l.bf16 %v5402_v42 }
 0x406   :  { %6224 = vmatprep.subr.bf16.mxu0 %v7349_v45  ;;  %6246 = vmatprep.subr.bf16.mxu1 %v7350_v46  ;;  %v7380_v45 = vld [vmem:[%s9009_s9 + $0x38] sm:$0xff]   ;;  %v6205_v46 = vld [vmem:[%s9012_s12] ss:$0 sm:$0xff] }
 0x409   :  { %6225 = vmatpush3.bf16.msra.mxu0 %v7351_v47  ;;  %6247 = vmatpush3.bf16.msra.mxu1 %v7352_v48  ;;  %v6209_v47 = vld [vmem:[%s9012_s12 + $0x2] ss:$0 sm:$0xff]  ;;  %v6206_v48 = vld [vmem:[%s9012_s12 + $0x1] ss:$0 sm:$0xff] }
 0x40a   :  { %6226 = vmatprep.subr.bf16.mxu0 %v7353_v24  ;;  %6248 = vmatprep.subr.bf16.mxu1 %v7354_v49  ;;  %v5410_v24 = vmul.f32 %v6205_v46, %v5404_v44  ;;  %v5442_v49 = vmul.f32 %v6209_v47, %v5404_v44 }
 0x40c   :  { %5411 = vadd.xlane.f32.xlu0 %v5410_v24  ;;  %5443 = vadd.xlane.f32.xlu1 %v5442_v49 }
 0x40d   :  { %6227 = vmatpush3.bf16.msra.mxu0 %v7355_v50  ;;  %6249 = vmatpush3.bf16.msra.mxu1 %v7356_v51  ;;  %v6212_v50 = vld [vmem:[%s9012_s12 + $0x3] ss:$0 sm:$0xff]  ;;  %v5426_v51 = vmul.f32 %v6206_v48, %v5404_v44  ;;  %v5482_v48 = vstv %s6217_s26 }
 0x40e   :  { %6228 = vmatprep.subr.bf16.mxu0 %v7357_v52  ;;  %6250 = vmatprep.subr.bf16.mxu1 %v7358_v53  ;;  %v5458_v52 = vmul.f32 %v6212_v50, %v5404_v44  ;;  %v6215_v53 = vld [vmem:[%s9012_s12 + $0x4] ss:$0 sm:$0xff] }
 0x410   :  { %5427 = vadd.xlane.f32.xlu0 %v5426_v51  ;;  %5459 = vadd.xlane.f32.xlu1 %v5458_v52  ;;  %v6218_v51 = vld [vmem:[#allocation2] ss:$0 sm:$0xff] }
 0x411   :  { %6229 = vmatpush3.bf16.msra.mxu0 %v7359_v54  ;;  %6251 = vmatpush3.bf16.msra.mxu1 %v7360_v25  ;;  %v5474_v54 = vmul.f32 %v6215_v53, %v5404_v44 }
 0x412   :  { %6230 = vmatprep.subr.bf16.mxu0 %v7361_v55  ;;  %6252 = vmatprep.subr.bf16.mxu1 %v7362_v56  ;;  %v6162_v56 = vld [vmem:[%s9008_s8] ss:$0 sm:$0xff] }
 0x414   :  { %5475 = vadd.xlane.f32.xlu0 %v5474_v54 }
 0x415   :  { %6231 = vmatpush3.bf16.msra.mxu0 %v7363_v57  ;;  %6253 = vmatpush3.bf16.msra.mxu1 %v7364_v58 }
 0x416   :  { %6232 = vmatprep.subr.bf16.mxu0 %v7365_v31  ;;  %6254 = vmatprep.subr.bf16.mxu1 %v7366_v59 }
 0x419   :  { %6233 = vmatpush3.bf16.msra.mxu0 %v7367_v60  ;;  %6255 = vmatpush3.bf16.msra.mxu1 %v7368_v61 }
 0x41a   :  { %6234 = vmatprep.subr.bf16.mxu0 %v7369_v62  ;;  %6256 = vmatprep.subr.bf16.mxu1 %v7370_v0 }
 0x41d   :  { %6235 = vmatpush3.bf16.msra.mxu0 %v7371_v1  ;;  %6257 = vmatpush3.bf16.msra.mxu1 %v7372_v2 }
 0x41e   :  { %6273 = vmatprep.subr.bf16.mxu0 %v7468_v3 }
 0x4d3   :  { %v4826_v10 = vpop.f32.mrb[8].mxu0  ;;  %v4908_v11 = vpop.f32.mrb[8].mxu1 }
 0x4d4   :  { %v6301_v13 = vadd.f32 %v4826_v10, %v4094_v6  ;;  %v6303_v14 = vadd.f32 %v4908_v11, %v4102_v7  ;;  %v4828_v16 = vpop.f32.mrb[9].mxu0  ;;  %v4910_v12 = vpop.f32.mrb[9].mxu1  ;;  %v6195_v7 = vld [vmem:[%s9010_s10] ss:$0 sm:$0xff]  ;;  %s6208_s10 = sld [smem:[#allocation9 + $0x1]] }
 0x4d5   :  { %v6302_v18 = vadd.f32 %v4828_v16, %v4098_v8  ;;  %v6304_v15 = vadd.f32 %v4910_v12, %v4106_v9  ;;  %v4830_v20 = vpop.f32.mrb[10].mxu0  ;;  %v4912_v21 = vpop.f32.mrb[10].mxu1  ;;  %v6204_v16 = vld [vmem:[%s9011_s11] ss:$0 sm:$0xff]  ;;  %s6214_s11 = sld [smem:[#allocation9 + $0x3]] }
 0x4d6   :  { %vm4915_vm8 = vcmp.ge.f32.partialorder %v6301_v13, 0.0  ;;  %v4919_v22 = vmul.f32 0.01, %v6301_v13  ;;  %vm4917_vm9 = vcmp.ge.f32.partialorder %v6303_v14, 0.0  ;;  %v4921_v17 = vmul.f32 0.01, %v6303_v14 }
 0x4d7   :  { %vm4916_vm10 = vcmp.ge.f32.partialorder %v6302_v18, 0.0  ;;  %v4920_v40 = vmul.f32 0.01, %v6302_v18  ;;  %vm4918_vm11 = vcmp.ge.f32.partialorder %v6304_v15, 0.0  ;;  %v4922_v26 = vmul.f32 0.01, %v6304_v15 }
 0x4d8   :  { %v4923_v23 = vsel %vm4915_vm8, %v6301_v13, %v4919_v22  ;;  %v4925_v27 = vsel %vm4917_vm9, %v6303_v14, %v4921_v17  ;;  %v4831_v28 = vpop.f32.mrb[11].mxu0  ;;  %v4913_v29 = vpop.f32.mrb[11].mxu1  ;;  %v5414_v20 = vstv %s5413_s4  ;;  %v5430_v21 = vstv %s6207_s25 }
 0x4d9   :  { %v4924_v30 = vsel %vm4916_vm10, %v6302_v18, %v4920_v40  ;;  %v4926_v19 = vsel %vm4918_vm11, %v6304_v15, %v4922_v26  ;;  %v4927_v34 = vpack.c.bf16 %v4923_v23, %v4923_v23  ;;  %v4929_v4 = vpack.c.bf16 %v4925_v27, %v4925_v27  ;;  %v5412_v15 = vpop.xlane.xlu0 %5411  ;;  %v5444_v17 = vpop.xlane.xlu1 %5443 }
 0x4da   :  { %v4928_v32 = vpack.c.bf16 %v4924_v30, %v4924_v30  ;;  %v4930_v33 = vpack.c.bf16 %v4926_v19, %v4926_v19  ;;  %v5415_v40 = vadd.f32 %v5414_v20, %v5412_v15  ;;  %v5446_v23 = vstv %s6210_s5 }
 0x4db   :  { %v5447_v28 = vadd.f32 %v5446_v23, %v5444_v17  ;;  %v5418_v30 = vstv %s5417_s14  ;;  %v5434_v19 = vstv %s6208_s10  ;;  %v5466_v44 = vstv %s6214_s11 }
 0x4dc   :  { %5226 = vmatprep.mubr.bf16.mxu0 %v4928_v32  ;;  %5266 = vmatprep.mubr.bf16.mxu1 %v4930_v33  ;;  %v5416_v27 = vmax.f32 %v5415_v40, 0.0  ;;  %v5462_v32 = vstv %s6213_s17 }
 0x4dd   :  { %5227 = vmatmul.mubr.bf16.vlgmr.msra.gmra.mrb[12].mxu0 %v4927_v34  ;;  %5267 = vmatmul.mubr.bf16.vlgmr.msra.gmra.mrb[12].mxu1 %v4929_v4  ;;  %v5428_v22 = vpop.xlane.xlu0 %5427  ;;  %v5460_v33 = vpop.xlane.xlu1 %5459  ;;  %v5448_v34 = vmax.f32 %v5447_v28, 0.0 }
 0x4de   :  { %6274 = vmatpush3.bf16.msra.mxu0 %v7373_v63  ;;  %6289 = vmatprep.mubr.msk.bf16.mxu0 %vm7469_vm12, %v7468_v3  ;;  %v5431_v26 = vadd.f32 %v5430_v21, %v5428_v22  ;;  %v5419_v63 = vmul.f32 %v5418_v30, %v5416_v27 }
 0x4df   :  { %6275 = vmatprep.subr.bf16.mxu0 %v7468_v3 }
 0x4e0   :  { %v5432_v29 = vmax.f32 %v5431_v26, 0.0 }
 0x4e2   :  { %6276 = vmatpush3.bf16.msra.mxu0 %v7374_v35  ;;  %v5435_v4 = vmul.f32 %v5434_v19, %v5432_v29  ;;  %v5463_v35 = vadd.f32 %v5462_v32, %v5460_v33 }
 0x4e3   :  { %6277 = vmatprep.subr.bf16.mxu0 %v7468_v3 }
 0x4e4   :  { %v5436_v41 = vadd.f32 %v5435_v4, %v5419_v63  ;;  %v5464_v42 = vmax.f32 %v5463_v35, 0.0 }
 0x4e6   :  { %6278 = vmatpush3.bf16.msra.mxu0 %v7375_v36  ;;  %v5450_v36 = vstv %s6211_s18 }
 0x4e7   :  { %6279 = vmatprep.subr.bf16.mxu0 %v7468_v3 }
 0x4ea   :  { %6280 = vmatpush3.bf16.msra.mxu0 %v7376_v37  ;;  %v5478_v37 = vstv %s6216_s22 }
 0x4eb   :  { %6281 = vmatprep.subr.bf16.mxu0 %v7468_v3 }
 0x4ee   :  { %6282 = vmatpush3.bf16.msra.mxu0 %v7377_v38  ;;  %v5476_v38 = vpop.xlane.xlu0 %5475 }
 0x4ef   :  { %6283 = vmatprep.subr.bf16.mxu0 %v7468_v3 }
 0x4f2   :  { %6284 = vmatpush3.bf16.msra.mxu0 %v7378_v39  ;;  %v5451_v39 = vmul.f32 %v5450_v36, %v5448_v34 }
 0x4f3   :  { %6285 = vmatprep.subr.bf16.mxu0 %v7468_v3 }
 0x4f4   :  { %v5452_v47 = vadd.f32 %v5451_v39, %v5436_v41 }
 0x4f6   :  { %6286 = vmatpush3.bf16.msra.mxu0 %v7379_v43  ;;  %v5479_v43 = vadd.f32 %v5478_v37, %v5476_v38 }
 0x4f7   :  { %6287 = vmatprep.subr.bf16.mxu0 %v7468_v3 }
 0x4f8   :  { %v5480_v46 = vmax.f32 %v5479_v43, 0.0 }
 0x4fa   :  { %6288 = vmatpush3.bf16.msra.mxu0 %v7380_v45  ;;  %v5467_v45 = vmul.f32 %v5466_v44, %v5464_v42  ;;  %v5483_v24 = vmul.f32 %v5482_v48, %v5480_v46 }
 0x4fc   :  { %v5468_v49 = vadd.f32 %v5467_v45, %v5452_v47 }
 0x4fe   :  { %v5484_v50 = vadd.f32 %v5483_v24, %v5468_v49 }
 0x5b0   :  { %v6236_v25 = vpop.f32.mrb[12].mxu0  ;;  %v6258_v55 = vpop.f32.mrb[12].mxu1 }
 0x5b1   :  { %v6237_v57 = vpop.f32.mrb[13].mxu0  ;;  %v6259_v58 = vpop.f32.mrb[13].mxu1 }
 0x5b2   :  { %v6238_v31 = vadd.f32 %v6237_v57, %v6236_v25  ;;  %v6260_v59 = vadd.f32 %v6259_v58, %v6258_v55  ;;  %v6239_v60 = vpop.f32.mrb[14].mxu0  ;;  %v6261_v61 = vpop.f32.mrb[14].mxu1 }
 0x5b3   :  { %v6240_v62 = vpop.f32.mrb[15].mxu0  ;;  %v6262_v0 = vpop.f32.mrb[15].mxu1 }
 0x5b4   :  { %v5229_v1 = vadd.f32 %v6238_v31, %v6162_v56 }
 0x5b6   :  { %v5269_v2 = vadd.f32 %v6260_v59, %v5229_v1 }
 0x5b8   :  { %vm5274_vm13 = vcmp.ge.f32.partialorder %v5269_v2, 0.0  ;;  %v5275_v3 = vmul.f32 0.01, %v5269_v2 }
 0x5ba   :  { %v5276_v5 = vsel %vm5274_vm13, %v5269_v2, %v5275_v3 }
 0x5bb   :  { %v5277_v6 = vpack.c.bf16 %v5276_v5, %v5276_v5 }
 0x5bd   :  { %6290 = vmatmul.mubr.bf16.vlgmr.msra.gmra.mrb[16].mxu0 %v5277_v6 }
 0x690   :  { %v5383_v8 = vpop.f32.mrb[16].mxu0 }
 0x691   :  { %v5384_v9 = vadd.f32 %v6195_v7, %v5383_v8  ;;  %v6291_v10 = vpop.f32.mrb[17].mxu0 }
 0x692   :  { %v5386_v11 = vpop.f32.mrb[18].mxu0 }
 0x693   :  { %v5390_v13 = vmul.f32 0.01, %v5384_v9  ;;  %v6292_v14 = vpop.f32.mrb[19].mxu0  ;;  %vm5389_vm14 = vcmp.ge.f32.partialorder %v5384_v9, 0.0 }
 0x695   :  { %v5391_v12 = vsel %vm5389_vm14, %v5384_v9, %v5390_v13 }
 0x696   :  { %v5399_v18 = vmul.f32 %v6204_v16, %v5391_v12 }
 0x698   :  { %5400 = vadd.xlane.f32.xlu1 %v5399_v18 }
 0x725   :  { %v5401_v52 = vpop.xlane.xlu1 %5400 }
 0x726   :  { %v5485_v53 = vadd.f32 %v5484_v50, %v5401_v52 }
 0x728   :  { %v5493_v54 = vadd.f32 %v6218_v51, %v5485_v53 }
 0x72a   :  { %v6219_v25 = vmul.f32 -1.442695, %v5493_v54 }
 0x72c   :  { %7381 = vpow2.f32 %v6219_v25 }
 0x736   :  { %v7382_v55 = vpop.eup %7381 }
 0x737   :  { %v5497_v56 = vadd.f32 1.0, %v7382_v55 }
 0x739   :  { %7383 = vrcp.f32 %v5497_v56 }
 0x743   :  { %v7384_v57 = vpop.eup %7383 }
 0x744   :  { %5501 = vst.msk [vmem:[%s9021_s29] sm:$0xff] %vm5500_vm15, %v7384_v57 }
 0x745   :  { %5506 = vsyncpa [#allocation4], 1 }
 0x746   :  { %5507 = vsyncpa [#allocation7], 1 }
 0x747   :  { %5508 = vsyncpa [#allocation5], 1 }
 0x748   :  { %5509 = vsyncpa [#allocation10], 1 }

</bundles_post_ra>
